<compile_context>
chip_gen: v7x
topology: tpu7x:2x2x1
jax: 0.10.0
libtpu: 0.0.40
codegen_flags: <defaults>
</compile_context>

<pallas_src>
import functools

import jax
import jax.numpy as jnp
from jax import lax
from jax.experimental import pallas as pl
from jax.experimental.pallas import tpu as pltpu


def _round_up(x, m):
    return (x + m - 1) // m * m


# ----------------------------------------------------------------------------
# Fused kernel: embedding gather -> nlayers x LSTM -> scorer, all in VMEM.
#
# Gate layout: the 4 LSTM gates live in ONE lane tile of width G = 4*H, column
# order [f | i | o | g].  h and c occupy lanes [0, H) of a (Bp, G) tile (zero
# elsewhere) so every matmul contraction and every store is lane-dense.
# Gate alignment for the c/h update uses two XLU rolls whose result is
# independent of the roll sign convention:
#     rolled = roll(act, 2H)   -> [o | g | f | i]          (half-width swap)
#     p      = act * rolled    -> i*g lands in blocks 1 AND 3
#     ig     = roll(p, H)      -> block 0 = i*g either way
# ----------------------------------------------------------------------------
def _fused_unilstm_kernel(*refs, T, Bp, H, G, nlayers):
    tok_ref, len_ref, emb_ref, wsc_ref, bsc_ref = refs[:5]
    layer_refs = refs[5:5 + 3 * nlayers]
    hs_ref, hN_ref, cN_ref, sc_ref = refs[5 + 3 * nlayers:5 + 3 * nlayers + 4]
    gx_scr, hs_scr = refs[-2:]

    TB = T * Bp
    lane = lax.broadcasted_iota(jnp.int32, (Bp, G), 1)
    g_mask = lane >= 3 * H            # tanh gate (block 3)
    h_mask = lane < H                 # lanes that carry h / c

    # --- fused embedding gather: one-hot matmul on the MXU (tiny vocab) -----
    vocab_lane = lax.broadcasted_iota(jnp.int32, (TB, emb_ref.shape[0]), 1)
    onehot = (tok_ref[...] == vocab_lane).astype(jnp.float32)
    x0 = jnp.dot(onehot, emb_ref[...], preferred_element_type=jnp.float32)

    lens = len_ref[...]               # (Bp, 1) int32
    h = None
    for l in range(nlayers):
        wih, whh, bias = layer_refs[3 * l:3 * l + 3]
        xin = x0 if l == 0 else hs_scr[...]

        # Hoisted input projection: one MXU matmul over all T*Bp rows.
        gx_scr[...] = jnp.dot(xin.astype(jnp.bfloat16), wih[...],
                              preferred_element_type=jnp.float32) + bias[...]

        dst = hs_ref if l == nlayers - 1 else hs_scr
        h = jnp.zeros((Bp, G), jnp.float32)       # loop-carried in vregs
        c = jnp.zeros((Bp, G), jnp.float32)

        for t in range(T):                        # T small & static -> unroll
            pre = gx_scr[t * Bp:(t + 1) * Bp, :] + jnp.dot(
                h.astype(jnp.bfloat16), whh[...],
                preferred_element_type=jnp.float32)           # (Bp, G)
            act = jnp.where(g_mask, jnp.tanh(pre), jax.nn.sigmoid(pre))
            rolled = pltpu.roll(act, 2 * H, axis=1)           # [o|g|f|i]
            ig = pltpu.roll(act * rolled, H, axis=1)          # i*g -> block 0
            c_full = act * c + ig                             # f*c + i*g
            h_full = rolled * jnp.tanh(c_full)                # o * tanh(c')
            c_new = jnp.where(h_mask, c_full, 0.0)            # keep lanes >= H zero
            h_new = jnp.where(h_mask, h_full, 0.0)

            valid = t < lens                                  # (Bp, 1) bool
            h = jnp.where(valid, h_new, h)                    # hold past length
            c = jnp.where(valid, c_new, c)
            dst[t * Bp:(t + 1) * Bp, :] = jnp.where(valid, h_new, 0.0)

        hN_ref[l] = h                                         # write once per layer
        cN_ref[l] = c
        # inter-layer dropout = identity (eval mode)

    # --- fused scorer head: lane-dense (Bp, NLp) store -----------------------
    sc_ref[...] = jnp.dot(h, wsc_ref[...],
                          preferred_element_type=jnp.float32) + bsc_ref[...]


def _fused_call(tok_flat, len_p, params, *, T, Bp, H, G, nlayers, nlabels_p):
    vmem = pl.BlockSpec(memory_space=pltpu.MemorySpace.VMEM)
    kernel = functools.partial(_fused_unilstm_kernel, T=T, Bp=Bp, H=H, G=G,
                               nlayers=nlayers)
    args = [tok_flat, len_p, params["embedding"], params["w_sc"], params["b_sc"]]
    for layer in params["layers"]:
        args += [layer["w_ih"], layer["w_hh"], layer["b"]]
    n_in = len(args)
    return pl.pallas_call(
        kernel,
        out_shape=(jax.ShapeDtypeStruct((T * Bp, G), jnp.float32),        # hs (top layer)
                   jax.ShapeDtypeStruct((nlayers, Bp, G), jnp.float32),   # h_n
                   jax.ShapeDtypeStruct((nlayers, Bp, G), jnp.float32),   # c_n
                   jax.ShapeDtypeStruct((Bp, nlabels_p), jnp.float32)),   # scores
        in_specs=[vmem] * n_in,
        out_specs=(vmem, vmem, vmem, vmem),
        scratch_shapes=[pltpu.VMEM((T * Bp, G), jnp.float32),   # hoisted x-gates
                        pltpu.VMEM((T * Bp, G), jnp.float32)],  # inter-layer hidden seq
    )(*args)


# ----------------------------------------------------------------------------
# JAX glue (only tiny int preprocessing + output slicing remain outside).
# ----------------------------------------------------------------------------
def unilstm_forward(params, token_ids, lengths, *, hidden_size, nlabels):
    """Forward pass of UniLSTMModel (eval mode, bidirect=False)."""
    H = hidden_size
    G = 4 * H
    nlayers = len(params["layers"])
    nlabels_p = params["w_sc"].shape[1]
    B, T = token_ids.shape
    Bp = _round_up(B, 8)

    # sort_tensors / resort_tensors = permutation + inverse -> no-op.
    tok = jnp.pad(token_ids.T.astype(jnp.int32), ((0, 0), (0, Bp - B)))
    tok = tok.reshape(T * Bp, 1)                                   # time-major rows
    len_p = jnp.pad(lengths.astype(jnp.int32), (0, Bp - B)).reshape(Bp, 1)

    hs, hN, cN, scores = _fused_call(tok, len_p, params, T=T, Bp=Bp, H=H, G=G,
                                     nlayers=nlayers, nlabels_p=nlabels_p)

    rec_output = jnp.transpose(hs.reshape(T, Bp, G)[:, :B, :H], (1, 0, 2))  # (B,T,H)
    h_n = hN[:, :B, :H]                                             # (nlayers, B, H)
    c_n = cN[:, :B, :H]
    decoded_scores = scores[:B, :nlabels]
    return decoded_scores, (h_n, c_n), rec_output


# ----------------------------------------------------------------------------
# Deterministic parameter construction (shapes follow the nn.Module __init__),
# stored pre-transposed, gate-reordered to [f|i|o|g], padded & cast for the
# single-lane-tile gate layout.
# ----------------------------------------------------------------------------
def _pack_gates(w, H, rows_to):
    """(R, 4H) with torch gate order [i|f|g|o] -> columns reordered to
    [f|i|o|g], rows zero-padded to rows_to."""
    R = w.shape[0]
    w = w.reshape(R, 4, H)[:, jnp.array([1, 0, 3, 2]), :].reshape(R, 4 * H)
    return jnp.pad(w, ((0, rows_to - R), (0, 0)))


def make_params(key, ntokens, emb_size, hidden_size, nlayers, nlabels):
    H = hidden_size                     # UniLSTM (bidirect=False): rec_size == hidden
    G = 4 * H
    assert G % 128 == 0, "gate packing assumes 4*hidden is a multiple of 128"
    Ep = _round_up(emb_size, 128)       # lane-padded embedding width
    Vp = _round_up(ntokens, 128)        # lane-padded vocab (one-hot contraction)
    NLp = _round_up(nlabels, 128)

    keys = iter(jax.random.split(key, 4 * nlayers + 4))

    def u(shape, scale):
        return jax.random.uniform(next(keys), shape, jnp.float32, -scale, scale)

    params = {"layers": []}
    # Frozen GloVe embedding in the original; deterministic random stand-in.
    emb = 0.1 * jax.random.normal(next(keys), (ntokens, emb_size), jnp.float32)
    params["embedding"] = jnp.pad(emb, ((0, Vp - ntokens), (0, Ep - emb_size)))

    k = 1.0 / float(H) ** 0.5
    in_size, in_rows = emb_size, Ep
    for _ in range(nlayers):
        w_ih = u((in_size, 4 * H), k)             # stored transposed: (in, 4H)
        w_hh = u((H, 4 * H), k)                   # (H, 4H)
        bias = u((4 * H,), k) + u((4 * H,), k)    # b_ih + b_hh
        params["layers"].append({
            "w_ih": _pack_gates(w_ih, H, rows_to=in_rows).astype(jnp.bfloat16),
            "w_hh": _pack_gates(w_hh, H, rows_to=G).astype(jnp.bfloat16),
            "b":    _pack_gates(bias[None, :], H, rows_to=1),          # f32
        })
        in_size, in_rows = H, G                   # deeper layers read (Bp,G) hiddens

    # scorer_layer: Linear(hidden, nlabels), weight ~ U(-0.1, 0.1), zero bias.
    w_sc = u((hidden_size, nlabels), 0.1)
    params["w_sc"] = jnp.pad(w_sc, ((0, G - hidden_size), (0, NLp - nlabels)))
    params["b_sc"] = jnp.zeros((1, NLp), jnp.float32)
    return params


if __name__ == "__main__":
    NTOKENS, EMB, HIDDEN, NLAYERS, NLABELS = 100, 32, 32, 2, 5
    B, T = 4, 8

    key = jax.random.PRNGKey(0)
    k_params, k_tok = jax.random.split(key)
    params = make_params(k_params, NTOKENS, EMB, HIDDEN, NLAYERS, NLABELS)

    token_ids = jax.random.randint(k_tok, (B, T), 1, NTOKENS, dtype=jnp.int32)
    lengths = jnp.array([8, 5, 3, 6], dtype=jnp.int32)
    # zero out padding positions (as a padded batch would have)
    token_ids = token_ids * (jnp.arange(T)[None, :] < lengths[:, None]).astype(jnp.int32)

    fwd = jax.jit(functools.partial(unilstm_forward,
                                    hidden_size=HIDDEN, nlabels=NLABELS))
    scores, (h_n, c_n), rec_output = jax.block_until_ready(
        fwd(params, token_ids, lengths))

    assert scores.shape == (B, NLABELS)
    assert h_n.shape == (NLAYERS, B, HIDDEN)
    assert c_n.shape == (NLAYERS, B, HIDDEN)
    assert rec_output.shape == (B, T, HIDDEN)
    # pad_packed_sequence semantics: padded timesteps of rec_output are exactly zero
    t_idx = jnp.arange(T)[None, :, None]
    assert bool(jnp.all(jnp.where(t_idx >= lengths[:, None, None],
                                  rec_output == 0.0, True)))
    assert bool(jnp.all(jnp.isfinite(scores)))
    assert bool(jnp.all(jnp.isfinite(rec_output)))
    print("KERNEL_OK")
</pallas_src>

<mosaic_0001>
module attributes {stable_mosaic.version = 11 : i64} {
  func.func @_fused_unilstm_kernel(%arg0: memref<64x1xi32, #tpu.memory_space<vmem>>, %arg1: memref<8x1xi32, #tpu.memory_space<vmem>>, %arg2: memref<128x128xf32, #tpu.memory_space<vmem>>, %arg3: memref<128x128xf32, #tpu.memory_space<vmem>>, %arg4: memref<1x128xf32, #tpu.memory_space<vmem>>, %arg5: memref<128x128xbf16, #tpu.memory_space<vmem>>, %arg6: memref<128x128xbf16, #tpu.memory_space<vmem>>, %arg7: memref<1x128xf32, #tpu.memory_space<vmem>>, %arg8: memref<128x128xbf16, #tpu.memory_space<vmem>>, %arg9: memref<128x128xbf16, #tpu.memory_space<vmem>>, %arg10: memref<1x128xf32, #tpu.memory_space<vmem>>, %arg11: memref<64x128xf32, #tpu.memory_space<vmem>>, %arg12: memref<2x8x128xf32, #tpu.memory_space<vmem>>, %arg13: memref<2x8x128xf32, #tpu.memory_space<vmem>>, %arg14: memref<8x128xf32, #tpu.memory_space<vmem>>, %arg15: memref<64x128xf32, #tpu.memory_space<vmem>>, %arg16: memref<64x128xf32, #tpu.memory_space<vmem>>) attributes {dimension_semantics = [], scalar_prefetch = 0 : i64, scratch_operands = 2 : i64, tpu.core_type = #tpu.core_type<tc>} {
    %0 = tpu.iota {dimensions = array<i32: 1>} : vector<8x128xi32>
    %c96_i32 = arith.constant 96 : i32
    %1 = vector.broadcast %c96_i32 : i32 to vector<8x128xi32>
    %2 = arith.cmpi sge, %0, %1 : vector<8x128xi32>
    %c32_i32 = arith.constant 32 : i32
    %3 = vector.broadcast %c32_i32 : i32 to vector<8x128xi32>
    %4 = arith.cmpi slt, %0, %3 : vector<8x128xi32>
    %5 = tpu.iota {dimensions = array<i32: 1>} : vector<64x128xi32>
    %c0 = arith.constant 0 : index
    %c0_0 = arith.constant 0 : index
    %6 = vector.load %arg0[%c0, %c0_0] : memref<64x1xi32, #tpu.memory_space<vmem>>, vector<64x1xi32>
    %7 = vector.broadcast %6 : vector<64x1xi32> to vector<64x128xi32>
    %8 = arith.cmpi eq, %7, %5 : vector<64x128xi32>
    %9 = arith.extui %8 : vector<64x128xi1> to vector<64x128xi32>
    %10 = arith.sitofp %9 : vector<64x128xi32> to vector<64x128xf32>
    %c0_1 = arith.constant 0 : index
    %c0_2 = arith.constant 0 : index
    %11 = vector.load %arg2[%c0_1, %c0_2] : memref<128x128xf32, #tpu.memory_space<vmem>>, vector<128x128xf32>
    %cst = arith.constant dense<0.000000e+00> : vector<64x128xf32>
    %12 = tpu.matmul %10, %11, %cst {dimension_numbers = #tpu.dot_dimension_numbers<[1], [0], [0], [1], [0, 0, 1, 1], [], []>} : vector<64x128xf32>, vector<128x128xf32>, vector<64x128xf32> -> vector<64x128xf32>
    %c0_3 = arith.constant 0 : index
    %c0_4 = arith.constant 0 : index
    %13 = vector.load %arg1[%c0_3, %c0_4] : memref<8x1xi32, #tpu.memory_space<vmem>>, vector<8x1xi32>
    %14 = arith.truncf %12 : vector<64x128xf32> to vector<64x128xbf16>
    %c0_5 = arith.constant 0 : index
    %c0_6 = arith.constant 0 : index
    %15 = vector.load %arg5[%c0_5, %c0_6] : memref<128x128xbf16, #tpu.memory_space<vmem>>, vector<128x128xbf16>
    %cst_7 = arith.constant dense<0.000000e+00> : vector<64x128xf32>
    %16 = tpu.matmul %14, %15, %cst_7 {dimension_numbers = #tpu.dot_dimension_numbers<[1], [0], [0], [1], [0, 0, 1, 1], [], []>} : vector<64x128xbf16>, vector<128x128xbf16>, vector<64x128xf32> -> vector<64x128xf32>
    %c0_8 = arith.constant 0 : index
    %c0_9 = arith.constant 0 : index
    %17 = vector.load %arg7[%c0_8, %c0_9] : memref<1x128xf32, #tpu.memory_space<vmem>>, vector<1x128xf32>
    %18 = vector.broadcast %17 : vector<1x128xf32> to vector<64x128xf32>
    %19 = arith.addf %16, %18 : vector<64x128xf32>
    %c0_10 = arith.constant 0 : index
    %c0_11 = arith.constant 0 : index
    %20 = vector.load %arg15[%c0_10, %c0_11] : memref<64x128xf32, #tpu.memory_space<vmem>>, vector<64x128xf32>
    tpu.vector_store %arg15[%c0_10, %c0_11], %19 {strides = array<i32>} : memref<64x128xf32, #tpu.memory_space<vmem>>, vector<64x128xf32>,
    %cst_12 = arith.constant 0.000000e+00 : f32
    %21 = vector.broadcast %cst_12 : f32 to vector<8x128xf32>
    %cst_13 = arith.constant 0.000000e+00 : f32
    %22 = vector.broadcast %cst_13 : f32 to vector<8x128xf32>
    %c0_14 = arith.constant 0 : index
    %c0_15 = arith.constant 0 : index
    %23 = vector.load %arg15[%c0_14, %c0_15] : memref<64x128xf32, #tpu.memory_space<vmem>>, vector<8x128xf32>
    %24 = arith.truncf %21 : vector<8x128xf32> to vector<8x128xbf16>
    %c0_16 = arith.constant 0 : index
    %c0_17 = arith.constant 0 : index
    %25 = vector.load %arg6[%c0_16, %c0_17] : memref<128x128xbf16, #tpu.memory_space<vmem>>, vector<128x128xbf16>
    %cst_18 = arith.constant dense<0.000000e+00> : vector<8x128xf32>
    %26 = tpu.matmul %24, %25, %cst_18 {dimension_numbers = #tpu.dot_dimension_numbers<[1], [0], [0], [1], [0, 0, 1, 1], [], []>} : vector<8x128xbf16>, vector<128x128xbf16>, vector<8x128xf32> -> vector<8x128xf32>
    %27 = arith.addf %23, %26 : vector<8x128xf32>
    %28 = math.tanh %27 : vector<8x128xf32>
    %29 = arith.negf %27 : vector<8x128xf32>
    %30 = math.exp %29 : vector<8x128xf32>
    %cst_19 = arith.constant 1.000000e+00 : f32
    %31 = vector.broadcast %cst_19 : f32 to vector<8x128xf32>
    %32 = arith.addf %31, %30 : vector<8x128xf32>
    %33 = arith.divf %31, %32 : vector<8x128xf32>
    %34 = arith.select %2, %28, %33 : vector<8x128xi1>, vector<8x128xf32>
    %c64_i32 = arith.constant 64 : i32
    %35 = tpu.dynamic_rotate %34 by %c64_i32 dim 1 : vector<8x128xf32>, i32 -> vector<8x128xf32>
    %36 = arith.mulf %34, %35 : vector<8x128xf32>
    %c32_i32_20 = arith.constant 32 : i32
    %37 = tpu.dynamic_rotate %36 by %c32_i32_20 dim 1 : vector<8x128xf32>, i32 -> vector<8x128xf32>
    %38 = arith.mulf %34, %22 : vector<8x128xf32>
    %39 = arith.addf %38, %37 : vector<8x128xf32>
    %40 = math.tanh %39 : vector<8x128xf32>
    %41 = arith.mulf %35, %40 : vector<8x128xf32>
    %cst_21 = arith.constant 0.000000e+00 : f32
    %42 = vector.broadcast %cst_21 : f32 to vector<8x128xf32>
    %43 = arith.select %4, %39, %42 : vector<8x128xi1>, vector<8x128xf32>
    %cst_22 = arith.constant 0.000000e+00 : f32
    %44 = vector.broadcast %cst_22 : f32 to vector<8x128xf32>
    %45 = arith.select %4, %41, %44 : vector<8x128xi1>, vector<8x128xf32>
    %c0_i32 = arith.constant 0 : i32
    %46 = vector.broadcast %c0_i32 : i32 to vector<8x1xi32>
    %47 = arith.cmpi sgt, %13, %46 : vector<8x1xi32>
    %48 = vector.shape_cast %47 : vector<8x1xi1> to vector<8x1xi1>
    %49 = vector.broadcast %48 : vector<8x1xi1> to vector<8x128xi1>
    %50 = arith.select %49, %45, %21 : vector<8x128xi1>, vector<8x128xf32>
    %51 = vector.shape_cast %47 : vector<8x1xi1> to vector<8x1xi1>
    %52 = vector.broadcast %51 : vector<8x1xi1> to vector<8x128xi1>
    %53 = arith.select %52, %43, %22 : vector<8x128xi1>, vector<8x128xf32>
    %cst_23 = arith.constant 0.000000e+00 : f32
    %54 = vector.shape_cast %47 : vector<8x1xi1> to vector<8x1xi1>
    %55 = vector.broadcast %54 : vector<8x1xi1> to vector<8x128xi1>
    %56 = vector.broadcast %cst_23 : f32 to vector<8x128xf32>
    %57 = arith.select %55, %45, %56 : vector<8x128xi1>, vector<8x128xf32>
    %c0_24 = arith.constant 0 : index
    %c0_25 = arith.constant 0 : index
    %58 = vector.load %arg16[%c0_24, %c0_25] : memref<64x128xf32, #tpu.memory_space<vmem>>, vector<8x128xf32>
    tpu.vector_store %arg16[%c0_24, %c0_25], %57 {strides = array<i32>} : memref<64x128xf32, #tpu.memory_space<vmem>>, vector<8x128xf32>,
    %c8 = arith.constant 8 : index
    %c0_26 = arith.constant 0 : index
    %59 = vector.load %arg15[%c8, %c0_26] : memref<64x128xf32, #tpu.memory_space<vmem>>, vector<8x128xf32>
    %60 = arith.truncf %50 : vector<8x128xf32> to vector<8x128xbf16>
    %c0_27 = arith.constant 0 : index
    %c0_28 = arith.constant 0 : index
    %61 = vector.load %arg6[%c0_27, %c0_28] : memref<128x128xbf16, #tpu.memory_space<vmem>>, vector<128x128xbf16>
    %cst_29 = arith.constant dense<0.000000e+00> : vector<8x128xf32>
    %62 = tpu.matmul %60, %61, %cst_29 {dimension_numbers = #tpu.dot_dimension_numbers<[1], [0], [0], [1], [0, 0, 1, 1], [], []>} : vector<8x128xbf16>, vector<128x128xbf16>, vector<8x128xf32> -> vector<8x128xf32>
    %63 = arith.addf %59, %62 : vector<8x128xf32>
    %64 = math.tanh %63 : vector<8x128xf32>
    %65 = arith.negf %63 : vector<8x128xf32>
    %66 = math.exp %65 : vector<8x128xf32>
    %cst_30 = arith.constant 1.000000e+00 : f32
    %67 = vector.broadcast %cst_30 : f32 to vector<8x128xf32>
    %68 = arith.addf %67, %66 : vector<8x128xf32>
    %69 = arith.divf %67, %68 : vector<8x128xf32>
    %70 = arith.select %2, %64, %69 : vector<8x128xi1>, vector<8x128xf32>
    %c64_i32_31 = arith.constant 64 : i32
    %71 = tpu.dynamic_rotate %70 by %c64_i32_31 dim 1 : vector<8x128xf32>, i32 -> vector<8x128xf32>
    %72 = arith.mulf %70, %71 : vector<8x128xf32>
    %c32_i32_32 = arith.constant 32 : i32
    %73 = tpu.dynamic_rotate %72 by %c32_i32_32 dim 1 : vector<8x128xf32>, i32 -> vector<8x128xf32>
    %74 = arith.mulf %70, %53 : vector<8x128xf32>
    %75 = arith.addf %74, %73 : vector<8x128xf32>
    %76 = math.tanh %75 : vector<8x128xf32>
    %77 = arith.mulf %71, %76 : vector<8x128xf32>
    %cst_33 = arith.constant 0.000000e+00 : f32
    %78 = vector.broadcast %cst_33 : f32 to vector<8x128xf32>
    %79 = arith.select %4, %75, %78 : vector<8x128xi1>, vector<8x128xf32>
    %cst_34 = arith.constant 0.000000e+00 : f32
    %80 = vector.broadcast %cst_34 : f32 to vector<8x128xf32>
    %81 = arith.select %4, %77, %80 : vector<8x128xi1>, vector<8x128xf32>
    %c1_i32 = arith.constant 1 : i32
    %82 = vector.broadcast %c1_i32 : i32 to vector<8x1xi32>
    %83 = arith.cmpi sgt, %13, %82 : vector<8x1xi32>
    %84 = vector.shape_cast %83 : vector<8x1xi1> to vector<8x1xi1>
    %85 = vector.broadcast %84 : vector<8x1xi1> to vector<8x128xi1>
    %86 = arith.select %85, %81, %50 : vector<8x128xi1>, vector<8x128xf32>
    %87 = vector.shape_cast %83 : vector<8x1xi1> to vector<8x1xi1>
    %88 = vector.broadcast %87 : vector<8x1xi1> to vector<8x128xi1>
    %89 = arith.select %88, %79, %53 : vector<8x128xi1>, vector<8x128xf32>
    %cst_35 = arith.constant 0.000000e+00 : f32
    %90 = vector.shape_cast %83 : vector<8x1xi1> to vector<8x1xi1>
    %91 = vector.broadcast %90 : vector<8x1xi1> to vector<8x128xi1>
    %92 = vector.broadcast %cst_35 : f32 to vector<8x128xf32>
    %93 = arith.select %91, %81, %92 : vector<8x128xi1>, vector<8x128xf32>
    %c8_36 = arith.constant 8 : index
    %c0_37 = arith.constant 0 : index
    %94 = vector.load %arg16[%c8_36, %c0_37] : memref<64x128xf32, #tpu.memory_space<vmem>>, vector<8x128xf32>
    tpu.vector_store %arg16[%c8_36, %c0_37], %93 {strides = array<i32>} : memref<64x128xf32, #tpu.memory_space<vmem>>, vector<8x128xf32>,
    %c16 = arith.constant 16 : index
    %c0_38 = arith.constant 0 : index
    %95 = vector.load %arg15[%c16, %c0_38] : memref<64x128xf32, #tpu.memory_space<vmem>>, vector<8x128xf32>
    %96 = arith.truncf %86 : vector<8x128xf32> to vector<8x128xbf16>
    %c0_39 = arith.constant 0 : index
    %c0_40 = arith.constant 0 : index
    %97 = vector.load %arg6[%c0_39, %c0_40] : memref<128x128xbf16, #tpu.memory_space<vmem>>, vector<128x128xbf16>
    %cst_41 = arith.constant dense<0.000000e+00> : vector<8x128xf32>
    %98 = tpu.matmul %96, %97, %cst_41 {dimension_numbers = #tpu.dot_dimension_numbers<[1], [0], [0], [1], [0, 0, 1, 1], [], []>} : vector<8x128xbf16>, vector<128x128xbf16>, vector<8x128xf32> -> vector<8x128xf32>
    %99 = arith.addf %95, %98 : vector<8x128xf32>
    %100 = math.tanh %99 : vector<8x128xf32>
    %101 = arith.negf %99 : vector<8x128xf32>
    %102 = math.exp %101 : vector<8x128xf32>
    %cst_42 = arith.constant 1.000000e+00 : f32
    %103 = vector.broadcast %cst_42 : f32 to vector<8x128xf32>
    %104 = arith.addf %103, %102 : vector<8x128xf32>
    %105 = arith.divf %103, %104 : vector<8x128xf32>
    %106 = arith.select %2, %100, %105 : vector<8x128xi1>, vector<8x128xf32>
    %c64_i32_43 = arith.constant 64 : i32
    %107 = tpu.dynamic_rotate %106 by %c64_i32_43 dim 1 : vector<8x128xf32>, i32 -> vector<8x128xf32>
    %108 = arith.mulf %106, %107 : vector<8x128xf32>
    %c32_i32_44 = arith.constant 32 : i32
    %109 = tpu.dynamic_rotate %108 by %c32_i32_44 dim 1 : vector<8x128xf32>, i32 -> vector<8x128xf32>
    %110 = arith.mulf %106, %89 : vector<8x128xf32>
    %111 = arith.addf %110, %109 : vector<8x128xf32>
    %112 = math.tanh %111 : vector<8x128xf32>
    %113 = arith.mulf %107, %112 : vector<8x128xf32>
    %cst_45 = arith.constant 0.000000e+00 : f32
    %114 = vector.broadcast %cst_45 : f32 to vector<8x128xf32>
    %115 = arith.select %4, %111, %114 : vector<8x128xi1>, vector<8x128xf32>
    %cst_46 = arith.constant 0.000000e+00 : f32
    %116 = vector.broadcast %cst_46 : f32 to vector<8x128xf32>
    %117 = arith.select %4, %113, %116 : vector<8x128xi1>, vector<8x128xf32>
    %c2_i32 = arith.constant 2 : i32
    %118 = vector.broadcast %c2_i32 : i32 to vector<8x1xi32>
    %119 = arith.cmpi sgt, %13, %118 : vector<8x1xi32>
    %120 = vector.shape_cast %119 : vector<8x1xi1> to vector<8x1xi1>
    %121 = vector.broadcast %120 : vector<8x1xi1> to vector<8x128xi1>
    %122 = arith.select %121, %117, %86 : vector<8x128xi1>, vector<8x128xf32>
    %123 = vector.shape_cast %119 : vector<8x1xi1> to vector<8x1xi1>
    %124 = vector.broadcast %123 : vector<8x1xi1> to vector<8x128xi1>
    %125 = arith.select %124, %115, %89 : vector<8x128xi1>, vector<8x128xf32>
    %cst_47 = arith.constant 0.000000e+00 : f32
    %126 = vector.shape_cast %119 : vector<8x1xi1> to vector<8x1xi1>
    %127 = vector.broadcast %126 : vector<8x1xi1> to vector<8x128xi1>
    %128 = vector.broadcast %cst_47 : f32 to vector<8x128xf32>
    %129 = arith.select %127, %117, %128 : vector<8x128xi1>, vector<8x128xf32>
    %c16_48 = arith.constant 16 : index
    %c0_49 = arith.constant 0 : index
    %130 = vector.load %arg16[%c16_48, %c0_49] : memref<64x128xf32, #tpu.memory_space<vmem>>, vector<8x128xf32>
    tpu.vector_store %arg16[%c16_48, %c0_49], %129 {strides = array<i32>} : memref<64x128xf32, #tpu.memory_space<vmem>>, vector<8x128xf32>,
    %c24 = arith.constant 24 : index
    %c0_50 = arith.constant 0 : index
    %131 = vector.load %arg15[%c24, %c0_50] : memref<64x128xf32, #tpu.memory_space<vmem>>, vector<8x128xf32>
    %132 = arith.truncf %122 : vector<8x128xf32> to vector<8x128xbf16>
    %c0_51 = arith.constant 0 : index
    %c0_52 = arith.constant 0 : index
    %133 = vector.load %arg6[%c0_51, %c0_52] : memref<128x128xbf16, #tpu.memory_space<vmem>>, vector<128x128xbf16>
    %cst_53 = arith.constant dense<0.000000e+00> : vector<8x128xf32>
    %134 = tpu.matmul %132, %133, %cst_53 {dimension_numbers = #tpu.dot_dimension_numbers<[1], [0], [0], [1], [0, 0, 1, 1], [], []>} : vector<8x128xbf16>, vector<128x128xbf16>, vector<8x128xf32> -> vector<8x128xf32>
    %135 = arith.addf %131, %134 : vector<8x128xf32>
    %136 = math.tanh %135 : vector<8x128xf32>
    %137 = arith.negf %135 : vector<8x128xf32>
    %138 = math.exp %137 : vector<8x128xf32>
    %cst_54 = arith.constant 1.000000e+00 : f32
    %139 = vector.broadcast %cst_54 : f32 to vector<8x128xf32>
    %140 = arith.addf %139, %138 : vector<8x128xf32>
    %141 = arith.divf %139, %140 : vector<8x128xf32>
    %142 = arith.select %2, %136, %141 : vector<8x128xi1>, vector<8x128xf32>
    %c64_i32_55 = arith.constant 64 : i32
    %143 = tpu.dynamic_rotate %142 by %c64_i32_55 dim 1 : vector<8x128xf32>, i32 -> vector<8x128xf32>
    %144 = arith.mulf %142, %143 : vector<8x128xf32>
    %c32_i32_56 = arith.constant 32 : i32
    %145 = tpu.dynamic_rotate %144 by %c32_i32_56 dim 1 : vector<8x128xf32>, i32 -> vector<8x128xf32>
    %146 = arith.mulf %142, %125 : vector<8x128xf32>
    %147 = arith.addf %146, %145 : vector<8x128xf32>
    %148 = math.tanh %147 : vector<8x128xf32>
    %149 = arith.mulf %143, %148 : vector<8x128xf32>
    %cst_57 = arith.constant 0.000000e+00 : f32
    %150 = vector.broadcast %cst_57 : f32 to vector<8x128xf32>
    %151 = arith.select %4, %147, %150 : vector<8x128xi1>, vector<8x128xf32>
    %cst_58 = arith.constant 0.000000e+00 : f32
    %152 = vector.broadcast %cst_58 : f32 to vector<8x128xf32>
    %153 = arith.select %4, %149, %152 : vector<8x128xi1>, vector<8x128xf32>
    %c3_i32 = arith.constant 3 : i32
    %154 = vector.broadcast %c3_i32 : i32 to vector<8x1xi32>
    %155 = arith.cmpi sgt, %13, %154 : vector<8x1xi32>
    %156 = vector.shape_cast %155 : vector<8x1xi1> to vector<8x1xi1>
    %157 = vector.broadcast %156 : vector<8x1xi1> to vector<8x128xi1>
    %158 = arith.select %157, %153, %122 : vector<8x128xi1>, vector<8x128xf32>
    %159 = vector.shape_cast %155 : vector<8x1xi1> to vector<8x1xi1>
    %160 = vector.broadcast %159 : vector<8x1xi1> to vector<8x128xi1>
    %161 = arith.select %160, %151, %125 : vector<8x128xi1>, vector<8x128xf32>
    %cst_59 = arith.constant 0.000000e+00 : f32
    %162 = vector.shape_cast %155 : vector<8x1xi1> to vector<8x1xi1>
    %163 = vector.broadcast %162 : vector<8x1xi1> to vector<8x128xi1>
    %164 = vector.broadcast %cst_59 : f32 to vector<8x128xf32>
    %165 = arith.select %163, %153, %164 : vector<8x128xi1>, vector<8x128xf32>
    %c24_60 = arith.constant 24 : index
    %c0_61 = arith.constant 0 : index
    %166 = vector.load %arg16[%c24_60, %c0_61] : memref<64x128xf32, #tpu.memory_space<vmem>>, vector<8x128xf32>
    tpu.vector_store %arg16[%c24_60, %c0_61], %165 {strides = array<i32>} : memref<64x128xf32, #tpu.memory_space<vmem>>, vector<8x128xf32>,
    %c32 = arith.constant 32 : index
    %c0_62 = arith.constant 0 : index
    %167 = vector.load %arg15[%c32, %c0_62] : memref<64x128xf32, #tpu.memory_space<vmem>>, vector<8x128xf32>
    %168 = arith.truncf %158 : vector<8x128xf32> to vector<8x128xbf16>
    %c0_63 = arith.constant 0 : index
    %c0_64 = arith.constant 0 : index
    %169 = vector.load %arg6[%c0_63, %c0_64] : memref<128x128xbf16, #tpu.memory_space<vmem>>, vector<128x128xbf16>
    %cst_65 = arith.constant dense<0.000000e+00> : vector<8x128xf32>
    %170 = tpu.matmul %168, %169, %cst_65 {dimension_numbers = #tpu.dot_dimension_numbers<[1], [0], [0], [1], [0, 0, 1, 1], [], []>} : vector<8x128xbf16>, vector<128x128xbf16>, vector<8x128xf32> -> vector<8x128xf32>
    %171 = arith.addf %167, %170 : vector<8x128xf32>
    %172 = math.tanh %171 : vector<8x128xf32>
    %173 = arith.negf %171 : vector<8x128xf32>
    %174 = math.exp %173 : vector<8x128xf32>
    %cst_66 = arith.constant 1.000000e+00 : f32
    %175 = vector.broadcast %cst_66 : f32 to vector<8x128xf32>
    %176 = arith.addf %175, %174 : vector<8x128xf32>
    %177 = arith.divf %175, %176 : vector<8x128xf32>
    %178 = arith.select %2, %172, %177 : vector<8x128xi1>, vector<8x128xf32>
    %c64_i32_67 = arith.constant 64 : i32
    %179 = tpu.dynamic_rotate %178 by %c64_i32_67 dim 1 : vector<8x128xf32>, i32 -> vector<8x128xf32>
    %180 = arith.mulf %178, %179 : vector<8x128xf32>
    %c32_i32_68 = arith.constant 32 : i32
    %181 = tpu.dynamic_rotate %180 by %c32_i32_68 dim 1 : vector<8x128xf32>, i32 -> vector<8x128xf32>
    %182 = arith.mulf %178, %161 : vector<8x128xf32>
    %183 = arith.addf %182, %181 : vector<8x128xf32>
    %184 = math.tanh %183 : vector<8x128xf32>
    %185 = arith.mulf %179, %184 : vector<8x128xf32>
    %cst_69 = arith.constant 0.000000e+00 : f32
    %186 = vector.broadcast %cst_69 : f32 to vector<8x128xf32>
    %187 = arith.select %4, %183, %186 : vector<8x128xi1>, vector<8x128xf32>
    %cst_70 = arith.constant 0.000000e+00 : f32
    %188 = vector.broadcast %cst_70 : f32 to vector<8x128xf32>
    %189 = arith.select %4, %185, %188 : vector<8x128xi1>, vector<8x128xf32>
    %c4_i32 = arith.constant 4 : i32
    %190 = vector.broadcast %c4_i32 : i32 to vector<8x1xi32>
    %191 = arith.cmpi sgt, %13, %190 : vector<8x1xi32>
    %192 = vector.shape_cast %191 : vector<8x1xi1> to vector<8x1xi1>
    %193 = vector.broadcast %192 : vector<8x1xi1> to vector<8x128xi1>
    %194 = arith.select %193, %189, %158 : vector<8x128xi1>, vector<8x128xf32>
    %195 = vector.shape_cast %191 : vector<8x1xi1> to vector<8x1xi1>
    %196 = vector.broadcast %195 : vector<8x1xi1> to vector<8x128xi1>
    %197 = arith.select %196, %187, %161 : vector<8x128xi1>, vector<8x128xf32>
    %cst_71 = arith.constant 0.000000e+00 : f32
    %198 = vector.shape_cast %191 : vector<8x1xi1> to vector<8x1xi1>
    %199 = vector.broadcast %198 : vector<8x1xi1> to vector<8x128xi1>
    %200 = vector.broadcast %cst_71 : f32 to vector<8x128xf32>
    %201 = arith.select %199, %189, %200 : vector<8x128xi1>, vector<8x128xf32>
    %c32_72 = arith.constant 32 : index
    %c0_73 = arith.constant 0 : index
    %202 = vector.load %arg16[%c32_72, %c0_73] : memref<64x128xf32, #tpu.memory_space<vmem>>, vector<8x128xf32>
    tpu.vector_store %arg16[%c32_72, %c0_73], %201 {strides = array<i32>} : memref<64x128xf32, #tpu.memory_space<vmem>>, vector<8x128xf32>,
    %c40 = arith.constant 40 : index
    %c0_74 = arith.constant 0 : index
    %203 = vector.load %arg15[%c40, %c0_74] : memref<64x128xf32, #tpu.memory_space<vmem>>, vector<8x128xf32>
    %204 = arith.truncf %194 : vector<8x128xf32> to vector<8x128xbf16>
    %c0_75 = arith.constant 0 : index
    %c0_76 = arith.constant 0 : index
    %205 = vector.load %arg6[%c0_75, %c0_76] : memref<128x128xbf16, #tpu.memory_space<vmem>>, vector<128x128xbf16>
    %cst_77 = arith.constant dense<0.000000e+00> : vector<8x128xf32>
    %206 = tpu.matmul %204, %205, %cst_77 {dimension_numbers = #tpu.dot_dimension_numbers<[1], [0], [0], [1], [0, 0, 1, 1], [], []>} : vector<8x128xbf16>, vector<128x128xbf16>, vector<8x128xf32> -> vector<8x128xf32>
    %207 = arith.addf %203, %206 : vector<8x128xf32>
    %208 = math.tanh %207 : vector<8x128xf32>
    %209 = arith.negf %207 : vector<8x128xf32>
    %210 = math.exp %209 : vector<8x128xf32>
    %cst_78 = arith.constant 1.000000e+00 : f32
    %211 = vector.broadcast %cst_78 : f32 to vector<8x128xf32>
    %212 = arith.addf %211, %210 : vector<8x128xf32>
    %213 = arith.divf %211, %212 : vector<8x128xf32>
    %214 = arith.select %2, %208, %213 : vector<8x128xi1>, vector<8x128xf32>
    %c64_i32_79 = arith.constant 64 : i32
    %215 = tpu.dynamic_rotate %214 by %c64_i32_79 dim 1 : vector<8x128xf32>, i32 -> vector<8x128xf32>
    %216 = arith.mulf %214, %215 : vector<8x128xf32>
    %c32_i32_80 = arith.constant 32 : i32
    %217 = tpu.dynamic_rotate %216 by %c32_i32_80 dim 1 : vector<8x128xf32>, i32 -> vector<8x128xf32>
    %218 = arith.mulf %214, %197 : vector<8x128xf32>
    %219 = arith.addf %218, %217 : vector<8x128xf32>
    %220 = math.tanh %219 : vector<8x128xf32>
    %221 = arith.mulf %215, %220 : vector<8x128xf32>
    %cst_81 = arith.constant 0.000000e+00 : f32
    %222 = vector.broadcast %cst_81 : f32 to vector<8x128xf32>
    %223 = arith.select %4, %219, %222 : vector<8x128xi1>, vector<8x128xf32>
    %cst_82 = arith.constant 0.000000e+00 : f32
    %224 = vector.broadcast %cst_82 : f32 to vector<8x128xf32>
    %225 = arith.select %4, %221, %224 : vector<8x128xi1>, vector<8x128xf32>
    %c5_i32 = arith.constant 5 : i32
    %226 = vector.broadcast %c5_i32 : i32 to vector<8x1xi32>
    %227 = arith.cmpi sgt, %13, %226 : vector<8x1xi32>
    %228 = vector.shape_cast %227 : vector<8x1xi1> to vector<8x1xi1>
    %229 = vector.broadcast %228 : vector<8x1xi1> to vector<8x128xi1>
    %230 = arith.select %229, %225, %194 : vector<8x128xi1>, vector<8x128xf32>
    %231 = vector.shape_cast %227 : vector<8x1xi1> to vector<8x1xi1>
    %232 = vector.broadcast %231 : vector<8x1xi1> to vector<8x128xi1>
    %233 = arith.select %232, %223, %197 : vector<8x128xi1>, vector<8x128xf32>
    %cst_83 = arith.constant 0.000000e+00 : f32
    %234 = vector.shape_cast %227 : vector<8x1xi1> to vector<8x1xi1>
    %235 = vector.broadcast %234 : vector<8x1xi1> to vector<8x128xi1>
    %236 = vector.broadcast %cst_83 : f32 to vector<8x128xf32>
    %237 = arith.select %235, %225, %236 : vector<8x128xi1>, vector<8x128xf32>
    %c40_84 = arith.constant 40 : index
    %c0_85 = arith.constant 0 : index
    %238 = vector.load %arg16[%c40_84, %c0_85] : memref<64x128xf32, #tpu.memory_space<vmem>>, vector<8x128xf32>
    tpu.vector_store %arg16[%c40_84, %c0_85], %237 {strides = array<i32>} : memref<64x128xf32, #tpu.memory_space<vmem>>, vector<8x128xf32>,
    %c48 = arith.constant 48 : index
    %c0_86 = arith.constant 0 : index
    %239 = vector.load %arg15[%c48, %c0_86] : memref<64x128xf32, #tpu.memory_space<vmem>>, vector<8x128xf32>
    %240 = arith.truncf %230 : vector<8x128xf32> to vector<8x128xbf16>
    %c0_87 = arith.constant 0 : index
    %c0_88 = arith.constant 0 : index
    %241 = vector.load %arg6[%c0_87, %c0_88] : memref<128x128xbf16, #tpu.memory_space<vmem>>, vector<128x128xbf16>
    %cst_89 = arith.constant dense<0.000000e+00> : vector<8x128xf32>
    %242 = tpu.matmul %240, %241, %cst_89 {dimension_numbers = #tpu.dot_dimension_numbers<[1], [0], [0], [1], [0, 0, 1, 1], [], []>} : vector<8x128xbf16>, vector<128x128xbf16>, vector<8x128xf32> -> vector<8x128xf32>
    %243 = arith.addf %239, %242 : vector<8x128xf32>
    %244 = math.tanh %243 : vector<8x128xf32>
    %245 = arith.negf %243 : vector<8x128xf32>
    %246 = math.exp %245 : vector<8x128xf32>
    %cst_90 = arith.constant 1.000000e+00 : f32
    %247 = vector.broadcast %cst_90 : f32 to vector<8x128xf32>
    %248 = arith.addf %247, %246 : vector<8x128xf32>
    %249 = arith.divf %247, %248 : vector<8x128xf32>
    %250 = arith.select %2, %244, %249 : vector<8x128xi1>, vector<8x128xf32>
    %c64_i32_91 = arith.constant 64 : i32
    %251 = tpu.dynamic_rotate %250 by %c64_i32_91 dim 1 : vector<8x128xf32>, i32 -> vector<8x128xf32>
    %252 = arith.mulf %250, %251 : vector<8x128xf32>
    %c32_i32_92 = arith.constant 32 : i32
    %253 = tpu.dynamic_rotate %252 by %c32_i32_92 dim 1 : vector<8x128xf32>, i32 -> vector<8x128xf32>
    %254 = arith.mulf %250, %233 : vector<8x128xf32>
    %255 = arith.addf %254, %253 : vector<8x128xf32>
    %256 = math.tanh %255 : vector<8x128xf32>
    %257 = arith.mulf %251, %256 : vector<8x128xf32>
    %cst_93 = arith.constant 0.000000e+00 : f32
    %258 = vector.broadcast %cst_93 : f32 to vector<8x128xf32>
    %259 = arith.select %4, %255, %258 : vector<8x128xi1>, vector<8x128xf32>
    %cst_94 = arith.constant 0.000000e+00 : f32
    %260 = vector.broadcast %cst_94 : f32 to vector<8x128xf32>
    %261 = arith.select %4, %257, %260 : vector<8x128xi1>, vector<8x128xf32>
    %c6_i32 = arith.constant 6 : i32
    %262 = vector.broadcast %c6_i32 : i32 to vector<8x1xi32>
    %263 = arith.cmpi sgt, %13, %262 : vector<8x1xi32>
    %264 = vector.shape_cast %263 : vector<8x1xi1> to vector<8x1xi1>
    %265 = vector.broadcast %264 : vector<8x1xi1> to vector<8x128xi1>
    %266 = arith.select %265, %261, %230 : vector<8x128xi1>, vector<8x128xf32>
    %267 = vector.shape_cast %263 : vector<8x1xi1> to vector<8x1xi1>
    %268 = vector.broadcast %267 : vector<8x1xi1> to vector<8x128xi1>
    %269 = arith.select %268, %259, %233 : vector<8x128xi1>, vector<8x128xf32>
    %cst_95 = arith.constant 0.000000e+00 : f32
    %270 = vector.shape_cast %263 : vector<8x1xi1> to vector<8x1xi1>
    %271 = vector.broadcast %270 : vector<8x1xi1> to vector<8x128xi1>
    %272 = vector.broadcast %cst_95 : f32 to vector<8x128xf32>
    %273 = arith.select %271, %261, %272 : vector<8x128xi1>, vector<8x128xf32>
    %c48_96 = arith.constant 48 : index
    %c0_97 = arith.constant 0 : index
    %274 = vector.load %arg16[%c48_96, %c0_97] : memref<64x128xf32, #tpu.memory_space<vmem>>, vector<8x128xf32>
    tpu.vector_store %arg16[%c48_96, %c0_97], %273 {strides = array<i32>} : memref<64x128xf32, #tpu.memory_space<vmem>>, vector<8x128xf32>,
    %c56 = arith.constant 56 : index
    %c0_98 = arith.constant 0 : index
    %275 = vector.load %arg15[%c56, %c0_98] : memref<64x128xf32, #tpu.memory_space<vmem>>, vector<8x128xf32>
    %276 = arith.truncf %266 : vector<8x128xf32> to vector<8x128xbf16>
    %c0_99 = arith.constant 0 : index
    %c0_100 = arith.constant 0 : index
    %277 = vector.load %arg6[%c0_99, %c0_100] : memref<128x128xbf16, #tpu.memory_space<vmem>>, vector<128x128xbf16>
    %cst_101 = arith.constant dense<0.000000e+00> : vector<8x128xf32>
    %278 = tpu.matmul %276, %277, %cst_101 {dimension_numbers = #tpu.dot_dimension_numbers<[1], [0], [0], [1], [0, 0, 1, 1], [], []>} : vector<8x128xbf16>, vector<128x128xbf16>, vector<8x128xf32> -> vector<8x128xf32>
    %279 = arith.addf %275, %278 : vector<8x128xf32>
    %280 = math.tanh %279 : vector<8x128xf32>
    %281 = arith.negf %279 : vector<8x128xf32>
    %282 = math.exp %281 : vector<8x128xf32>
    %cst_102 = arith.constant 1.000000e+00 : f32
    %283 = vector.broadcast %cst_102 : f32 to vector<8x128xf32>
    %284 = arith.addf %283, %282 : vector<8x128xf32>
    %285 = arith.divf %283, %284 : vector<8x128xf32>
    %286 = arith.select %2, %280, %285 : vector<8x128xi1>, vector<8x128xf32>
    %c64_i32_103 = arith.constant 64 : i32
    %287 = tpu.dynamic_rotate %286 by %c64_i32_103 dim 1 : vector<8x128xf32>, i32 -> vector<8x128xf32>
    %288 = arith.mulf %286, %287 : vector<8x128xf32>
    %c32_i32_104 = arith.constant 32 : i32
    %289 = tpu.dynamic_rotate %288 by %c32_i32_104 dim 1 : vector<8x128xf32>, i32 -> vector<8x128xf32>
    %290 = arith.mulf %286, %269 : vector<8x128xf32>
    %291 = arith.addf %290, %289 : vector<8x128xf32>
    %292 = math.tanh %291 : vector<8x128xf32>
    %293 = arith.mulf %287, %292 : vector<8x128xf32>
    %cst_105 = arith.constant 0.000000e+00 : f32
    %294 = vector.broadcast %cst_105 : f32 to vector<8x128xf32>
    %295 = arith.select %4, %291, %294 : vector<8x128xi1>, vector<8x128xf32>
    %cst_106 = arith.constant 0.000000e+00 : f32
    %296 = vector.broadcast %cst_106 : f32 to vector<8x128xf32>
    %297 = arith.select %4, %293, %296 : vector<8x128xi1>, vector<8x128xf32>
    %c7_i32 = arith.constant 7 : i32
    %298 = vector.broadcast %c7_i32 : i32 to vector<8x1xi32>
    %299 = arith.cmpi sgt, %13, %298 : vector<8x1xi32>
    %300 = vector.shape_cast %299 : vector<8x1xi1> to vector<8x1xi1>
    %301 = vector.broadcast %300 : vector<8x1xi1> to vector<8x128xi1>
    %302 = arith.select %301, %297, %266 : vector<8x128xi1>, vector<8x128xf32>
    %303 = vector.shape_cast %299 : vector<8x1xi1> to vector<8x1xi1>
    %304 = vector.broadcast %303 : vector<8x1xi1> to vector<8x128xi1>
    %305 = arith.select %304, %295, %269 : vector<8x128xi1>, vector<8x128xf32>
    %cst_107 = arith.constant 0.000000e+00 : f32
    %306 = vector.shape_cast %299 : vector<8x1xi1> to vector<8x1xi1>
    %307 = vector.broadcast %306 : vector<8x1xi1> to vector<8x128xi1>
    %308 = vector.broadcast %cst_107 : f32 to vector<8x128xf32>
    %309 = arith.select %307, %297, %308 : vector<8x128xi1>, vector<8x128xf32>
    %c56_108 = arith.constant 56 : index
    %c0_109 = arith.constant 0 : index
    %310 = vector.load %arg16[%c56_108, %c0_109] : memref<64x128xf32, #tpu.memory_space<vmem>>, vector<8x128xf32>
    tpu.vector_store %arg16[%c56_108, %c0_109], %309 {strides = array<i32>} : memref<64x128xf32, #tpu.memory_space<vmem>>, vector<8x128xf32>,
    %c0_110 = arith.constant 0 : index
    %c0_111 = arith.constant 0 : index
    %c0_112 = arith.constant 0 : index
    %311 = vector.load %arg12[%c0_110, %c0_111, %c0_112] : memref<2x8x128xf32, #tpu.memory_space<vmem>>, vector<1x8x128xf32>
    %312 = vector.shape_cast %311 : vector<1x8x128xf32> to vector<8x128xf32>
    %313 = vector.shape_cast %302 : vector<8x128xf32> to vector<1x8x128xf32>
    tpu.vector_store %arg12[%c0_110, %c0_111, %c0_112], %313 {strides = array<i32>} : memref<2x8x128xf32, #tpu.memory_space<vmem>>, vector<1x8x128xf32>,
    %c0_113 = arith.constant 0 : index
    %c0_114 = arith.constant 0 : index
    %c0_115 = arith.constant 0 : index
    %314 = vector.load %arg13[%c0_113, %c0_114, %c0_115] : memref<2x8x128xf32, #tpu.memory_space<vmem>>, vector<1x8x128xf32>
    %315 = vector.shape_cast %314 : vector<1x8x128xf32> to vector<8x128xf32>
    %316 = vector.shape_cast %305 : vector<8x128xf32> to vector<1x8x128xf32>
    tpu.vector_store %arg13[%c0_113, %c0_114, %c0_115], %316 {strides = array<i32>} : memref<2x8x128xf32, #tpu.memory_space<vmem>>, vector<1x8x128xf32>,
    %c0_116 = arith.constant 0 : index
    %c0_117 = arith.constant 0 : index
    %317 = vector.load %arg16[%c0_116, %c0_117] : memref<64x128xf32, #tpu.memory_space<vmem>>, vector<64x128xf32>
    %318 = arith.truncf %317 : vector<64x128xf32> to vector<64x128xbf16>
    %c0_118 = arith.constant 0 : index
    %c0_119 = arith.constant 0 : index
    %319 = vector.load %arg8[%c0_118, %c0_119] : memref<128x128xbf16, #tpu.memory_space<vmem>>, vector<128x128xbf16>
    %cst_120 = arith.constant dense<0.000000e+00> : vector<64x128xf32>
    %320 = tpu.matmul %318, %319, %cst_120 {dimension_numbers = #tpu.dot_dimension_numbers<[1], [0], [0], [1], [0, 0, 1, 1], [], []>} : vector<64x128xbf16>, vector<128x128xbf16>, vector<64x128xf32> -> vector<64x128xf32>
    %c0_121 = arith.constant 0 : index
    %c0_122 = arith.constant 0 : index
    %321 = vector.load %arg10[%c0_121, %c0_122] : memref<1x128xf32, #tpu.memory_space<vmem>>, vector<1x128xf32>
    %322 = vector.broadcast %321 : vector<1x128xf32> to vector<64x128xf32>
    %323 = arith.addf %320, %322 : vector<64x128xf32>
    %c0_123 = arith.constant 0 : index
    %c0_124 = arith.constant 0 : index
    %324 = vector.load %arg15[%c0_123, %c0_124] : memref<64x128xf32, #tpu.memory_space<vmem>>, vector<64x128xf32>
    tpu.vector_store %arg15[%c0_123, %c0_124], %323 {strides = array<i32>} : memref<64x128xf32, #tpu.memory_space<vmem>>, vector<64x128xf32>,
    %cst_125 = arith.constant 0.000000e+00 : f32
    %325 = vector.broadcast %cst_125 : f32 to vector<8x128xf32>
    %cst_126 = arith.constant 0.000000e+00 : f32
    %326 = vector.broadcast %cst_126 : f32 to vector<8x128xf32>
    %c0_127 = arith.constant 0 : index
    %c0_128 = arith.constant 0 : index
    %327 = vector.load %arg15[%c0_127, %c0_128] : memref<64x128xf32, #tpu.memory_space<vmem>>, vector<8x128xf32>
    %328 = arith.truncf %325 : vector<8x128xf32> to vector<8x128xbf16>
    %c0_129 = arith.constant 0 : index
    %c0_130 = arith.constant 0 : index
    %329 = vector.load %arg9[%c0_129, %c0_130] : memref<128x128xbf16, #tpu.memory_space<vmem>>, vector<128x128xbf16>
    %cst_131 = arith.constant dense<0.000000e+00> : vector<8x128xf32>
    %330 = tpu.matmul %328, %329, %cst_131 {dimension_numbers = #tpu.dot_dimension_numbers<[1], [0], [0], [1], [0, 0, 1, 1], [], []>} : vector<8x128xbf16>, vector<128x128xbf16>, vector<8x128xf32> -> vector<8x128xf32>
    %331 = arith.addf %327, %330 : vector<8x128xf32>
    %332 = math.tanh %331 : vector<8x128xf32>
    %333 = arith.negf %331 : vector<8x128xf32>
    %334 = math.exp %333 : vector<8x128xf32>
    %cst_132 = arith.constant 1.000000e+00 : f32
    %335 = vector.broadcast %cst_132 : f32 to vector<8x128xf32>
    %336 = arith.addf %335, %334 : vector<8x128xf32>
    %337 = arith.divf %335, %336 : vector<8x128xf32>
    %338 = arith.select %2, %332, %337 : vector<8x128xi1>, vector<8x128xf32>
    %c64_i32_133 = arith.constant 64 : i32
    %339 = tpu.dynamic_rotate %338 by %c64_i32_133 dim 1 : vector<8x128xf32>, i32 -> vector<8x128xf32>
    %340 = arith.mulf %338, %339 : vector<8x128xf32>
    %c32_i32_134 = arith.constant 32 : i32
    %341 = tpu.dynamic_rotate %340 by %c32_i32_134 dim 1 : vector<8x128xf32>, i32 -> vector<8x128xf32>
    %342 = arith.mulf %338, %326 : vector<8x128xf32>
    %343 = arith.addf %342, %341 : vector<8x128xf32>
    %344 = math.tanh %343 : vector<8x128xf32>
    %345 = arith.mulf %339, %344 : vector<8x128xf32>
    %cst_135 = arith.constant 0.000000e+00 : f32
    %346 = vector.broadcast %cst_135 : f32 to vector<8x128xf32>
    %347 = arith.select %4, %343, %346 : vector<8x128xi1>, vector<8x128xf32>
    %cst_136 = arith.constant 0.000000e+00 : f32
    %348 = vector.broadcast %cst_136 : f32 to vector<8x128xf32>
    %349 = arith.select %4, %345, %348 : vector<8x128xi1>, vector<8x128xf32>
    %c0_i32_137 = arith.constant 0 : i32
    %350 = vector.broadcast %c0_i32_137 : i32 to vector<8x1xi32>
    %351 = arith.cmpi sgt, %13, %350 : vector<8x1xi32>
    %352 = vector.shape_cast %351 : vector<8x1xi1> to vector<8x1xi1>
    %353 = vector.broadcast %352 : vector<8x1xi1> to vector<8x128xi1>
    %354 = arith.select %353, %349, %325 : vector<8x128xi1>, vector<8x128xf32>
    %355 = vector.shape_cast %351 : vector<8x1xi1> to vector<8x1xi1>
    %356 = vector.broadcast %355 : vector<8x1xi1> to vector<8x128xi1>
    %357 = arith.select %356, %347, %326 : vector<8x128xi1>, vector<8x128xf32>
    %cst_138 = arith.constant 0.000000e+00 : f32
    %358 = vector.shape_cast %351 : vector<8x1xi1> to vector<8x1xi1>
    %359 = vector.broadcast %358 : vector<8x1xi1> to vector<8x128xi1>
    %360 = vector.broadcast %cst_138 : f32 to vector<8x128xf32>
    %361 = arith.select %359, %349, %360 : vector<8x128xi1>, vector<8x128xf32>
    %c0_139 = arith.constant 0 : index
    %c0_140 = arith.constant 0 : index
    %362 = vector.load %arg11[%c0_139, %c0_140] : memref<64x128xf32, #tpu.memory_space<vmem>>, vector<8x128xf32>
    tpu.vector_store %arg11[%c0_139, %c0_140], %361 {strides = array<i32>} : memref<64x128xf32, #tpu.memory_space<vmem>>, vector<8x128xf32>,
    %c8_141 = arith.constant 8 : index
    %c0_142 = arith.constant 0 : index
    %363 = vector.load %arg15[%c8_141, %c0_142] : memref<64x128xf32, #tpu.memory_space<vmem>>, vector<8x128xf32>
    %364 = arith.truncf %354 : vector<8x128xf32> to vector<8x128xbf16>
    %c0_143 = arith.constant 0 : index
    %c0_144 = arith.constant 0 : index
    %365 = vector.load %arg9[%c0_143, %c0_144] : memref<128x128xbf16, #tpu.memory_space<vmem>>, vector<128x128xbf16>
    %cst_145 = arith.constant dense<0.000000e+00> : vector<8x128xf32>
    %366 = tpu.matmul %364, %365, %cst_145 {dimension_numbers = #tpu.dot_dimension_numbers<[1], [0], [0], [1], [0, 0, 1, 1], [], []>} : vector<8x128xbf16>, vector<128x128xbf16>, vector<8x128xf32> -> vector<8x128xf32>
    %367 = arith.addf %363, %366 : vector<8x128xf32>
    %368 = math.tanh %367 : vector<8x128xf32>
    %369 = arith.negf %367 : vector<8x128xf32>
    %370 = math.exp %369 : vector<8x128xf32>
    %cst_146 = arith.constant 1.000000e+00 : f32
    %371 = vector.broadcast %cst_146 : f32 to vector<8x128xf32>
    %372 = arith.addf %371, %370 : vector<8x128xf32>
    %373 = arith.divf %371, %372 : vector<8x128xf32>
    %374 = arith.select %2, %368, %373 : vector<8x128xi1>, vector<8x128xf32>
    %c64_i32_147 = arith.constant 64 : i32
    %375 = tpu.dynamic_rotate %374 by %c64_i32_147 dim 1 : vector<8x128xf32>, i32 -> vector<8x128xf32>
    %376 = arith.mulf %374, %375 : vector<8x128xf32>
    %c32_i32_148 = arith.constant 32 : i32
    %377 = tpu.dynamic_rotate %376 by %c32_i32_148 dim 1 : vector<8x128xf32>, i32 -> vector<8x128xf32>
    %378 = arith.mulf %374, %357 : vector<8x128xf32>
    %379 = arith.addf %378, %377 : vector<8x128xf32>
    %380 = math.tanh %379 : vector<8x128xf32>
    %381 = arith.mulf %375, %380 : vector<8x128xf32>
    %cst_149 = arith.constant 0.000000e+00 : f32
    %382 = vector.broadcast %cst_149 : f32 to vector<8x128xf32>
    %383 = arith.select %4, %379, %382 : vector<8x128xi1>, vector<8x128xf32>
    %cst_150 = arith.constant 0.000000e+00 : f32
    %384 = vector.broadcast %cst_150 : f32 to vector<8x128xf32>
    %385 = arith.select %4, %381, %384 : vector<8x128xi1>, vector<8x128xf32>
    %c1_i32_151 = arith.constant 1 : i32
    %386 = vector.broadcast %c1_i32_151 : i32 to vector<8x1xi32>
    %387 = arith.cmpi sgt, %13, %386 : vector<8x1xi32>
    %388 = vector.shape_cast %387 : vector<8x1xi1> to vector<8x1xi1>
    %389 = vector.broadcast %388 : vector<8x1xi1> to vector<8x128xi1>
    %390 = arith.select %389, %385, %354 : vector<8x128xi1>, vector<8x128xf32>
    %391 = vector.shape_cast %387 : vector<8x1xi1> to vector<8x1xi1>
    %392 = vector.broadcast %391 : vector<8x1xi1> to vector<8x128xi1>
    %393 = arith.select %392, %383, %357 : vector<8x128xi1>, vector<8x128xf32>
    %cst_152 = arith.constant 0.000000e+00 : f32
    %394 = vector.shape_cast %387 : vector<8x1xi1> to vector<8x1xi1>
    %395 = vector.broadcast %394 : vector<8x1xi1> to vector<8x128xi1>
    %396 = vector.broadcast %cst_152 : f32 to vector<8x128xf32>
    %397 = arith.select %395, %385, %396 : vector<8x128xi1>, vector<8x128xf32>
    %c8_153 = arith.constant 8 : index
    %c0_154 = arith.constant 0 : index
    %398 = vector.load %arg11[%c8_153, %c0_154] : memref<64x128xf32, #tpu.memory_space<vmem>>, vector<8x128xf32>
    tpu.vector_store %arg11[%c8_153, %c0_154], %397 {strides = array<i32>} : memref<64x128xf32, #tpu.memory_space<vmem>>, vector<8x128xf32>,
    %c16_155 = arith.constant 16 : index
    %c0_156 = arith.constant 0 : index
    %399 = vector.load %arg15[%c16_155, %c0_156] : memref<64x128xf32, #tpu.memory_space<vmem>>, vector<8x128xf32>
    %400 = arith.truncf %390 : vector<8x128xf32> to vector<8x128xbf16>
    %c0_157 = arith.constant 0 : index
    %c0_158 = arith.constant 0 : index
    %401 = vector.load %arg9[%c0_157, %c0_158] : memref<128x128xbf16, #tpu.memory_space<vmem>>, vector<128x128xbf16>
    %cst_159 = arith.constant dense<0.000000e+00> : vector<8x128xf32>
    %402 = tpu.matmul %400, %401, %cst_159 {dimension_numbers = #tpu.dot_dimension_numbers<[1], [0], [0], [1], [0, 0, 1, 1], [], []>} : vector<8x128xbf16>, vector<128x128xbf16>, vector<8x128xf32> -> vector<8x128xf32>
    %403 = arith.addf %399, %402 : vector<8x128xf32>
    %404 = math.tanh %403 : vector<8x128xf32>
    %405 = arith.negf %403 : vector<8x128xf32>
    %406 = math.exp %405 : vector<8x128xf32>
    %cst_160 = arith.constant 1.000000e+00 : f32
    %407 = vector.broadcast %cst_160 : f32 to vector<8x128xf32>
    %408 = arith.addf %407, %406 : vector<8x128xf32>
    %409 = arith.divf %407, %408 : vector<8x128xf32>
    %410 = arith.select %2, %404, %409 : vector<8x128xi1>, vector<8x128xf32>
    %c64_i32_161 = arith.constant 64 : i32
    %411 = tpu.dynamic_rotate %410 by %c64_i32_161 dim 1 : vector<8x128xf32>, i32 -> vector<8x128xf32>
    %412 = arith.mulf %410, %411 : vector<8x128xf32>
    %c32_i32_162 = arith.constant 32 : i32
    %413 = tpu.dynamic_rotate %412 by %c32_i32_162 dim 1 : vector<8x128xf32>, i32 -> vector<8x128xf32>
    %414 = arith.mulf %410, %393 : vector<8x128xf32>
    %415 = arith.addf %414, %413 : vector<8x128xf32>
    %416 = math.tanh %415 : vector<8x128xf32>
    %417 = arith.mulf %411, %416 : vector<8x128xf32>
    %cst_163 = arith.constant 0.000000e+00 : f32
    %418 = vector.broadcast %cst_163 : f32 to vector<8x128xf32>
    %419 = arith.select %4, %415, %418 : vector<8x128xi1>, vector<8x128xf32>
    %cst_164 = arith.constant 0.000000e+00 : f32
    %420 = vector.broadcast %cst_164 : f32 to vector<8x128xf32>
    %421 = arith.select %4, %417, %420 : vector<8x128xi1>, vector<8x128xf32>
    %c2_i32_165 = arith.constant 2 : i32
    %422 = vector.broadcast %c2_i32_165 : i32 to vector<8x1xi32>
    %423 = arith.cmpi sgt, %13, %422 : vector<8x1xi32>
    %424 = vector.shape_cast %423 : vector<8x1xi1> to vector<8x1xi1>
    %425 = vector.broadcast %424 : vector<8x1xi1> to vector<8x128xi1>
    %426 = arith.select %425, %421, %390 : vector<8x128xi1>, vector<8x128xf32>
    %427 = vector.shape_cast %423 : vector<8x1xi1> to vector<8x1xi1>
    %428 = vector.broadcast %427 : vector<8x1xi1> to vector<8x128xi1>
    %429 = arith.select %428, %419, %393 : vector<8x128xi1>, vector<8x128xf32>
    %cst_166 = arith.constant 0.000000e+00 : f32
    %430 = vector.shape_cast %423 : vector<8x1xi1> to vector<8x1xi1>
    %431 = vector.broadcast %430 : vector<8x1xi1> to vector<8x128xi1>
    %432 = vector.broadcast %cst_166 : f32 to vector<8x128xf32>
    %433 = arith.select %431, %421, %432 : vector<8x128xi1>, vector<8x128xf32>
    %c16_167 = arith.constant 16 : index
    %c0_168 = arith.constant 0 : index
    %434 = vector.load %arg11[%c16_167, %c0_168] : memref<64x128xf32, #tpu.memory_space<vmem>>, vector<8x128xf32>
    tpu.vector_store %arg11[%c16_167, %c0_168], %433 {strides = array<i32>} : memref<64x128xf32, #tpu.memory_space<vmem>>, vector<8x128xf32>,
    %c24_169 = arith.constant 24 : index
    %c0_170 = arith.constant 0 : index
    %435 = vector.load %arg15[%c24_169, %c0_170] : memref<64x128xf32, #tpu.memory_space<vmem>>, vector<8x128xf32>
    %436 = arith.truncf %426 : vector<8x128xf32> to vector<8x128xbf16>
    %c0_171 = arith.constant 0 : index
    %c0_172 = arith.constant 0 : index
    %437 = vector.load %arg9[%c0_171, %c0_172] : memref<128x128xbf16, #tpu.memory_space<vmem>>, vector<128x128xbf16>
    %cst_173 = arith.constant dense<0.000000e+00> : vector<8x128xf32>
    %438 = tpu.matmul %436, %437, %cst_173 {dimension_numbers = #tpu.dot_dimension_numbers<[1], [0], [0], [1], [0, 0, 1, 1], [], []>} : vector<8x128xbf16>, vector<128x128xbf16>, vector<8x128xf32> -> vector<8x128xf32>
    %439 = arith.addf %435, %438 : vector<8x128xf32>
    %440 = math.tanh %439 : vector<8x128xf32>
    %441 = arith.negf %439 : vector<8x128xf32>
    %442 = math.exp %441 : vector<8x128xf32>
    %cst_174 = arith.constant 1.000000e+00 : f32
    %443 = vector.broadcast %cst_174 : f32 to vector<8x128xf32>
    %444 = arith.addf %443, %442 : vector<8x128xf32>
    %445 = arith.divf %443, %444 : vector<8x128xf32>
    %446 = arith.select %2, %440, %445 : vector<8x128xi1>, vector<8x128xf32>
    %c64_i32_175 = arith.constant 64 : i32
    %447 = tpu.dynamic_rotate %446 by %c64_i32_175 dim 1 : vector<8x128xf32>, i32 -> vector<8x128xf32>
    %448 = arith.mulf %446, %447 : vector<8x128xf32>
    %c32_i32_176 = arith.constant 32 : i32
    %449 = tpu.dynamic_rotate %448 by %c32_i32_176 dim 1 : vector<8x128xf32>, i32 -> vector<8x128xf32>
    %450 = arith.mulf %446, %429 : vector<8x128xf32>
    %451 = arith.addf %450, %449 : vector<8x128xf32>
    %452 = math.tanh %451 : vector<8x128xf32>
    %453 = arith.mulf %447, %452 : vector<8x128xf32>
    %cst_177 = arith.constant 0.000000e+00 : f32
    %454 = vector.broadcast %cst_177 : f32 to vector<8x128xf32>
    %455 = arith.select %4, %451, %454 : vector<8x128xi1>, vector<8x128xf32>
    %cst_178 = arith.constant 0.000000e+00 : f32
    %456 = vector.broadcast %cst_178 : f32 to vector<8x128xf32>
    %457 = arith.select %4, %453, %456 : vector<8x128xi1>, vector<8x128xf32>
    %c3_i32_179 = arith.constant 3 : i32
    %458 = vector.broadcast %c3_i32_179 : i32 to vector<8x1xi32>
    %459 = arith.cmpi sgt, %13, %458 : vector<8x1xi32>
    %460 = vector.shape_cast %459 : vector<8x1xi1> to vector<8x1xi1>
    %461 = vector.broadcast %460 : vector<8x1xi1> to vector<8x128xi1>
    %462 = arith.select %461, %457, %426 : vector<8x128xi1>, vector<8x128xf32>
    %463 = vector.shape_cast %459 : vector<8x1xi1> to vector<8x1xi1>
    %464 = vector.broadcast %463 : vector<8x1xi1> to vector<8x128xi1>
    %465 = arith.select %464, %455, %429 : vector<8x128xi1>, vector<8x128xf32>
    %cst_180 = arith.constant 0.000000e+00 : f32
    %466 = vector.shape_cast %459 : vector<8x1xi1> to vector<8x1xi1>
    %467 = vector.broadcast %466 : vector<8x1xi1> to vector<8x128xi1>
    %468 = vector.broadcast %cst_180 : f32 to vector<8x128xf32>
    %469 = arith.select %467, %457, %468 : vector<8x128xi1>, vector<8x128xf32>
    %c24_181 = arith.constant 24 : index
    %c0_182 = arith.constant 0 : index
    %470 = vector.load %arg11[%c24_181, %c0_182] : memref<64x128xf32, #tpu.memory_space<vmem>>, vector<8x128xf32>
    tpu.vector_store %arg11[%c24_181, %c0_182], %469 {strides = array<i32>} : memref<64x128xf32, #tpu.memory_space<vmem>>, vector<8x128xf32>,
    %c32_183 = arith.constant 32 : index
    %c0_184 = arith.constant 0 : index
    %471 = vector.load %arg15[%c32_183, %c0_184] : memref<64x128xf32, #tpu.memory_space<vmem>>, vector<8x128xf32>
    %472 = arith.truncf %462 : vector<8x128xf32> to vector<8x128xbf16>
    %c0_185 = arith.constant 0 : index
    %c0_186 = arith.constant 0 : index
    %473 = vector.load %arg9[%c0_185, %c0_186] : memref<128x128xbf16, #tpu.memory_space<vmem>>, vector<128x128xbf16>
    %cst_187 = arith.constant dense<0.000000e+00> : vector<8x128xf32>
    %474 = tpu.matmul %472, %473, %cst_187 {dimension_numbers = #tpu.dot_dimension_numbers<[1], [0], [0], [1], [0, 0, 1, 1], [], []>} : vector<8x128xbf16>, vector<128x128xbf16>, vector<8x128xf32> -> vector<8x128xf32>
    %475 = arith.addf %471, %474 : vector<8x128xf32>
    %476 = math.tanh %475 : vector<8x128xf32>
    %477 = arith.negf %475 : vector<8x128xf32>
    %478 = math.exp %477 : vector<8x128xf32>
    %cst_188 = arith.constant 1.000000e+00 : f32
    %479 = vector.broadcast %cst_188 : f32 to vector<8x128xf32>
    %480 = arith.addf %479, %478 : vector<8x128xf32>
    %481 = arith.divf %479, %480 : vector<8x128xf32>
    %482 = arith.select %2, %476, %481 : vector<8x128xi1>, vector<8x128xf32>
    %c64_i32_189 = arith.constant 64 : i32
    %483 = tpu.dynamic_rotate %482 by %c64_i32_189 dim 1 : vector<8x128xf32>, i32 -> vector<8x128xf32>
    %484 = arith.mulf %482, %483 : vector<8x128xf32>
    %c32_i32_190 = arith.constant 32 : i32
    %485 = tpu.dynamic_rotate %484 by %c32_i32_190 dim 1 : vector<8x128xf32>, i32 -> vector<8x128xf32>
    %486 = arith.mulf %482, %465 : vector<8x128xf32>
    %487 = arith.addf %486, %485 : vector<8x128xf32>
    %488 = math.tanh %487 : vector<8x128xf32>
    %489 = arith.mulf %483, %488 : vector<8x128xf32>
    %cst_191 = arith.constant 0.000000e+00 : f32
    %490 = vector.broadcast %cst_191 : f32 to vector<8x128xf32>
    %491 = arith.select %4, %487, %490 : vector<8x128xi1>, vector<8x128xf32>
    %cst_192 = arith.constant 0.000000e+00 : f32
    %492 = vector.broadcast %cst_192 : f32 to vector<8x128xf32>
    %493 = arith.select %4, %489, %492 : vector<8x128xi1>, vector<8x128xf32>
    %c4_i32_193 = arith.constant 4 : i32
    %494 = vector.broadcast %c4_i32_193 : i32 to vector<8x1xi32>
    %495 = arith.cmpi sgt, %13, %494 : vector<8x1xi32>
    %496 = vector.shape_cast %495 : vector<8x1xi1> to vector<8x1xi1>
    %497 = vector.broadcast %496 : vector<8x1xi1> to vector<8x128xi1>
    %498 = arith.select %497, %493, %462 : vector<8x128xi1>, vector<8x128xf32>
    %499 = vector.shape_cast %495 : vector<8x1xi1> to vector<8x1xi1>
    %500 = vector.broadcast %499 : vector<8x1xi1> to vector<8x128xi1>
    %501 = arith.select %500, %491, %465 : vector<8x128xi1>, vector<8x128xf32>
    %cst_194 = arith.constant 0.000000e+00 : f32
    %502 = vector.shape_cast %495 : vector<8x1xi1> to vector<8x1xi1>
    %503 = vector.broadcast %502 : vector<8x1xi1> to vector<8x128xi1>
    %504 = vector.broadcast %cst_194 : f32 to vector<8x128xf32>
    %505 = arith.select %503, %493, %504 : vector<8x128xi1>, vector<8x128xf32>
    %c32_195 = arith.constant 32 : index
    %c0_196 = arith.constant 0 : index
    %506 = vector.load %arg11[%c32_195, %c0_196] : memref<64x128xf32, #tpu.memory_space<vmem>>, vector<8x128xf32>
    tpu.vector_store %arg11[%c32_195, %c0_196], %505 {strides = array<i32>} : memref<64x128xf32, #tpu.memory_space<vmem>>, vector<8x128xf32>,
    %c40_197 = arith.constant 40 : index
    %c0_198 = arith.constant 0 : index
    %507 = vector.load %arg15[%c40_197, %c0_198] : memref<64x128xf32, #tpu.memory_space<vmem>>, vector<8x128xf32>
    %508 = arith.truncf %498 : vector<8x128xf32> to vector<8x128xbf16>
    %c0_199 = arith.constant 0 : index
    %c0_200 = arith.constant 0 : index
    %509 = vector.load %arg9[%c0_199, %c0_200] : memref<128x128xbf16, #tpu.memory_space<vmem>>, vector<128x128xbf16>
    %cst_201 = arith.constant dense<0.000000e+00> : vector<8x128xf32>
    %510 = tpu.matmul %508, %509, %cst_201 {dimension_numbers = #tpu.dot_dimension_numbers<[1], [0], [0], [1], [0, 0, 1, 1], [], []>} : vector<8x128xbf16>, vector<128x128xbf16>, vector<8x128xf32> -> vector<8x128xf32>
    %511 = arith.addf %507, %510 : vector<8x128xf32>
    %512 = math.tanh %511 : vector<8x128xf32>
    %513 = arith.negf %511 : vector<8x128xf32>
    %514 = math.exp %513 : vector<8x128xf32>
    %cst_202 = arith.constant 1.000000e+00 : f32
    %515 = vector.broadcast %cst_202 : f32 to vector<8x128xf32>
    %516 = arith.addf %515, %514 : vector<8x128xf32>
    %517 = arith.divf %515, %516 : vector<8x128xf32>
    %518 = arith.select %2, %512, %517 : vector<8x128xi1>, vector<8x128xf32>
    %c64_i32_203 = arith.constant 64 : i32
    %519 = tpu.dynamic_rotate %518 by %c64_i32_203 dim 1 : vector<8x128xf32>, i32 -> vector<8x128xf32>
    %520 = arith.mulf %518, %519 : vector<8x128xf32>
    %c32_i32_204 = arith.constant 32 : i32
    %521 = tpu.dynamic_rotate %520 by %c32_i32_204 dim 1 : vector<8x128xf32>, i32 -> vector<8x128xf32>
    %522 = arith.mulf %518, %501 : vector<8x128xf32>
    %523 = arith.addf %522, %521 : vector<8x128xf32>
    %524 = math.tanh %523 : vector<8x128xf32>
    %525 = arith.mulf %519, %524 : vector<8x128xf32>
    %cst_205 = arith.constant 0.000000e+00 : f32
    %526 = vector.broadcast %cst_205 : f32 to vector<8x128xf32>
    %527 = arith.select %4, %523, %526 : vector<8x128xi1>, vector<8x128xf32>
    %cst_206 = arith.constant 0.000000e+00 : f32
    %528 = vector.broadcast %cst_206 : f32 to vector<8x128xf32>
    %529 = arith.select %4, %525, %528 : vector<8x128xi1>, vector<8x128xf32>
    %c5_i32_207 = arith.constant 5 : i32
    %530 = vector.broadcast %c5_i32_207 : i32 to vector<8x1xi32>
    %531 = arith.cmpi sgt, %13, %530 : vector<8x1xi32>
    %532 = vector.shape_cast %531 : vector<8x1xi1> to vector<8x1xi1>
    %533 = vector.broadcast %532 : vector<8x1xi1> to vector<8x128xi1>
    %534 = arith.select %533, %529, %498 : vector<8x128xi1>, vector<8x128xf32>
    %535 = vector.shape_cast %531 : vector<8x1xi1> to vector<8x1xi1>
    %536 = vector.broadcast %535 : vector<8x1xi1> to vector<8x128xi1>
    %537 = arith.select %536, %527, %501 : vector<8x128xi1>, vector<8x128xf32>
    %cst_208 = arith.constant 0.000000e+00 : f32
    %538 = vector.shape_cast %531 : vector<8x1xi1> to vector<8x1xi1>
    %539 = vector.broadcast %538 : vector<8x1xi1> to vector<8x128xi1>
    %540 = vector.broadcast %cst_208 : f32 to vector<8x128xf32>
    %541 = arith.select %539, %529, %540 : vector<8x128xi1>, vector<8x128xf32>
    %c40_209 = arith.constant 40 : index
    %c0_210 = arith.constant 0 : index
    %542 = vector.load %arg11[%c40_209, %c0_210] : memref<64x128xf32, #tpu.memory_space<vmem>>, vector<8x128xf32>
    tpu.vector_store %arg11[%c40_209, %c0_210], %541 {strides = array<i32>} : memref<64x128xf32, #tpu.memory_space<vmem>>, vector<8x128xf32>,
    %c48_211 = arith.constant 48 : index
    %c0_212 = arith.constant 0 : index
    %543 = vector.load %arg15[%c48_211, %c0_212] : memref<64x128xf32, #tpu.memory_space<vmem>>, vector<8x128xf32>
    %544 = arith.truncf %534 : vector<8x128xf32> to vector<8x128xbf16>
    %c0_213 = arith.constant 0 : index
    %c0_214 = arith.constant 0 : index
    %545 = vector.load %arg9[%c0_213, %c0_214] : memref<128x128xbf16, #tpu.memory_space<vmem>>, vector<128x128xbf16>
    %cst_215 = arith.constant dense<0.000000e+00> : vector<8x128xf32>
    %546 = tpu.matmul %544, %545, %cst_215 {dimension_numbers = #tpu.dot_dimension_numbers<[1], [0], [0], [1], [0, 0, 1, 1], [], []>} : vector<8x128xbf16>, vector<128x128xbf16>, vector<8x128xf32> -> vector<8x128xf32>
    %547 = arith.addf %543, %546 : vector<8x128xf32>
    %548 = math.tanh %547 : vector<8x128xf32>
    %549 = arith.negf %547 : vector<8x128xf32>
    %550 = math.exp %549 : vector<8x128xf32>
    %cst_216 = arith.constant 1.000000e+00 : f32
    %551 = vector.broadcast %cst_216 : f32 to vector<8x128xf32>
    %552 = arith.addf %551, %550 : vector<8x128xf32>
    %553 = arith.divf %551, %552 : vector<8x128xf32>
    %554 = arith.select %2, %548, %553 : vector<8x128xi1>, vector<8x128xf32>
    %c64_i32_217 = arith.constant 64 : i32
    %555 = tpu.dynamic_rotate %554 by %c64_i32_217 dim 1 : vector<8x128xf32>, i32 -> vector<8x128xf32>
    %556 = arith.mulf %554, %555 : vector<8x128xf32>
    %c32_i32_218 = arith.constant 32 : i32
    %557 = tpu.dynamic_rotate %556 by %c32_i32_218 dim 1 : vector<8x128xf32>, i32 -> vector<8x128xf32>
    %558 = arith.mulf %554, %537 : vector<8x128xf32>
    %559 = arith.addf %558, %557 : vector<8x128xf32>
    %560 = math.tanh %559 : vector<8x128xf32>
    %561 = arith.mulf %555, %560 : vector<8x128xf32>
    %cst_219 = arith.constant 0.000000e+00 : f32
    %562 = vector.broadcast %cst_219 : f32 to vector<8x128xf32>
    %563 = arith.select %4, %559, %562 : vector<8x128xi1>, vector<8x128xf32>
    %cst_220 = arith.constant 0.000000e+00 : f32
    %564 = vector.broadcast %cst_220 : f32 to vector<8x128xf32>
    %565 = arith.select %4, %561, %564 : vector<8x128xi1>, vector<8x128xf32>
    %c6_i32_221 = arith.constant 6 : i32
    %566 = vector.broadcast %c6_i32_221 : i32 to vector<8x1xi32>
    %567 = arith.cmpi sgt, %13, %566 : vector<8x1xi32>
    %568 = vector.shape_cast %567 : vector<8x1xi1> to vector<8x1xi1>
    %569 = vector.broadcast %568 : vector<8x1xi1> to vector<8x128xi1>
    %570 = arith.select %569, %565, %534 : vector<8x128xi1>, vector<8x128xf32>
    %571 = vector.shape_cast %567 : vector<8x1xi1> to vector<8x1xi1>
    %572 = vector.broadcast %571 : vector<8x1xi1> to vector<8x128xi1>
    %573 = arith.select %572, %563, %537 : vector<8x128xi1>, vector<8x128xf32>
    %cst_222 = arith.constant 0.000000e+00 : f32
    %574 = vector.shape_cast %567 : vector<8x1xi1> to vector<8x1xi1>
    %575 = vector.broadcast %574 : vector<8x1xi1> to vector<8x128xi1>
    %576 = vector.broadcast %cst_222 : f32 to vector<8x128xf32>
    %577 = arith.select %575, %565, %576 : vector<8x128xi1>, vector<8x128xf32>
    %c48_223 = arith.constant 48 : index
    %c0_224 = arith.constant 0 : index
    %578 = vector.load %arg11[%c48_223, %c0_224] : memref<64x128xf32, #tpu.memory_space<vmem>>, vector<8x128xf32>
    tpu.vector_store %arg11[%c48_223, %c0_224], %577 {strides = array<i32>} : memref<64x128xf32, #tpu.memory_space<vmem>>, vector<8x128xf32>,
    %c56_225 = arith.constant 56 : index
    %c0_226 = arith.constant 0 : index
    %579 = vector.load %arg15[%c56_225, %c0_226] : memref<64x128xf32, #tpu.memory_space<vmem>>, vector<8x128xf32>
    %580 = arith.truncf %570 : vector<8x128xf32> to vector<8x128xbf16>
    %c0_227 = arith.constant 0 : index
    %c0_228 = arith.constant 0 : index
    %581 = vector.load %arg9[%c0_227, %c0_228] : memref<128x128xbf16, #tpu.memory_space<vmem>>, vector<128x128xbf16>
    %cst_229 = arith.constant dense<0.000000e+00> : vector<8x128xf32>
    %582 = tpu.matmul %580, %581, %cst_229 {dimension_numbers = #tpu.dot_dimension_numbers<[1], [0], [0], [1], [0, 0, 1, 1], [], []>} : vector<8x128xbf16>, vector<128x128xbf16>, vector<8x128xf32> -> vector<8x128xf32>
    %583 = arith.addf %579, %582 : vector<8x128xf32>
    %584 = math.tanh %583 : vector<8x128xf32>
    %585 = arith.negf %583 : vector<8x128xf32>
    %586 = math.exp %585 : vector<8x128xf32>
    %cst_230 = arith.constant 1.000000e+00 : f32
    %587 = vector.broadcast %cst_230 : f32 to vector<8x128xf32>
    %588 = arith.addf %587, %586 : vector<8x128xf32>
    %589 = arith.divf %587, %588 : vector<8x128xf32>
    %590 = arith.select %2, %584, %589 : vector<8x128xi1>, vector<8x128xf32>
    %c64_i32_231 = arith.constant 64 : i32
    %591 = tpu.dynamic_rotate %590 by %c64_i32_231 dim 1 : vector<8x128xf32>, i32 -> vector<8x128xf32>
    %592 = arith.mulf %590, %591 : vector<8x128xf32>
    %c32_i32_232 = arith.constant 32 : i32
    %593 = tpu.dynamic_rotate %592 by %c32_i32_232 dim 1 : vector<8x128xf32>, i32 -> vector<8x128xf32>
    %594 = arith.mulf %590, %573 : vector<8x128xf32>
    %595 = arith.addf %594, %593 : vector<8x128xf32>
    %596 = math.tanh %595 : vector<8x128xf32>
    %597 = arith.mulf %591, %596 : vector<8x128xf32>
    %cst_233 = arith.constant 0.000000e+00 : f32
    %598 = vector.broadcast %cst_233 : f32 to vector<8x128xf32>
    %599 = arith.select %4, %595, %598 : vector<8x128xi1>, vector<8x128xf32>
    %cst_234 = arith.constant 0.000000e+00 : f32
    %600 = vector.broadcast %cst_234 : f32 to vector<8x128xf32>
    %601 = arith.select %4, %597, %600 : vector<8x128xi1>, vector<8x128xf32>
    %c7_i32_235 = arith.constant 7 : i32
    %602 = vector.broadcast %c7_i32_235 : i32 to vector<8x1xi32>
    %603 = arith.cmpi sgt, %13, %602 : vector<8x1xi32>
    %604 = vector.shape_cast %603 : vector<8x1xi1> to vector<8x1xi1>
    %605 = vector.broadcast %604 : vector<8x1xi1> to vector<8x128xi1>
    %606 = arith.select %605, %601, %570 : vector<8x128xi1>, vector<8x128xf32>
    %607 = vector.shape_cast %603 : vector<8x1xi1> to vector<8x1xi1>
    %608 = vector.broadcast %607 : vector<8x1xi1> to vector<8x128xi1>
    %609 = arith.select %608, %599, %573 : vector<8x128xi1>, vector<8x128xf32>
    %cst_236 = arith.constant 0.000000e+00 : f32
    %610 = vector.shape_cast %603 : vector<8x1xi1> to vector<8x1xi1>
    %611 = vector.broadcast %610 : vector<8x1xi1> to vector<8x128xi1>
    %612 = vector.broadcast %cst_236 : f32 to vector<8x128xf32>
    %613 = arith.select %611, %601, %612 : vector<8x128xi1>, vector<8x128xf32>
    %c56_237 = arith.constant 56 : index
    %c0_238 = arith.constant 0 : index
    %614 = vector.load %arg11[%c56_237, %c0_238] : memref<64x128xf32, #tpu.memory_space<vmem>>, vector<8x128xf32>
    tpu.vector_store %arg11[%c56_237, %c0_238], %613 {strides = array<i32>} : memref<64x128xf32, #tpu.memory_space<vmem>>, vector<8x128xf32>,
    %c1 = arith.constant 1 : index
    %c0_239 = arith.constant 0 : index
    %c0_240 = arith.constant 0 : index
    %615 = vector.load %arg12[%c1, %c0_239, %c0_240] : memref<2x8x128xf32, #tpu.memory_space<vmem>>, vector<1x8x128xf32>
    %616 = vector.shape_cast %615 : vector<1x8x128xf32> to vector<8x128xf32>
    %617 = vector.shape_cast %606 : vector<8x128xf32> to vector<1x8x128xf32>
    tpu.vector_store %arg12[%c1, %c0_239, %c0_240], %617 {strides = array<i32>} : memref<2x8x128xf32, #tpu.memory_space<vmem>>, vector<1x8x128xf32>,
    %c1_241 = arith.constant 1 : index
    %c0_242 = arith.constant 0 : index
    %c0_243 = arith.constant 0 : index
    %618 = vector.load %arg13[%c1_241, %c0_242, %c0_243] : memref<2x8x128xf32, #tpu.memory_space<vmem>>, vector<1x8x128xf32>
    %619 = vector.shape_cast %618 : vector<1x8x128xf32> to vector<8x128xf32>
    %620 = vector.shape_cast %609 : vector<8x128xf32> to vector<1x8x128xf32>
    tpu.vector_store %arg13[%c1_241, %c0_242, %c0_243], %620 {strides = array<i32>} : memref<2x8x128xf32, #tpu.memory_space<vmem>>, vector<1x8x128xf32>,
    %c0_244 = arith.constant 0 : index
    %c0_245 = arith.constant 0 : index
    %621 = vector.load %arg3[%c0_244, %c0_245] : memref<128x128xf32, #tpu.memory_space<vmem>>, vector<128x128xf32>
    %cst_246 = arith.constant dense<0.000000e+00> : vector<8x128xf32>
    %622 = tpu.matmul %606, %621, %cst_246 {dimension_numbers = #tpu.dot_dimension_numbers<[1], [0], [0], [1], [0, 0, 1, 1], [], []>} : vector<8x128xf32>, vector<128x128xf32>, vector<8x128xf32> -> vector<8x128xf32>
    %c0_247 = arith.constant 0 : index
    %c0_248 = arith.constant 0 : index
    %623 = vector.load %arg4[%c0_247, %c0_248] : memref<1x128xf32, #tpu.memory_space<vmem>>, vector<1x128xf32>
    %624 = vector.broadcast %623 : vector<1x128xf32> to vector<8x128xf32>
    %625 = arith.addf %622, %624 : vector<8x128xf32>
    %c0_249 = arith.constant 0 : index
    %c0_250 = arith.constant 0 : index
    %626 = vector.load %arg14[%c0_249, %c0_250] : memref<8x128xf32, #tpu.memory_space<vmem>>, vector<8x128xf32>
    tpu.vector_store %arg14[%c0_249, %c0_250], %625 {strides = array<i32>} : memref<8x128xf32, #tpu.memory_space<vmem>>, vector<8x128xf32>,
    return
  }
}

</mosaic_0001>

<bundles_post_ra>
// kernel: unilstm_forward.1
= control target key start
LH: loop header
LB: loop body
LE: loop exit
PB: predicated region body
PF: predicated region fallthrough
CT: control target
= control target key end

     0   :  { %20 = vsyncpa [#allocation5], 0  ;;  %s5014_s0 = inlined_call_operand.vmem [shape: s32[64,1], index: 0, kind: input, shape index: {}]   ;;  %s5015_s1 = inlined_call_operand.vmem [shape: s32[8,1], index: 1, kind: input, shape index: {}]   ;;  %s5016_s2 = inlined_call_operand.hbm [shape: f32[128,128], index: 2, kind: input, shape index: {}]   ;;  %s5017_s3 = inlined_call_operand.vmem [shape: f32[128,128], index: 3, kind: input, shape index: {}]   ;;  %s5018_s4 = inlined_call_operand.vmem [shape: f32[1,128], index: 4, kind: input, shape index: {}]   ;;  %s5019_s5 = inlined_call_operand.hbm [shape: bf16[128,128], index: 5, kind: input, shape index: {}]   ;;  %s5020_s6 = inlined_call_operand.hbm [shape: bf16[128,128], index: 6, kind: input, shape index: {}]   ;;  %s5021_s7 = inlined_call_operand.vmem [shape: f32[1,128], index: 7, kind: input, shape index: {}]   ;;  %s5022_s8 = inlined_call_operand.hbm [shape: bf16[128,128], index: 8, kind: input, shape index: {}]   ;;  %s5023_s9 = inlined_call_operand.hbm [shape: bf16[128,128], index: 9, kind: input, shape index: {}]   ;;  %s5024_s10 = inlined_call_operand.vmem [shape: f32[1,128], index: 10, kind: input, shape index: {}]   ;;  %s5025_s11 = inlined_call_operand.vmem [shape: f32[64,128], index: 11, kind: output, shape index: {0}]   ;;  %s5026_s12 = inlined_call_operand.vmem [shape: f32[2,8,128], index: 12, kind: output, shape index: {1}]   ;;  %s5027_s13 = inlined_call_operand.vmem [shape: f32[2,8,128], index: 13, kind: output, shape index: {2}]   ;;  %s5028_s14 = inlined_call_operand.vmem [shape: f32[8,128], index: 14, kind: output, shape index: {3}]  }
   0x1   :  { %21 = vsyncpa [#allocation7], 0 }
   0x2   :  { %22 = vsyncpa [#allocation10], 0  ;;  %s4156_s29 = smov [#allocation6]   ;;  %s4040_s17 = scalar_lea.hbm %s5019_s5, 1024 }
   0x3   :  { %s48_s30 = sshll.u32 %s4156_s29, 4  ;;  %p4041_p0 = scmp.ne.s32.totalorder %s5019_s5, %s4040_s17  ;;  %s49_s30 = int_to_ptr.vmem [resolvable:$true] %s48_s30 }
   0x4   :  { %p4044_p1 = scmp.lt.u32.totalorder %s4040_s17, %s5019_s5 }
   0x6   :  { %p4046_p2 = pnand %p4044_p1, %p4041_p0 }
   0x8   :  { %4049 = shalt.err (!%p4046_p2)
}
   0x9   :  { %s4050_s22 = scalar_lea.vmem %s49_s30, 1024  ;;  %p4055_p4 = scmp.lt.s32.totalorder %s49_s30, %s49_s30 }
   0xa   :  { %p4051_p3 = scmp.ne.s32.totalorder %s49_s30, %s4050_s22  ;;  %p4056_p5 = scmp.lt.s32.totalorder %s4050_s22, %s4050_s22 }
   0xc   :  { %p4057_p6 = por %p4056_p5, %p4055_p4 }
   0xe   :  { %p4058_p7 = pnand %p4057_p6, %p4051_p3 }
  0x10   :  { %4061 = shalt.err (!%p4058_p7)
}
  0x11   :  { %s4157_s23 = smov 64   ;;  %s4158_s24 = smov 4  }
  0x12   :  { %54 = dma.hbm_to_vmem [thread:$0]  %s5019_s5, 1024, %s49_s30, [#allocation7], %s4157_s23, %s4157_s23, %s4158_s24  }
  0x13   :  { %s4159_s27 = smov [#allocation9]   ;;  %s4160_s29 = smov [#allocation4]  }
  0x14   :  { %s74_s28 = sshll.u32 %s4159_s27, 4  ;;  %s32_s15 = sshll.u32 %s4160_s29, 4  ;;  %s75_s28 = int_to_ptr.vmem [resolvable:$true] %s74_s28  ;;  %s33_s15 = int_to_ptr.vmem [resolvable:$true] %s32_s15 }
  0x15   :  { %s4062_s18 = scalar_lea.hbm %s5022_s8, 1024 }
  0x16   :  { %p4063_p8 = scmp.ne.s32.totalorder %s5022_s8, %s4062_s18  ;;  %p4066_p9 = scmp.lt.u32.totalorder %s4062_s18, %s5022_s8 }
  0x18   :  { %p4068_p10 = pnand %p4066_p9, %p4063_p8 }
  0x1a   :  { %4071 = shalt.err (!%p4068_p10)
}
  0x1b   :  { %s4072_s5 = scalar_lea.vmem %s75_s28, 1024  ;;  %p4077_p12 = scmp.lt.s32.totalorder %s75_s28, %s75_s28 }
  0x1c   :  { %p4073_p11 = scmp.ne.s32.totalorder %s75_s28, %s4072_s5  ;;  %p4078_p13 = scmp.lt.s32.totalorder %s4072_s5, %s4072_s5 }
  0x1e   :  { %p4079_p0 = por %p4078_p13, %p4077_p12 }
  0x20   :  { %p4080_p1 = pnand %p4079_p0, %p4073_p11 }
  0x22   :  { %4083 = shalt.err (!%p4080_p1)
}
  0x23   :  { %80 = dma.hbm_to_vmem [thread:$0]  %s5022_s8, 1024, %s75_s28, [#allocation10], %s4157_s23, %s4157_s23, %s4158_s24  }
  0x24   :  { %s4084_s29 = scalar_lea.hbm %s5016_s2, 2048 }
  0x25   :  { %p4085_p2 = scmp.ne.s32.totalorder %s5016_s2, %s4084_s29  ;;  %p4088_p3 = scmp.lt.u32.totalorder %s4084_s29, %s5016_s2 }
  0x27   :  { %p4090_p4 = pnand %p4088_p3, %p4085_p2 }
  0x29   :  { %4093 = shalt.err (!%p4090_p4)
}
  0x2a   :  { %s4094_s20 = scalar_lea.vmem %s33_s15, 2048  ;;  %p4099_p6 = scmp.lt.s32.totalorder %s33_s15, %s33_s15 }
  0x2b   :  { %p4095_p5 = scmp.ne.s32.totalorder %s33_s15, %s4094_s20  ;;  %p4100_p7 = scmp.lt.s32.totalorder %s4094_s20, %s4094_s20 }
  0x2d   :  { %p4101_p8 = por %p4100_p7, %p4099_p6 }
  0x2f   :  { %p4102_p9 = pnand %p4101_p8, %p4095_p5 }
  0x31   :  { %4105 = shalt.err (!%p4102_p9)
}
  0x32   :  { %s4161_s8 = smov 128   ;;  %s4162_s28 = smov 8  }
  0x33   :  { %38 = dma.hbm_to_vmem [thread:$0]  %s5016_s2, 2048, %s33_s15, [#allocation5], %s4161_s8, %s4161_s8, %s4162_s28  }
  0x34   :  { %s4163_s5 = smov [#allocation8]   ;;  %s4164_s25 = smov [#allocation11]  }
  0x35   :  { %s60_s30 = sshll.u32 %s4163_s5, 4  ;;  %s86_s26 = sshll.u32 %s4164_s25, 4  ;;  %s61_s30 = int_to_ptr.vmem [resolvable:$true] %s60_s30  ;;  %s87_s26 = int_to_ptr.vmem [resolvable:$true] %s86_s26 }
  0x36   :  { %s4106_s16 = scalar_lea.hbm %s5020_s6, 1024 }
  0x37   :  { %p4107_p10 = scmp.ne.s32.totalorder %s5020_s6, %s4106_s16  ;;  %p4110_p11 = scmp.lt.u32.totalorder %s4106_s16, %s5020_s6 }
  0x39   :  { %p4112_p12 = pnand %p4110_p11, %p4107_p10 }
  0x3b   :  { %4115 = shalt.err (!%p4112_p12)
}
  0x3c   :  { %s4116_s2 = scalar_lea.vmem %s61_s30, 1024  ;;  %p4121_p0 = scmp.lt.s32.totalorder %s61_s30, %s61_s30 }
  0x3d   :  { %p4117_p13 = scmp.ne.s32.totalorder %s61_s30, %s4116_s2  ;;  %p4122_p1 = scmp.lt.s32.totalorder %s4116_s2, %s4116_s2 }
  0x3f   :  { %p4123_p2 = por %p4122_p1, %p4121_p0 }
  0x41   :  { %p4124_p3 = pnand %p4123_p2, %p4117_p13 }
  0x43   :  { %4127 = shalt.err (!%p4124_p3)
}
  0x44   :  { %66 = dma.hbm_to_vmem [thread:$0]  %s5020_s6, 1024, %s61_s30, [#allocation7], %s4157_s23, %s4157_s23, %s4158_s24  }
  0x45   :  { %s4128_s22 = scalar_lea.hbm %s5023_s9, 1024 }
  0x46   :  { %p4129_p4 = scmp.ne.s32.totalorder %s5023_s9, %s4128_s22  ;;  %p4132_p5 = scmp.lt.u32.totalorder %s4128_s22, %s5023_s9 }
  0x48   :  { %p4134_p6 = pnand %p4132_p5, %p4129_p4 }
  0x4a   :  { %4137 = shalt.err (!%p4134_p6)
}
  0x4b   :  { %s4138_s16 = scalar_lea.vmem %s87_s26, 1024  ;;  %p4143_p8 = scmp.lt.s32.totalorder %s87_s26, %s87_s26 }
  0x4c   :  { %p4139_p7 = scmp.ne.s32.totalorder %s87_s26, %s4138_s16  ;;  %p4144_p9 = scmp.lt.s32.totalorder %s4138_s16, %s4138_s16 }
  0x4e   :  { %p4145_p10 = por %p4144_p9, %p4143_p8 }
  0x50   :  { %p4146_p11 = pnand %p4145_p10, %p4139_p7 }
  0x52   :  { %4149 = shalt.err (!%p4146_p11)
}
  0x53   :  { %92 = dma.hbm_to_vmem [thread:$0]  %s5023_s9, 1024, %s87_s26, [#allocation10], %s4157_s23, %s4157_s23, %s4158_s24  }
  0x54   :  { %4150 = dma.done.wait [#allocation5], 2048  }
  0x55   :  { %4151 = vsyncadd [#allocation5], 4294965248 }
  0x56   :  { %4152 = dma.done.wait [#allocation7], 2048  }
  0x57   :  { %4153 = vsyncadd [#allocation7], 4294965248 }
  0x58   :  { %4154 = dma.done.wait [#allocation10], 2048  }
  0x59   :  { %4155 = vsyncadd [#allocation10], 4294965248  ;;  %v4165_v0 = vmov 0   ;;  %v117_v1 = vld [vmem:[%s5014_s0 + $0x10] sm:$0xff]  ;;  %v115_v2 = vld [vmem:[%s5014_s0] sm:$0xff]  ;;  %v4166_v39 = vmov 0.0   ;;  %v111_v40 = vlaneseq }
  0x5a   :  { %3767 = vset.pattern.permute.xlu1 %v4165_v0  ;;  %3766 = vset.pattern.permute.xlu0 %v4165_v0  ;;  %v118_v3 = vld [vmem:[%s5014_s0 + $0x18] sm:$0xff]  ;;  %v116_v4 = vld [vmem:[%s5014_s0 + $0x8] sm:$0xff]  ;;  %v171_v5 = vld [vmem:[#allocation4] sm:$0xff]  ;;  %v4167_v44 = vmov 1.0   ;;  %vm4168_vm8 = vmmov 0  }
  0x5b   :  { %130 = vperm.xlu1 %3767, %v117_v1   ;;  %124 = vperm.xlu0 %3766, %v115_v2   ;;  %v172_v6 = vld [vmem:[#allocation4 + $0x8] sm:$0xff]  ;;  %v173_v7 = vld [vmem:[#allocation4 + $0x10] sm:$0xff]  ;;  %v174_v8 = vld [vmem:[#allocation4 + $0x18] sm:$0xff]  ;;  %v4345_v41 = vand.u32 127, %v111_v40 }
  0x5c   :  { %v3695_v9 = vpack.c.bf16 %v172_v6, %v171_v5  ;;  %v3699_v10 = vpack.c.bf16 %v174_v8, %v173_v7  ;;  %v175_v11 = vld [vmem:[#allocation4 + $0x20] sm:$0xff]  ;;  %v176_v12 = vld [vmem:[#allocation4 + $0x28] sm:$0xff]  ;;  %v177_v15 = vld [vmem:[#allocation4 + $0x30] sm:$0xff] }
  0x5d   :  { %v120_v13 = vld [vmem:[%s5014_s0 + $0x28] sm:$0xff]  ;;  %v119_v14 = vld [vmem:[%s5014_s0 + $0x20] sm:$0xff]  ;;  %v178_v16 = vld [vmem:[#allocation4 + $0x38] sm:$0xff]  ;;  %v3703_v19 = vpack.c.bf16 %v176_v12, %v175_v11  ;;  %vm113_vm9 = vcmp.ge.s32.totalorder %v4345_v41, 96  ;;  %vm114_vm11 = vcmp.lt.s32.totalorder %v4345_v41, 32 }
  0x5e   :  { %3696 = vmatprep.subr.bf16.mxu0 %v3695_v9  ;;  %v122_v17 = vld [vmem:[%s5014_s0 + $0x38] sm:$0xff]  ;;  %v121_v18 = vld [vmem:[%s5014_s0 + $0x30] sm:$0xff]  ;;  %v179_v20 = vld [vmem:[#allocation4 + $0x40] sm:$0xff]  ;;  %v3707_v22 = vpack.c.bf16 %v178_v16, %v177_v15 }
  0x5f   :  { %133 = vperm.xlu1 %3767, %v118_v3   ;;  %127 = vperm.xlu0 %3766, %v116_v4   ;;  %v180_v21 = vld [vmem:[#allocation4 + $0x48] sm:$0xff]  ;;  %v181_v23 = vld [vmem:[#allocation4 + $0x50] sm:$0xff]  ;;  %v182_v24 = vld [vmem:[#allocation4 + $0x58] sm:$0xff] }
  0x60   :  { %3698 = vmatpush3.bf16.msra.mxu0 %v3695_v9  ;;  %v3711_v25 = vpack.c.bf16 %v180_v21, %v179_v20  ;;  %v3768_v26 = vld [vmem:[#allocation6] sm:$0xff]   ;;  %v3770_v27 = vld [vmem:[#allocation6 + $0x8] sm:$0xff]   ;;  %v3715_v28 = vpack.c.bf16 %v182_v24, %v181_v23  ;;  %v3772_v31 = vld [vmem:[#allocation6 + $0x10] sm:$0xff]  }
  0x61   :  { %3700 = vmatprep.subr.bf16.mxu0 %v3699_v10  ;;  %v183_v29 = vld [vmem:[#allocation4 + $0x60] sm:$0xff]  ;;  %v184_v30 = vld [vmem:[#allocation4 + $0x68] sm:$0xff]  ;;  %3292 = vmatprep.subr.bf16.mxu1 %v3768_v26  ;;  %v185_v32 = vld [vmem:[#allocation4 + $0x70] sm:$0xff] }
  0x62   :  { %3293 = vmatpush3.bf16.msra.mxu1 %v3768_v26  ;;  %v186_v33 = vld [vmem:[#allocation4 + $0x78] sm:$0xff]  ;;  %v3719_v34 = vpack.c.bf16 %v184_v30, %v183_v29  ;;  %v3776_v37 = vld [vmem:[#allocation6 + $0x20] sm:$0xff]   ;;  %v3778_v38 = vld [vmem:[#allocation6 + $0x28] sm:$0xff]  }
  0x63   :  { %139 = vperm.xlu1 %3767, %v120_v13   ;;  %136 = vperm.xlu0 %3766, %v119_v14   ;;  %v3774_v35 = vld [vmem:[#allocation6 + $0x18] sm:$0xff]   ;;  %v3723_v36 = vpack.c.bf16 %v186_v33, %v185_v32  ;;  %v3769_v45 = vld [vmem:[#allocation8] sm:$0xff]   ;;  %v3771_v48 = vld [vmem:[#allocation8 + $0x8] sm:$0xff]  }
  0x64   :  { %3702 = vmatpush3.bf16.msra.mxu0 %v3699_v10  ;;  %3294 = vmatprep.subr.bf16.mxu1 %v3770_v27  ;;  %v3773_v51 = vld [vmem:[#allocation8 + $0x10] sm:$0xff]   ;;  %v3775_v54 = vld [vmem:[#allocation8 + $0x18] sm:$0xff]   ;;  %v3777_v55 = vld [vmem:[#allocation8 + $0x20] sm:$0xff]  }
  0x65   :  { %3704 = vmatprep.subr.bf16.mxu0 %v3703_v19  ;;  %v3779_v56 = vld [vmem:[#allocation8 + $0x28] sm:$0xff]   ;;  %v3780_v57 = vld [vmem:[#allocation6 + $0x30] sm:$0xff]   ;;  %v3782_v59 = vld [vmem:[#allocation6 + $0x38] sm:$0xff]  }
  0x66   :  { %3295 = vmatpush3.bf16.msra.mxu1 %v3770_v27  ;;  %v3781_v58 = vld [vmem:[#allocation8 + $0x30] sm:$0xff]   ;;  %v3783_v60 = vld [vmem:[#allocation8 + $0x38] sm:$0xff]   ;;  %v2856_v14 = vld [vmem:[%s5021_s7] ss:$0 sm:$0xff] }
  0x67   :  { %145 = vperm.xlu1 %3767, %v122_v17   ;;  %142 = vperm.xlu0 %3766, %v121_v18  }
  0x68   :  { %3706 = vmatpush3.bf16.msra.mxu0 %v3703_v19  ;;  %3296 = vmatprep.subr.bf16.mxu1 %v3772_v31 }
  0x69   :  { %3708 = vmatprep.subr.bf16.mxu0 %v3707_v22 }
  0x6a   :  { %3297 = vmatpush3.bf16.msra.mxu1 %v3772_v31 }
  0x6b   :  { %3298 = vmatprep.subr.bf16.mxu1 %v3774_v35 }
  0x6c   :  { %3710 = vmatpush3.bf16.msra.mxu0 %v3707_v22 }
  0x6d   :  { %3712 = vmatprep.subr.bf16.mxu0 %v3711_v25 }
  0x6e   :  { %3299 = vmatpush3.bf16.msra.mxu1 %v3774_v35  ;;  %v4391_v35 = vld [vmem:[%s5015_s1] sm:$0xff]  ;;  %s4169_s1 = smov 32  }
  0x6f   :  { %3300 = vmatprep.subr.bf16.mxu1 %v3776_v37  ;;  %vm566_vm10 = vcmp.gt.s32.totalorder %v4391_v35, 0  ;;  %vm701_vm14 = vcmp.gt.s32.totalorder %v4391_v35, 1 }
  0x70   :  { %3714 = vmatpush3.bf16.msra.mxu0 %v3711_v25  ;;  %v567_v40 = vsel %vm566_vm10, 1, %v4165_v0 }
  0x71   :  { %3716 = vmatprep.subr.bf16.mxu0 %v3715_v28 }
  0x72   :  { %3301 = vmatpush3.bf16.msra.mxu1 %v3776_v37 }
  0x73   :  { %3302 = vmatprep.subr.bf16.mxu1 %v3778_v38 }
  0x74   :  { %3718 = vmatpush3.bf16.msra.mxu0 %v3715_v28 }
  0x75   :  { %3720 = vmatprep.subr.bf16.mxu0 %v3719_v34 }
  0x76   :  { %3303 = vmatpush3.bf16.msra.mxu1 %v3778_v38 }
  0x77   :  { %3304 = vmatprep.subr.bf16.mxu1 %v3780_v57 }
  0x78   :  { %3722 = vmatpush3.bf16.msra.mxu0 %v3719_v34 }
  0x79   :  { %3724 = vmatprep.subr.bf16.mxu0 %v3723_v36 }
  0x7a   :  { %3305 = vmatpush3.bf16.msra.mxu1 %v3780_v57 }
  0x7b   :  { %3306 = vmatprep.subr.bf16.mxu1 %v3782_v59 }
  0x7c   :  { %3726 = vmatpush3.bf16.msra.mxu0 %v3723_v36 }
  0x7d   :  { %3316 = vmatprep.subr.bf16.mxu0 %v4166_v39 }
  0x7e   :  { %3307 = vmatpush3.bf16.msra.mxu1 %v3782_v59 }
  0x7f   :  { %3336 = vmatprep.subr.bf16.mxu1 %v4166_v39 }
  0xda   :  { %v131_v42 = vpop.permute.xlu1 %130  ;;  %v125_v43 = vpop.permute.xlu0 %124 }
  0xdb   :  { %vm147_vm0 = vcmp.eq.s32.totalorder %v125_v43, %v4345_v41  ;;  %vm149_vm1 = vcmp.eq.s32.totalorder %v131_v42, %v4345_v41  ;;  %v3784_v42 = vld [vmem:[#allocation8] sm:$0xff]   ;;  %v3785_v43 = vld [vmem:[#allocation8 + $0x8] sm:$0xff]  }
  0xdc   :  { %3280 = vmatprep.mubr.msk.f32.mxu0 %vm147_vm0, %v4167_v44  ;;  %vm837_vm0 = vcmp.gt.s32.totalorder %v4391_v35, 2 }
  0xde   :  { %v134_v46 = vpop.permute.xlu1 %133  ;;  %v128_v47 = vpop.permute.xlu0 %127 }
  0xdf   :  { %vm148_vm2 = vcmp.eq.s32.totalorder %v128_v47, %v4345_v41  ;;  %vm150_vm3 = vcmp.eq.s32.totalorder %v134_v46, %v4345_v41  ;;  %v3788_v46 = vld [vmem:[#allocation8 + $0x20] sm:$0xff]   ;;  %v3789_v47 = vld [vmem:[#allocation8 + $0x28] sm:$0xff]  }
  0xe0   :  { %3281 = vmatmul.mubr.msk.f32.vlgmr.msra.gmra.mrb[0].mxu0 %vm148_vm2, %v4167_v44  ;;  %vm973_vm2 = vcmp.gt.s32.totalorder %v4391_v35, 3 }
  0xe1   :  { %3283 = vmatprep.mubr.msk.f32.mxu0 %vm149_vm1, %v4167_v44  ;;  %3317 = vmatpush3.bf16.msra.mxu0 %v3769_v45  ;;  %v3787_v45 = vld [vmem:[#allocation8 + $0x18] sm:$0xff]  }
  0xe2   :  { %v140_v49 = vpop.permute.xlu1 %139  ;;  %v137_v50 = vpop.permute.xlu0 %136  ;;  %3318 = vmatprep.subr.bf16.mxu0 %v4166_v39 }
  0xe3   :  { %vm151_vm4 = vcmp.eq.s32.totalorder %v137_v50, %v4345_v41  ;;  %vm152_vm5 = vcmp.eq.s32.totalorder %v140_v49, %v4345_v41 }
  0xe4   :  { %3284 = vmatmul.mubr.msk.f32.gmra.mrb[2].mxu0 %vm150_vm3, %v4167_v44 }
  0xe5   :  { %3286 = vmatprep.mubr.msk.f32.mxu0 %vm151_vm4, %v4167_v44  ;;  %3319 = vmatpush3.bf16.msra.mxu0 %v3771_v48  ;;  %v3790_v48 = vld [vmem:[#allocation8 + $0x30] sm:$0xff]   ;;  %vm1109_vm4 = vcmp.gt.s32.totalorder %v4391_v35, 4 }
  0xe6   :  { %v143_v52 = vpop.permute.xlu0 %142  ;;  %3320 = vmatprep.subr.bf16.mxu0 %v4166_v39  ;;  %v146_v53 = vpop.permute.xlu1 %145 }
  0xe7   :  { %vm153_vm6 = vcmp.eq.s32.totalorder %v143_v52, %v4345_v41  ;;  %vm154_vm7 = vcmp.eq.s32.totalorder %v146_v53, %v4345_v41  ;;  %v3026_v41 = vld [vmem:[%s5018_s4] ss:$0 sm:$0xff] }
  0xe8   :  { %3287 = vmatmul.mubr.msk.f32.gmra.mrb[4].mxu0 %vm152_vm5, %v4167_v44 }
  0xe9   :  { %3289 = vmatprep.mubr.msk.f32.mxu0 %vm153_vm6, %v4167_v44  ;;  %3321 = vmatpush3.bf16.msra.mxu0 %v3773_v51  ;;  %v3791_v51 = vld [vmem:[#allocation8 + $0x38] sm:$0xff]   ;;  %vm1245_vm6 = vcmp.gt.s32.totalorder %v4391_v35, 5 }
  0xea   :  { %3322 = vmatprep.subr.bf16.mxu0 %v4166_v39 }
  0xec   :  { %3290 = vmatmul.mubr.msk.f32.gmra.mrb[6].mxu0 %vm154_vm7, %v4167_v44  ;;  %v3786_v44 = vld [vmem:[#allocation8 + $0x10] sm:$0xff]  }
  0xed   :  { %3323 = vmatpush3.bf16.msra.mxu0 %v3775_v54  ;;  %3332 = vmatprep.mubr.msk.bf16.mxu0 %vm4168_vm8, %v4166_v39 }
  0xee   :  { %3324 = vmatprep.subr.bf16.mxu0 %v4166_v39 }
  0xf1   :  { %3325 = vmatpush3.bf16.msra.mxu0 %v3777_v55 }
  0xf2   :  { %3326 = vmatprep.subr.bf16.mxu0 %v4166_v39 }
  0xf5   :  { %3327 = vmatpush3.bf16.msra.mxu0 %v3779_v56 }
  0xf6   :  { %3328 = vmatprep.subr.bf16.mxu0 %v4166_v39 }
  0xf9   :  { %3329 = vmatpush3.bf16.msra.mxu0 %v3781_v58 }
  0xfa   :  { %3330 = vmatprep.subr.bf16.mxu0 %v4166_v39 }
  0xfd   :  { %3331 = vmatpush3.bf16.msra.mxu0 %v3783_v60 }
  0xfe   :  { %3356 = vmatprep.subr.bf16.mxu0 %v4166_v39 }
 0x100   :  { %3333 = vmatmul.mubr.bf16.vlgmr.msra.gmra.mrb[8].mxu0 %v4165_v0 }
 0x101   :  { %3372 = vmatprep.mubr.msk.bf16.mxu0 %vm4168_vm8, %v4166_v39 }
 0x1b3   :  { %v3282_v61 = vpop.f32.mrb[0].mxu0 }
 0x1b4   :  { %v253_v62 = vpop.f32.mrb[1].mxu0 }
 0x1b5   :  { %v293_v63 = vpack.c.bf16 %v3282_v61, %v253_v62 }
 0x1b7   :  { %v3285_v1 = vpop.f32.mrb[2].mxu0  ;;  %3308 = vmatprep.mubr.bf16.mxu1 %v293_v63 }
 0x1b8   :  { %v263_v2 = vpop.f32.mrb[3].mxu0 }
 0x1b9   :  { %v294_v3 = vpack.c.bf16 %v3285_v1, %v263_v2 }
 0x1bb   :  { %v3288_v4 = vpop.f32.mrb[4].mxu0  ;;  %3309 = vmatmul.mubr.bf16.vlgmr.msra.gmra.mrb[0].mxu1 %v294_v3 }
 0x1bc   :  { %v273_v5 = vpop.f32.mrb[5].mxu0  ;;  %3337 = vmatpush3.bf16.msra.mxu1 %v3784_v42 }
 0x1bd   :  { %v295_v6 = vpack.c.bf16 %v3288_v4, %v273_v5  ;;  %3338 = vmatprep.subr.bf16.mxu1 %v4166_v39 }
 0x1bf   :  { %v3291_v7 = vpop.f32.mrb[6].mxu0  ;;  %3312 = vmatprep.mubr.bf16.mxu1 %v295_v6 }
 0x1c0   :  { %v283_v8 = vpop.f32.mrb[7].mxu0  ;;  %3339 = vmatpush3.bf16.msra.mxu1 %v3785_v43 }
 0x1c1   :  { %v296_v9 = vpack.c.bf16 %v3291_v7, %v283_v8  ;;  %3340 = vmatprep.subr.bf16.mxu1 %v4166_v39 }
 0x1c3   :  { %3313 = vmatmul.mubr.bf16.gmra.mrb[4].mxu1 %v296_v9  ;;  %v702_v9 = vsel %vm701_vm14, 1, %v4165_v0 }
 0x1c4   :  { %3352 = vmatprep.mubr.msk.bf16.mxu1 %vm4168_vm8, %v4166_v39  ;;  %3341 = vmatpush3.bf16.msra.mxu1 %v3786_v44 }
 0x1c5   :  { %3342 = vmatprep.subr.bf16.mxu1 %v4166_v39 }
 0x1c8   :  { %3343 = vmatpush3.bf16.msra.mxu1 %v3787_v45 }
 0x1c9   :  { %3344 = vmatprep.subr.bf16.mxu1 %v4166_v39 }
 0x1cc   :  { %3345 = vmatpush3.bf16.msra.mxu1 %v3788_v46 }
 0x1cd   :  { %3346 = vmatprep.subr.bf16.mxu1 %v4166_v39 }
 0x1d0   :  { %3347 = vmatpush3.bf16.msra.mxu1 %v3789_v47 }
 0x1d1   :  { %3348 = vmatprep.subr.bf16.mxu1 %v4166_v39 }
 0x1d3   :  { %v540_v10 = vpop.f32.mrb[8].mxu0 }
 0x1d4   :  { %v3334_v11 = vpop.f32.mrb[9].mxu0  ;;  %3349 = vmatpush3.bf16.msra.mxu1 %v3790_v48 }
 0x1d5   :  { %v543_v12 = vpop.f32.mrb[10].mxu0  ;;  %3350 = vmatprep.subr.bf16.mxu1 %v4166_v39  ;;  %v3793_v11 = vld [vmem:[#allocation8 + $0x8] sm:$0xff]  }
 0x1d6   :  { %v3335_v13 = vpop.f32.mrb[11].mxu0  ;;  %v3794_v12 = vld [vmem:[#allocation8 + $0x10] sm:$0xff]  }
 0x1d7   :  { %v3795_v13 = vld [vmem:[#allocation8 + $0x18] sm:$0xff]  }
 0x1d8   :  { %3351 = vmatpush3.bf16.msra.mxu1 %v3791_v51 }
 0x1d9   :  { %3376 = vmatprep.subr.bf16.mxu1 %v4166_v39 }
 0x28e   :  { %v3310_v15 = vpop.f32.mrb[0].mxu1 }
 0x28f   :  { %v4374_v16 = vadd.f32 %v3310_v15, %v2856_v14  ;;  %v402_v17 = vpop.f32.mrb[1].mxu1  ;;  %v3797_v15 = vld [vmem:[#allocation8 + $0x28] sm:$0xff]  }
 0x290   :  { %v403_v18 = vadd.f32 %v2856_v14, %v402_v17  ;;  %v3311_v19 = vpop.f32.mrb[2].mxu1  ;;  %v3798_v17 = vld [vmem:[#allocation8 + $0x30] sm:$0xff]  }
 0x291   :  { %v4376_v20 = vadd.f32 %v3311_v19, %v2856_v14  ;;  %v405_v21 = vpop.f32.mrb[3].mxu1 }
 0x292   :  { %v546_v22 = vadd.f32 %v540_v10, %v403_v18  ;;  %v4378_v23 = vadd.f32 %v2856_v14, %v405_v21  ;;  %v3792_v10 = vld [vmem:[#allocation8] sm:$0xff]   ;;  %v3799_v21 = vld [vmem:[#allocation8 + $0x38] sm:$0xff]  }
 0x293   :  { %3357 = vmatpush3.bf16.msra.mxu0 %v3792_v10 }
 0x294   :  { %v2873_v24 = vmul.f32 -1.442695, %v546_v22  ;;  %3358 = vmatprep.subr.bf16.mxu0 %v4166_v39 }
 0x296   :  { %3912 = vpow2.f32 %v2873_v24  ;;  %v3314_v25 = vpop.f32.mrb[4].mxu1 }
 0x297   :  { %v4380_v26 = vadd.f32 %v3314_v25, %v2856_v14  ;;  %v418_v27 = vpop.f32.mrb[5].mxu1  ;;  %3914 = vtanh.f32 %v546_v22  ;;  %3359 = vmatpush3.bf16.msra.mxu0 %v3793_v11 }
 0x298   :  { %v4382_v28 = vadd.f32 %v2856_v14, %v418_v27  ;;  %v3315_v29 = vpop.f32.mrb[6].mxu1  ;;  %3360 = vmatprep.subr.bf16.mxu0 %v4166_v39 }
 0x299   :  { %v4384_v30 = vadd.f32 %v3315_v29, %v2856_v14  ;;  %v421_v31 = vpop.f32.mrb[7].mxu1 }
 0x29a   :  { %v4386_v32 = vadd.f32 %v2856_v14, %v421_v31  ;;  %v3796_v14 = vld [vmem:[#allocation8 + $0x20] sm:$0xff]  }
 0x29b   :  { %3361 = vmatpush3.bf16.msra.mxu0 %v3794_v12 }
 0x29c   :  { %3362 = vmatprep.subr.bf16.mxu0 %v4166_v39 }
 0x29f   :  { %3363 = vmatpush3.bf16.msra.mxu0 %v3795_v13 }
 0x2a0   :  { %v3913_v33 = vpop.eup %3912  ;;  %3364 = vmatprep.subr.bf16.mxu0 %v4166_v39 }
 0x2a1   :  { %v551_v34 = vadd.f32 1.0, %v3913_v33  ;;  %v3915_v36 = vpop.eup %3914 }
 0x2a3   :  { %3916 = vrcp.f32 %v551_v34  ;;  %3365 = vmatpush3.bf16.msra.mxu0 %v3796_v14 }
 0x2a4   :  { %3366 = vmatprep.subr.bf16.mxu0 %v4166_v39 }
 0x2a7   :  { %3367 = vmatpush3.bf16.msra.mxu0 %v3797_v15 }
 0x2a8   :  { %3368 = vmatprep.subr.bf16.mxu0 %v4166_v39 }
 0x2ab   :  { %3369 = vmatpush3.bf16.msra.mxu0 %v3798_v17 }
 0x2ac   :  { %3370 = vmatprep.subr.bf16.mxu0 %v4166_v39 }
 0x2ad   :  { %v3917_v37 = vpop.eup %3916 }
 0x2ae   :  { %v554_v38 = vsel %vm113_vm9, %v3915_v36, %v3917_v37 }
 0x2af   :  { %555 = vrot.lane.b32.xlu0 %v554_v38, %s4157_s23  ;;  %v560_v52 = vmul.f32 0.0, %v554_v38  ;;  %3371 = vmatpush3.bf16.msra.mxu0 %v3799_v21 }
 0x2b0   :  { %3396 = vmatprep.subr.bf16.mxu0 %v4166_v39 }
 0x2b3   :  { %569 = vperm.xlu0 %3766, %v567_v40  }
 0x321   :  { %v556_v49 = vpop.permute.xlu0 %555 }
 0x322   :  { %v557_v50 = vmul.f32 %v556_v49, %v554_v38 }
 0x324   :  { %558 = vrot.lane.b32.xlu1 %v557_v50, %s4169_s1 }
 0x332   :  { %v4408_v55 = vpop.permute.xlu0 %569 }
 0x333   :  { %vm571_vm12 = vcmp.eq.s32.totalorder %v4408_v55, 1 }
 0x334   :  { %vm4421_vm13 = vmpackc.low %vm571_vm12, %vm571_vm12 }
 0x396   :  { %v559_v53 = vpop.permute.xlu1 %558 }
 0x397   :  { %v561_v54 = vadd.f32 %v560_v52, %v559_v53  ;;  %v3800_v52 = vld [vmem:[#allocation8] sm:$0xff]   ;;  %v3801_v53 = vld [vmem:[#allocation8 + $0x8] sm:$0xff]  }
 0x399   :  { %3918 = vtanh.f32 %v561_v54  ;;  %v564_v22 = vsel %vm114_vm11, %v561_v54, 0.0  ;;  %v3802_v54 = vld [vmem:[#allocation8 + $0x10] sm:$0xff]  }
 0x3a3   :  { %v3919_v56 = vpop.eup %3918 }
 0x3a4   :  { %v563_v57 = vmul.f32 %v3919_v56, %v556_v49  ;;  %v3803_v56 = vld [vmem:[#allocation8 + $0x18] sm:$0xff]  }
 0x3a6   :  { %v4414_v58 = vsel %vm114_vm11, %v563_v57, 0.0  ;;  %v3804_v57 = vld [vmem:[#allocation8 + $0x20] sm:$0xff]  }
 0x3a7   :  { %v2883_v59 = vpack.c.bf16 %v4414_v58, %v4414_v58  ;;  %v572_v34 = vsel %vm571_vm12, %v4414_v58, 0.0 }
 0x3a9   :  { %3353 = vmatmul.mubr.msk.bf16.vlgmr.msra.gmra.mrb[8].mxu1 %vm4421_vm13, %v2883_v59  ;;  %v3805_v59 = vld [vmem:[#allocation8 + $0x28] sm:$0xff]  }
 0x3aa   :  { %3392 = vmatprep.mubr.msk.bf16.mxu1 %vm4168_vm8, %v4166_v39  ;;  %3377 = vmatpush3.bf16.msra.mxu1 %v3800_v52 }
 0x3ab   :  { %3378 = vmatprep.subr.bf16.mxu1 %v4166_v39 }
 0x3ae   :  { %3379 = vmatpush3.bf16.msra.mxu1 %v3801_v53 }
 0x3af   :  { %3380 = vmatprep.subr.bf16.mxu1 %v4166_v39 }
 0x3b2   :  { %3381 = vmatpush3.bf16.msra.mxu1 %v3802_v54 }
 0x3b3   :  { %3382 = vmatprep.subr.bf16.mxu1 %v4166_v39 }
 0x3b6   :  { %3383 = vmatpush3.bf16.msra.mxu1 %v3803_v56 }
 0x3b7   :  { %3384 = vmatprep.subr.bf16.mxu1 %v4166_v39 }
 0x3ba   :  { %3385 = vmatpush3.bf16.msra.mxu1 %v3804_v57 }
 0x3bb   :  { %3386 = vmatprep.subr.bf16.mxu1 %v4166_v39 }
 0x3be   :  { %3387 = vmatpush3.bf16.msra.mxu1 %v3805_v59 }
 0x3bf   :  { %3388 = vmatprep.subr.bf16.mxu1 %v4166_v39 }
 0x47c   :  { %v675_v61 = vpop.f32.mrb[8].mxu1 }
 0x47d   :  { %v681_v62 = vadd.f32 %v675_v61, %v4378_v23  ;;  %v3354_v63 = vpop.f32.mrb[9].mxu1  ;;  %v573_v23 = vsel %vm571_vm12, %v564_v22, 0.0  ;;  %v3806_v61 = vld [vmem:[#allocation8 + $0x30] sm:$0xff]  }
 0x47e   :  { %v678_v1 = vpop.f32.mrb[10].mxu1  ;;  %3389 = vmatpush3.bf16.msra.mxu1 %v3806_v61 }
 0x47f   :  { %v2885_v2 = vmul.f32 -1.442695, %v681_v62  ;;  %v3355_v3 = vpop.f32.mrb[11].mxu1  ;;  %v3807_v1 = vld [vmem:[#allocation8 + $0x38] sm:$0xff]   ;;  %3390 = vmatprep.subr.bf16.mxu1 %v4166_v39 }
 0x481   :  { %3920 = vpow2.f32 %v2885_v2 }
 0x482   :  { %3922 = vtanh.f32 %v681_v62  ;;  %3391 = vmatpush3.bf16.msra.mxu1 %v3807_v1 }
 0x483   :  { %3416 = vmatprep.subr.bf16.mxu1 %v4166_v39 }
 0x48b   :  { %v3921_v4 = vpop.eup %3920 }
 0x48c   :  { %v686_v5 = vadd.f32 1.0, %v3921_v4  ;;  %v3923_v6 = vpop.eup %3922 }
 0x48e   :  { %3924 = vrcp.f32 %v686_v5 }
 0x498   :  { %v3925_v7 = vpop.eup %3924 }
 0x499   :  { %v689_v8 = vsel %vm113_vm9, %v3923_v6, %v3925_v7 }
 0x49a   :  { %690 = vrot.lane.b32.xlu1 %v689_v8, %s4157_s23  ;;  %v695_v24 = vmul.f32 %v689_v8, %v573_v23 }
 0x49e   :  { %704 = vperm.xlu1 %3767, %v702_v9  }
 0x50c   :  { %v691_v18 = vpop.permute.xlu1 %690 }
 0x50d   :  { %v692_v19 = vmul.f32 %v691_v18, %v689_v8 }
 0x50f   :  { %693 = vrot.lane.b32.xlu0 %v692_v19, %s4169_s1 }
 0x51d   :  { %v4448_v31 = vpop.permute.xlu1 %704 }
 0x51e   :  { %vm706_vm15 = vcmp.eq.s32.totalorder %v4448_v31, 1 }
 0x51f   :  { %vm3027_vm10 = vmpackc.low %vm706_vm15, %vm571_vm12 }
 0x581   :  { %v694_v25 = vpop.permute.xlu0 %693 }
 0x582   :  { %v696_v27 = vadd.f32 %v695_v24, %v694_v25 }
 0x584   :  { %3926 = vtanh.f32 %v696_v27  ;;  %v699_v2 = vsel %vm114_vm11, %v696_v27, 0.0  ;;  %v3808_v27 = vld [vmem:[#allocation8] sm:$0xff]  }
 0x585   :  { %v708_v3 = vsel %vm706_vm15, %v699_v2, %v573_v23 }
 0x58e   :  { %v3927_v29 = vpop.eup %3926 }
 0x58f   :  { %v698_v33 = vmul.f32 %v3927_v29, %v691_v18  ;;  %v3809_v29 = vld [vmem:[#allocation8 + $0x8] sm:$0xff]  }
 0x591   :  { %v4456_v36 = vsel %vm114_vm11, %v698_v33, 0.0  ;;  %v3810_v33 = vld [vmem:[#allocation8 + $0x10] sm:$0xff]  }
 0x592   :  { %v707_v37 = vsel %vm706_vm15, %v4456_v36, %v572_v34  ;;  %v3811_v34 = vld [vmem:[#allocation8 + $0x18] sm:$0xff]  }
 0x593   :  { %v712_v38 = vpack.c.bf16 %v707_v37, %v707_v37 }
 0x595   :  { %3373 = vmatmul.mubr.bf16.vlgmr.msra.gmra.mrb[12].mxu0 %v712_v38  ;;  %v3813_v38 = vld [vmem:[#allocation8 + $0x28] sm:$0xff]  }
 0x596   :  { %3412 = vmatprep.mubr.msk.bf16.mxu0 %vm4168_vm8, %v4166_v39  ;;  %3397 = vmatpush3.bf16.msra.mxu0 %v3808_v27 }
 0x597   :  { %3398 = vmatprep.subr.bf16.mxu0 %v4166_v39 }
 0x59a   :  { %3399 = vmatpush3.bf16.msra.mxu0 %v3809_v29 }
 0x59b   :  { %3400 = vmatprep.subr.bf16.mxu0 %v4166_v39 }
 0x59e   :  { %3401 = vmatpush3.bf16.msra.mxu0 %v3810_v33 }
 0x59f   :  { %3402 = vmatprep.subr.bf16.mxu0 %v4166_v39 }
 0x5a2   :  { %3403 = vmatpush3.bf16.msra.mxu0 %v3811_v34 }
 0x5a3   :  { %3404 = vmatprep.subr.bf16.mxu0 %v4166_v39 }
 0x668   :  { %v811_v40 = vpop.f32.mrb[12].mxu0 }
 0x669   :  { %v817_v42 = vadd.f32 %v811_v40, %v4374_v16  ;;  %v3374_v43 = vpop.f32.mrb[13].mxu0  ;;  %v838_v16 = vsel %vm837_vm0, 1, %v4165_v0  ;;  %v3814_v40 = vld [vmem:[#allocation8 + $0x30] sm:$0xff]  }
 0x66a   :  { %v814_v44 = vpop.f32.mrb[14].mxu0 }
 0x66b   :  { %v2894_v45 = vmul.f32 -1.442695, %v817_v42  ;;  %v3375_v46 = vpop.f32.mrb[15].mxu0  ;;  %v3815_v44 = vld [vmem:[#allocation8 + $0x38] sm:$0xff]  }
 0x66d   :  { %3928 = vpow2.f32 %v2894_v45 }
 0x66e   :  { %3930 = vtanh.f32 %v817_v42 }
 0x677   :  { %v3929_v47 = vpop.eup %3928 }
 0x678   :  { %v822_v48 = vadd.f32 1.0, %v3929_v47  ;;  %v3931_v49 = vpop.eup %3930 }
 0x67a   :  { %3932 = vrcp.f32 %v822_v48 }
 0x684   :  { %v3933_v50 = vpop.eup %3932 }
 0x685   :  { %v825_v51 = vsel %vm113_vm9, %v3931_v49, %v3933_v50 }
 0x686   :  { %826 = vrot.lane.b32.xlu0 %v825_v51, %s4157_s23  ;;  %v831_v4 = vmul.f32 %v825_v51, %v708_v3 }
 0x68a   :  { %840 = vperm.xlu0 %3766, %v838_v16  }
 0x6f8   :  { %v827_v62 = vpop.permute.xlu0 %826 }
 0x6f9   :  { %v828_v63 = vmul.f32 %v827_v62, %v825_v51 }
 0x6fb   :  { %829 = vrot.lane.b32.xlu1 %v828_v63, %s4169_s1 }
 0x709   :  { %v4482_v8 = vpop.permute.xlu0 %840 }
 0x70a   :  { %vm842_vm1 = vcmp.eq.s32.totalorder %v4482_v8, 1 }
 0x76d   :  { %v830_v5 = vpop.permute.xlu1 %829 }
 0x76e   :  { %v832_v6 = vadd.f32 %v831_v4, %v830_v5 }
 0x770   :  { %3934 = vtanh.f32 %v832_v6  ;;  %v835_v45 = vsel %vm114_vm11, %v832_v6, 0.0  ;;  %v3816_v6 = vld [vmem:[#allocation8] sm:$0xff]  }
 0x771   :  { %v844_v46 = vsel %vm842_vm1, %v835_v45, %v708_v3 }
 0x77a   :  { %v3935_v7 = vpop.eup %3934 }
 0x77b   :  { %v834_v9 = vmul.f32 %v3935_v7, %v827_v62  ;;  %v3817_v7 = vld [vmem:[#allocation8 + $0x8] sm:$0xff]  }
 0x77d   :  { %v4487_v10 = vsel %vm114_vm11, %v834_v9, 0.0  ;;  %v3818_v9 = vld [vmem:[#allocation8 + $0x10] sm:$0xff]  }
 0x77e   :  { %v843_v11 = vsel %vm842_vm1, %v4487_v10, %v707_v37  ;;  %v3812_v37 = vld [vmem:[#allocation8 + $0x20] sm:$0xff]  }
 0x77f   :  { %v848_v12 = vpack.c.bf16 %v843_v11, %v843_v11  ;;  %3405 = vmatpush3.bf16.msra.mxu0 %v3812_v37 }
 0x780   :  { %3406 = vmatprep.subr.bf16.mxu0 %v4166_v39 }
 0x781   :  { %3393 = vmatmul.mubr.bf16.vlgmr.msra.gmra.mrb[12].mxu1 %v848_v12  ;;  %v3820_v12 = vld [vmem:[#allocation8 + $0x20] sm:$0xff]  }
 0x782   :  { %3432 = vmatprep.mubr.msk.bf16.mxu1 %vm4168_vm8, %v4166_v39  ;;  %3417 = vmatpush3.bf16.msra.mxu1 %v3816_v6 }
 0x783   :  { %3407 = vmatpush3.bf16.msra.mxu0 %v3813_v38  ;;  %3418 = vmatprep.subr.bf16.mxu1 %v4166_v39 }
 0x784   :  { %3408 = vmatprep.subr.bf16.mxu0 %v4166_v39 }
 0x786   :  { %3419 = vmatpush3.bf16.msra.mxu1 %v3817_v7 }
 0x787   :  { %3409 = vmatpush3.bf16.msra.mxu0 %v3814_v40  ;;  %3420 = vmatprep.subr.bf16.mxu1 %v4166_v39 }
 0x788   :  { %3410 = vmatprep.subr.bf16.mxu0 %v4166_v39 }
 0x78a   :  { %3421 = vmatpush3.bf16.msra.mxu1 %v3818_v9 }
 0x78b   :  { %3411 = vmatpush3.bf16.msra.mxu0 %v3815_v44  ;;  %3422 = vmatprep.subr.bf16.mxu1 %v4166_v39 }
 0x78c   :  { %3436 = vmatprep.subr.bf16.mxu0 %v4166_v39 }
 0x854   :  { %v947_v13 = vpop.f32.mrb[12].mxu1 }
 0x855   :  { %v953_v14 = vadd.f32 %v947_v13, %v4376_v20  ;;  %v3394_v15 = vpop.f32.mrb[13].mxu1  ;;  %v974_v20 = vsel %vm973_vm2, 1, %v4165_v0  ;;  %v3821_v13 = vld [vmem:[#allocation8 + $0x28] sm:$0xff]   ;;  %vm1381_vm2 = vcmp.gt.s32.totalorder %v4391_v35, 6 }
 0x856   :  { %v950_v17 = vpop.f32.mrb[14].mxu1 }
 0x857   :  { %v2903_v18 = vmul.f32 -1.442695, %v953_v14  ;;  %v3395_v19 = vpop.f32.mrb[15].mxu1 }
 0x859   :  { %3936 = vpow2.f32 %v2903_v18  ;;  %v3823_v18 = vld [vmem:[#allocation8 + $0x38] sm:$0xff]  }
 0x85a   :  { %3938 = vtanh.f32 %v953_v14  ;;  %v3822_v14 = vld [vmem:[#allocation8 + $0x30] sm:$0xff]  }
 0x863   :  { %v3937_v21 = vpop.eup %3936 }
 0x864   :  { %v958_v22 = vadd.f32 1.0, %v3937_v21  ;;  %v3939_v23 = vpop.eup %3938 }
 0x866   :  { %3940 = vrcp.f32 %v958_v22 }
 0x870   :  { %v3941_v24 = vpop.eup %3940 }
 0x871   :  { %v961_v25 = vsel %vm113_vm9, %v3939_v23, %v3941_v24 }
 0x872   :  { %962 = vrot.lane.b32.xlu1 %v961_v25, %s4157_s23  ;;  %v967_v47 = vmul.f32 %v961_v25, %v844_v46 }
 0x876   :  { %976 = vperm.xlu1 %3767, %v974_v20  }
 0x8e4   :  { %v963_v42 = vpop.permute.xlu1 %962 }
 0x8e5   :  { %v964_v43 = vmul.f32 %v963_v42, %v961_v25 }
 0x8e7   :  { %965 = vrot.lane.b32.xlu0 %v964_v43, %s4169_s1 }
 0x8f5   :  { %v4513_v51 = vpop.permute.xlu1 %976 }
 0x8f6   :  { %vm978_vm3 = vcmp.eq.s32.totalorder %v4513_v51, 1 }
 0x8f7   :  { %vm3030_vm14 = vmpackc.low %vm978_vm3, %vm842_vm1 }
 0x959   :  { %v966_v48 = vpop.permute.xlu0 %965 }
 0x95a   :  { %v968_v49 = vadd.f32 %v967_v47, %v966_v48 }
 0x95c   :  { %3942 = vtanh.f32 %v968_v49  ;;  %v971_v19 = vsel %vm114_vm11, %v968_v49, 0.0 }
 0x95d   :  { %v980_v21 = vsel %vm978_vm3, %v971_v19, %v844_v46  ;;  %v3836_v19 = vld [vmem:[#allocation9 + $0x20] sm:$0xff]  }
 0x966   :  { %v3943_v50 = vpop.eup %3942 }
 0x967   :  { %v970_v16 = vmul.f32 %v3943_v50, %v963_v42  ;;  %v3824_v50 = vld [vmem:[#allocation8] sm:$0xff]  }
 0x969   :  { %v4518_v52 = vsel %vm114_vm11, %v970_v16, 0.0  ;;  %v3825_v16 = vld [vmem:[#allocation8 + $0x8] sm:$0xff]  }
 0x96a   :  { %v979_v53 = vsel %vm978_vm3, %v4518_v52, %v843_v11  ;;  %v3819_v11 = vld [vmem:[#allocation8 + $0x18] sm:$0xff]  }
 0x96b   :  { %v984_v54 = vpack.c.bf16 %v979_v53, %v979_v53  ;;  %3423 = vmatpush3.bf16.msra.mxu1 %v3819_v11 }
 0x96c   :  { %3424 = vmatprep.subr.bf16.mxu1 %v4166_v39 }
 0x96d   :  { %3413 = vmatmul.mubr.bf16.vlgmr.msra.gmra.mrb[16].mxu0 %v984_v54  ;;  %v3827_v54 = vld [vmem:[#allocation8 + $0x18] sm:$0xff]  }
 0x96e   :  { %3452 = vmatprep.mubr.msk.bf16.mxu0 %vm4168_vm8, %v4166_v39  ;;  %3437 = vmatpush3.bf16.msra.mxu0 %v3824_v50  ;;  %v3845_v50 = vld [vmem:[#allocation8 + $0x28] sm:$0xff]  }
 0x96f   :  { %3425 = vmatpush3.bf16.msra.mxu1 %v3820_v12  ;;  %3438 = vmatprep.subr.bf16.mxu0 %v4166_v39 }
 0x970   :  { %3426 = vmatprep.subr.bf16.mxu1 %v4166_v39 }
 0x972   :  { %3439 = vmatpush3.bf16.msra.mxu0 %v3825_v16  ;;  %v3846_v16 = vld [vmem:[#allocation8 + $0x30] sm:$0xff]  }
 0x973   :  { %3427 = vmatpush3.bf16.msra.mxu1 %v3821_v13  ;;  %3440 = vmatprep.subr.bf16.mxu0 %v4166_v39 }
 0x974   :  { %3428 = vmatprep.subr.bf16.mxu1 %v4166_v39 }
 0x977   :  { %3429 = vmatpush3.bf16.msra.mxu1 %v3822_v14  ;;  %v3833_v14 = vld [vmem:[#allocation9 + $0x8] sm:$0xff]  }
 0x978   :  { %3430 = vmatprep.subr.bf16.mxu1 %v4166_v39 }
 0x97b   :  { %3431 = vmatpush3.bf16.msra.mxu1 %v3823_v18  ;;  %v3835_v18 = vld [vmem:[#allocation9 + $0x18] sm:$0xff]  }
 0x97c   :  { %3456 = vmatprep.subr.bf16.mxu1 %v4166_v39 }
 0xa40   :  { %v1083_v56 = vpop.f32.mrb[16].mxu0 }
 0xa41   :  { %v1089_v57 = vadd.f32 %v1083_v56, %v4382_v28  ;;  %v3414_v59 = vpop.f32.mrb[17].mxu0  ;;  %v1110_v28 = vsel %vm1109_vm4, 1, %v4165_v0  ;;  %v3828_v56 = vld [vmem:[#allocation8 + $0x20] sm:$0xff]  }
 0xa42   :  { %v1086_v61 = vpop.f32.mrb[18].mxu0  ;;  %v3830_v59 = vld [vmem:[#allocation8 + $0x30] sm:$0xff]  }
 0xa43   :  { %v2912_v62 = vmul.f32 -1.442695, %v1089_v57  ;;  %v3415_v63 = vpop.f32.mrb[19].mxu0 }
 0xa44   :  { %v3831_v63 = vld [vmem:[#allocation8 + $0x38] sm:$0xff]  }
 0xa45   :  { %3944 = vpow2.f32 %v2912_v62 }
 0xa46   :  { %3946 = vtanh.f32 %v1089_v57  ;;  %v3829_v57 = vld [vmem:[#allocation8 + $0x28] sm:$0xff]  }
 0xa4f   :  { %v3945_v1 = vpop.eup %3944 }
 0xa50   :  { %v1094_v2 = vadd.f32 1.0, %v3945_v1  ;;  %v3947_v3 = vpop.eup %3946  ;;  %v3832_v1 = vld [vmem:[#allocation9] sm:$0xff]  }
 0xa52   :  { %3948 = vrcp.f32 %v1094_v2 }
 0xa5c   :  { %v3949_v4 = vpop.eup %3948 }
 0xa5d   :  { %v1097_v5 = vsel %vm113_vm9, %v3947_v3, %v3949_v4 }
 0xa5e   :  { %1098 = vrot.lane.b32.xlu0 %v1097_v5, %s4157_s23  ;;  %v1103_v22 = vmul.f32 %v1097_v5, %v980_v21 }
 0xa62   :  { %1112 = vperm.xlu0 %3766, %v1110_v28  }
 0xad0   :  { %v1099_v15 = vpop.permute.xlu0 %1098 }
 0xad1   :  { %v1100_v17 = vmul.f32 %v1099_v15, %v1097_v5 }
 0xad3   :  { %1101 = vrot.lane.b32.xlu1 %v1100_v17, %s4169_s1  ;;  %v3834_v17 = vld [vmem:[#allocation9 + $0x10] sm:$0xff]  }
 0xae1   :  { %v4544_v20 = vpop.permute.xlu0 %1112 }
 0xae2   :  { %vm1114_vm5 = vcmp.eq.s32.totalorder %v4544_v20, 1 }
 0xb45   :  { %v1102_v23 = vpop.permute.xlu1 %1101 }
 0xb46   :  { %v1104_v24 = vadd.f32 %v1103_v22, %v1102_v23  ;;  %v3031_v22 = vpack.c.bf16 %v4518_v52, %v4487_v10 }
 0xb48   :  { %3950 = vtanh.f32 %v1104_v24  ;;  %v1107_v2 = vsel %vm114_vm11, %v1104_v24, 0.0 }
 0xb49   :  { %v4574_v3 = vsel %vm1114_vm5, %v1107_v2, %v980_v21  ;;  %v3837_v21 = vld [vmem:[#allocation9 + $0x28] sm:$0xff]  }
 0xb52   :  { %v3951_v25 = vpop.eup %3950 }
 0xb53   :  { %v1106_v27 = vmul.f32 %v3951_v25, %v1099_v15  ;;  %v3028_v15 = vpack.c.bf16 %v4456_v36, %v4414_v58  ;;  %v3838_v58 = vld [vmem:[#allocation9 + $0x30] sm:$0xff]   ;;  %v3839_v36 = vld [vmem:[#allocation9 + $0x38] sm:$0xff]  }
 0xb55   :  { %v4549_v29 = vsel %vm114_vm11, %v1106_v27, 0.0 }
 0xb56   :  { %v1115_v33 = vsel %vm1114_vm5, %v4549_v29, %v979_v53  ;;  %v3826_v53 = vld [vmem:[#allocation8 + $0x10] sm:$0xff]  }
 0xb57   :  { %v1120_v34 = vpack.c.bf16 %v1115_v33, %v1115_v33  ;;  %3441 = vmatpush3.bf16.msra.mxu0 %v3826_v53 }
 0xb58   :  { %3442 = vmatprep.subr.bf16.mxu0 %v4166_v39 }
 0xb59   :  { %3433 = vmatmul.mubr.bf16.vlgmr.msra.gmra.mrb[16].mxu1 %v1120_v34 }
 0xb5a   :  { %3472 = vmatprep.mubr.msk.bf16.mxu1 %vm4168_vm8, %v4166_v39 }
 0xb5b   :  { %3443 = vmatpush3.bf16.msra.mxu0 %v3827_v54 }
 0xb5c   :  { %3444 = vmatprep.subr.bf16.mxu0 %v4166_v39 }
 0xb5f   :  { %3445 = vmatpush3.bf16.msra.mxu0 %v3828_v56  ;;  %v3847_v56 = vld [vmem:[#allocation8 + $0x38] sm:$0xff]  }
 0xb60   :  { %3446 = vmatprep.subr.bf16.mxu0 %v4166_v39 }
 0xb63   :  { %3447 = vmatpush3.bf16.msra.mxu0 %v3829_v57 }
 0xb64   :  { %3448 = vmatprep.subr.bf16.mxu0 %v4166_v39 }
 0xb67   :  { %3449 = vmatpush3.bf16.msra.mxu0 %v3830_v59 }
 0xb68   :  { %3450 = vmatprep.subr.bf16.mxu0 %v4166_v39 }
 0xb6b   :  { %3451 = vmatpush3.bf16.msra.mxu0 %v3831_v63 }
 0xb6c   :  { %3476 = vmatprep.subr.bf16.mxu0 %v3832_v1 }
 0xc2c   :  { %v1219_v37 = vpop.f32.mrb[16].mxu1 }
 0xc2d   :  { %v1225_v38 = vadd.f32 %v1219_v37, %v4386_v32  ;;  %v3434_v40 = vpop.f32.mrb[17].mxu1  ;;  %v1246_v32 = vsel %vm1245_vm6, 1, %v4165_v0  ;;  %vm1517_vm6 = vcmp.gt.s32.totalorder %v4391_v35, 7  ;;  %v3860_v35 = vld [vmem:[#allocation11 + $0x20] sm:$0xff]  }
 0xc2e   :  { %v1222_v42 = vpop.f32.mrb[18].mxu1 }
 0xc2f   :  { %v2921_v43 = vmul.f32 -1.442695, %v1225_v38  ;;  %v3435_v44 = vpop.f32.mrb[19].mxu1 }
 0xc31   :  { %3952 = vpow2.f32 %v2921_v43 }
 0xc32   :  { %3954 = vtanh.f32 %v1225_v38 }
 0xc3b   :  { %v3953_v45 = vpop.eup %3952 }
 0xc3c   :  { %v1230_v46 = vadd.f32 1.0, %v3953_v45  ;;  %v3955_v47 = vpop.eup %3954  ;;  %v3840_v45 = vld [vmem:[#allocation8] sm:$0xff]  }
 0xc3d   :  { %3457 = vmatpush3.bf16.msra.mxu1 %v3840_v45 }
 0xc3e   :  { %3956 = vrcp.f32 %v1230_v46  ;;  %3458 = vmatprep.subr.bf16.mxu1 %v4166_v39 }
 0xc48   :  { %v3957_v48 = vpop.eup %3956 }
 0xc49   :  { %v1233_v49 = vsel %vm113_vm9, %v3955_v47, %v3957_v48  ;;  %v3841_v47 = vld [vmem:[#allocation8 + $0x8] sm:$0xff]   ;;  %v3842_v48 = vld [vmem:[#allocation8 + $0x10] sm:$0xff]  }
 0xc4a   :  { %1234 = vrot.lane.b32.xlu1 %v1233_v49, %s4157_s23  ;;  %v1239_v4 = vmul.f32 %v1233_v49, %v4574_v3  ;;  %3459 = vmatpush3.bf16.msra.mxu1 %v3841_v47 }
 0xc4b   :  { %3460 = vmatprep.subr.bf16.mxu1 %v4166_v39 }
 0xc4e   :  { %1248 = vperm.xlu1 %3767, %v1246_v32   ;;  %3461 = vmatpush3.bf16.msra.mxu1 %v3842_v48  ;;  %v3844_v32 = vld [vmem:[#allocation8 + $0x20] sm:$0xff]  }
 0xc4f   :  { %3462 = vmatprep.subr.bf16.mxu1 %v4166_v39 }
 0xcbc   :  { %v1235_v61 = vpop.permute.xlu1 %1234 }
 0xcbd   :  { %v1236_v62 = vmul.f32 %v1235_v61, %v1233_v49  ;;  %v3843_v49 = vld [vmem:[#allocation8 + $0x18] sm:$0xff]  }
 0xcbe   :  { %3463 = vmatpush3.bf16.msra.mxu1 %v3843_v49 }
 0xcbf   :  { %1237 = vrot.lane.b32.xlu0 %v1236_v62, %s4169_s1  ;;  %3464 = vmatprep.subr.bf16.mxu1 %v4166_v39 }
 0xcc2   :  { %3465 = vmatpush3.bf16.msra.mxu1 %v3844_v32 }
 0xcc3   :  { %3466 = vmatprep.subr.bf16.mxu1 %v4166_v39 }
 0xcc6   :  { %3467 = vmatpush3.bf16.msra.mxu1 %v3845_v50  ;;  %v1518_v50 = vsel %vm1517_vm6, 1, %v4165_v0 }
 0xcc7   :  { %3468 = vmatprep.subr.bf16.mxu1 %v4166_v39 }
 0xcca   :  { %3469 = vmatpush3.bf16.msra.mxu1 %v3846_v16  ;;  %v3856_v16 = vld [vmem:[#allocation11] sm:$0xff]  }
 0xccb   :  { %3470 = vmatprep.subr.bf16.mxu1 %v4166_v39 }
 0xccd   :  { %v4580_v7 = vpop.permute.xlu1 %1248 }
 0xcce   :  { %vm1250_vm7 = vcmp.eq.s32.totalorder %v4580_v7, 1  ;;  %3471 = vmatpush3.bf16.msra.mxu1 %v3847_v56  ;;  %v3859_v56 = vld [vmem:[#allocation11 + $0x18] sm:$0xff]  }
 0xccf   :  { %vm3033_vm0 = vmpackc.low %vm1250_vm7, %vm1114_vm5  ;;  %3500 = vmatprep.subr.bf16.mxu1 %v4166_v39 }
 0xd31   :  { %v1238_v5 = vpop.permute.xlu0 %1237 }
 0xd32   :  { %v4577_v28 = vadd.f32 %v1239_v4, %v1238_v5 }
 0xd34   :  { %3958 = vtanh.f32 %v4577_v28  ;;  %v1243_v57 = vsel %vm114_vm11, %v4577_v28, 0.0  ;;  %v3848_v28 = vld [vmem:[#allocation11] sm:$0xff]  }
 0xd35   :  { %v4638_v59 = vsel %vm1250_vm7, %v1243_v57, %v4574_v3  ;;  %v3862_v57 = vld [vmem:[#allocation11 + $0x30] sm:$0xff]  }
 0xd3e   :  { %v3959_v6 = vpop.eup %3958 }
 0xd3f   :  { %v1242_v9 = vmul.f32 %v3959_v6, %v1235_v61 }
 0xd41   :  { %v1244_v11 = vsel %vm114_vm11, %v1242_v9, 0.0  ;;  %v3849_v9 = vld [vmem:[#allocation11 + $0x8] sm:$0xff]  }
 0xd42   :  { %v4587_v12 = vsel %vm1250_vm7, %v1244_v11, %v1115_v33  ;;  %v3034_v23 = vpack.c.bf16 %v1244_v11, %v4549_v29  ;;  %v3850_v11 = vld [vmem:[#allocation11 + $0x10] sm:$0xff]  }
 0xd43   :  { %v1256_v13 = vpack.c.bf16 %v4587_v12, %v4587_v12 }
 0xd45   :  { %3453 = vmatmul.mubr.bf16.vlgmr.msra.gmra.mrb[20].mxu0 %v1256_v13  ;;  %v3851_v13 = vld [vmem:[#allocation11 + $0x18] sm:$0xff]  }
 0xd46   :  { %3477 = vmatpush3.bf16.msra.mxu0 %v3832_v1  ;;  %3492 = vmatprep.mubr.msk.bf16.mxu0 %vm3027_vm10, %v3028_v15  ;;  %v3854_v15 = vld [vmem:[#allocation11 + $0x30] sm:$0xff]  }
 0xd47   :  { %3478 = vmatprep.subr.bf16.mxu0 %v3833_v14 }
 0xd4a   :  { %3479 = vmatpush3.bf16.msra.mxu0 %v3833_v14  ;;  %v3853_v14 = vld [vmem:[#allocation11 + $0x28] sm:$0xff]  }
 0xd4b   :  { %3480 = vmatprep.subr.bf16.mxu0 %v3834_v17 }
 0xd4e   :  { %3481 = vmatpush3.bf16.msra.mxu0 %v3834_v17  ;;  %v3855_v17 = vld [vmem:[#allocation11 + $0x38] sm:$0xff]  }
 0xd4f   :  { %3482 = vmatprep.subr.bf16.mxu0 %v3835_v18 }
 0xd52   :  { %3483 = vmatpush3.bf16.msra.mxu0 %v3835_v18 }
 0xd53   :  { %3484 = vmatprep.subr.bf16.mxu0 %v3836_v19 }
 0xd56   :  { %3485 = vmatpush3.bf16.msra.mxu0 %v3836_v19 }
 0xd57   :  { %3486 = vmatprep.subr.bf16.mxu0 %v3837_v21 }
 0xd5a   :  { %3487 = vmatpush3.bf16.msra.mxu0 %v3837_v21 }
 0xd5b   :  { %3488 = vmatprep.subr.bf16.mxu0 %v3838_v58 }
 0xd5e   :  { %3489 = vmatpush3.bf16.msra.mxu0 %v3838_v58 }
 0xd5f   :  { %3490 = vmatprep.subr.bf16.mxu0 %v3839_v36 }
 0xd62   :  { %3491 = vmatpush3.bf16.msra.mxu0 %v3839_v36 }
 0xd63   :  { %3520 = vmatprep.subr.bf16.mxu0 %v4166_v39 }
 0xd65   :  { %3493 = vmatmul.mubr.msk.bf16.vlgmr.msra.gmra.mrb[24].mxu0 %vm3030_vm14, %v3031_v22 }
 0xd66   :  { %3496 = vmatprep.mubr.msk.bf16.mxu0 %vm3033_vm0, %v3034_v23  ;;  %3521 = vmatpush3.bf16.msra.mxu0 %v3856_v16  ;;  %v3869_v16 = vld [vmem:[#allocation11 + $0x28] sm:$0xff]  }
 0xd67   :  { %3522 = vmatprep.subr.bf16.mxu0 %v4166_v39 }
 0xe18   :  { %v1355_v24 = vpop.f32.mrb[20].mxu0 }
 0xe19   :  { %v1361_v25 = vadd.f32 %v1355_v24, %v4380_v26  ;;  %v3454_v10 = vpop.f32.mrb[21].mxu0  ;;  %v1382_v26 = vsel %vm1381_vm2, 1, %v4165_v0 }
 0xe1a   :  { %v1358_v52 = vpop.f32.mrb[22].mxu0 }
 0xe1b   :  { %v2930_v27 = vmul.f32 -1.442695, %v1361_v25  ;;  %v3455_v33 = vpop.f32.mrb[23].mxu0  ;;  %v4676_v52 = vld [vmem:[%s5024_s10] ss:$0 sm:$0xff] }
 0xe1d   :  { %3960 = vpow2.f32 %v2930_v27 }
 0xe1e   :  { %3962 = vtanh.f32 %v1361_v25 }
 0xe27   :  { %v3961_v34 = vpop.eup %3960 }
 0xe28   :  { %v1366_v37 = vadd.f32 1.0, %v3961_v34  ;;  %v3963_v29 = vpop.eup %3962 }
 0xe2a   :  { %3964 = vrcp.f32 %v1366_v37 }
 0xe34   :  { %v3965_v38 = vpop.eup %3964 }
 0xe35   :  { %v1369_v40 = vsel %vm113_vm9, %v3963_v29, %v3965_v38 }
 0xe36   :  { %1370 = vrot.lane.b32.xlu0 %v1369_v40, %s4157_s23  ;;  %v1375_v61 = vmul.f32 %v1369_v40, %v4638_v59 }
 0xe38   :  { %v4615_v42 = vpop.f32.mrb[24].mxu0 }
 0xe39   :  { %v4617_v43 = vpop.f32.mrb[25].mxu0 }
 0xe3a   :  { %v4619_v44 = vpop.f32.mrb[26].mxu0  ;;  %1384 = vperm.xlu0 %3766, %v1382_v26  }
 0xe3b   :  { %v4621_v46 = vpop.f32.mrb[27].mxu0 }
 0xea8   :  { %v1371_v53 = vpop.permute.xlu0 %1370 }
 0xea9   :  { %v1372_v54 = vmul.f32 %v1371_v53, %v1369_v40 }
 0xeab   :  { %1373 = vrot.lane.b32.xlu1 %v1372_v54, %s4169_s1  ;;  %v3858_v54 = vld [vmem:[#allocation11 + $0x10] sm:$0xff]  }
 0xeb9   :  { %v4644_v2 = vpop.permute.xlu0 %1384 }
 0xeba   :  { %vm1386_vm4 = vcmp.eq.s32.totalorder %v4644_v2, 1 }
 0xf1d   :  { %v1374_v62 = vpop.permute.xlu1 %1373 }
 0xf1e   :  { %v4641_v63 = vadd.f32 %v1375_v61, %v1374_v62 }
 0xf20   :  { %3966 = vtanh.f32 %v4641_v63 }
 0xf2a   :  { %v3967_v1 = vpop.eup %3966 }
 0xf2b   :  { %v1378_v4 = vmul.f32 %v3967_v1, %v1371_v53  ;;  %v3857_v53 = vld [vmem:[#allocation11 + $0x8] sm:$0xff]   ;;  %v3863_v1 = vld [vmem:[#allocation11 + $0x38] sm:$0xff]  }
 0xf2c   :  { %3523 = vmatpush3.bf16.msra.mxu0 %v3857_v53  ;;  %v3870_v53 = vld [vmem:[#allocation11 + $0x30] sm:$0xff]  }
 0xf2d   :  { %v4649_v5 = vsel %vm114_vm11, %v1378_v4, 0.0  ;;  %3524 = vmatprep.subr.bf16.mxu0 %v4166_v39  ;;  %v1379_v4 = vsel %vm114_vm11, %v4641_v63, 0.0 }
 0xf2e   :  { %v4655_v3 = vsel %vm1386_vm4, %v4649_v5, %v4587_v12  ;;  %v3852_v12 = vld [vmem:[#allocation11 + $0x20] sm:$0xff]  }
 0xf2f   :  { %v1392_v6 = vpack.c.bf16 %v4655_v3, %v4655_v3 }
 0xf30   :  { %3525 = vmatpush3.bf16.msra.mxu0 %v3858_v54 }
 0xf31   :  { %3473 = vmatmul.mubr.bf16.vlgmr.msra.gmra.mrb[20].mxu1 %v1392_v6  ;;  %3526 = vmatprep.subr.bf16.mxu0 %v4166_v39 }
 0xf32   :  { %3501 = vmatpush3.bf16.msra.mxu1 %v3848_v28  ;;  %3516 = vmatprep.mubr.msk.bf16.mxu1 %vm4168_vm8, %v4166_v39  ;;  %v1388_v28 = vsel %vm1386_vm4, %v1379_v4, %v4638_v59 }
 0xf33   :  { %3502 = vmatprep.subr.bf16.mxu1 %v4166_v39 }
 0xf34   :  { %3527 = vmatpush3.bf16.msra.mxu0 %v3859_v56 }
 0xf35   :  { %3528 = vmatprep.subr.bf16.mxu0 %v4166_v39 }
 0xf36   :  { %3503 = vmatpush3.bf16.msra.mxu1 %v3849_v9 }
 0xf37   :  { %3504 = vmatprep.subr.bf16.mxu1 %v4166_v39 }
 0xf38   :  { %3529 = vmatpush3.bf16.msra.mxu0 %v3860_v35  ;;  %v3871_v35 = vld [vmem:[#allocation11 + $0x38] sm:$0xff]  }
 0xf39   :  { %3530 = vmatprep.subr.bf16.mxu0 %v4166_v39 }
 0xf3a   :  { %3505 = vmatpush3.bf16.msra.mxu1 %v3850_v11 }
 0xf3b   :  { %3506 = vmatprep.subr.bf16.mxu1 %v4166_v39 }
 0xf3e   :  { %3507 = vmatpush3.bf16.msra.mxu1 %v3851_v13 }
 0xf3f   :  { %3508 = vmatprep.subr.bf16.mxu1 %v4166_v39 }
 0xf42   :  { %3509 = vmatpush3.bf16.msra.mxu1 %v3852_v12 }
 0xf43   :  { %3510 = vmatprep.subr.bf16.mxu1 %v4166_v39 }
 0xf46   :  { %3511 = vmatpush3.bf16.msra.mxu1 %v3853_v14 }
 0xf47   :  { %3512 = vmatprep.subr.bf16.mxu1 %v4166_v39 }
 0xf4a   :  { %3513 = vmatpush3.bf16.msra.mxu1 %v3854_v15 }
 0xf4b   :  { %3514 = vmatprep.subr.bf16.mxu1 %v4166_v39 }
 0xf4e   :  { %3515 = vmatpush3.bf16.msra.mxu1 %v3855_v17 }
 0xf4f   :  { %3540 = vmatprep.subr.bf16.mxu1 %v4166_v39 }
 0xf51   :  { %3517 = vmatmul.mubr.bf16.vlgmr.msra.gmra.mrb[24].mxu1 %v4165_v0  ;;  %v3861_v0 = vld [vmem:[#allocation11 + $0x28] sm:$0xff]  }
 0xf52   :  { %3556 = vmatprep.mubr.msk.bf16.mxu1 %vm4168_vm8, %v4166_v39  ;;  %3531 = vmatpush3.bf16.msra.mxu0 %v3861_v0 }
 0xf53   :  { %3532 = vmatprep.subr.bf16.mxu0 %v4166_v39 }
 0xf56   :  { %3533 = vmatpush3.bf16.msra.mxu0 %v3862_v57 }
 0xf57   :  { %3534 = vmatprep.subr.bf16.mxu0 %v4166_v39 }
 0xf5a   :  { %3535 = vmatpush3.bf16.msra.mxu0 %v3863_v1 }
 0xf5b   :  { %3560 = vmatprep.subr.bf16.mxu0 %v4166_v39 }
0x1004   :  { %v1491_v18 = vpop.f32.mrb[20].mxu1 }
0x1005   :  { %v1497_v19 = vadd.f32 %v1491_v18, %v4384_v30  ;;  %v3474_v21 = vpop.f32.mrb[21].mxu1  ;;  %v1647_v30 = vadd.f32 %v4676_v52, %v4617_v43 }
0x1006   :  { %v1494_v58 = vpop.f32.mrb[22].mxu1 }
0x1007   :  { %v2939_v36 = vmul.f32 -1.442695, %v1497_v19  ;;  %v3475_v22 = vpop.f32.mrb[23].mxu1 }
0x1009   :  { %3968 = vpow2.f32 %v2939_v36 }
0x100a   :  { %3970 = vtanh.f32 %v1497_v19 }
0x1013   :  { %v3969_v23 = vpop.eup %3968 }
0x1014   :  { %v1502_v24 = vadd.f32 1.0, %v3969_v23  ;;  %v3971_v25 = vpop.eup %3970 }
0x1016   :  { %3972 = vrcp.f32 %v1502_v24 }
0x1020   :  { %v3973_v10 = vpop.eup %3972 }
0x1021   :  { %v1505_v27 = vsel %vm113_vm9, %v3971_v25, %v3973_v10 }
0x1022   :  { %1506 = vrot.lane.b32.xlu1 %v1505_v27, %s4157_s23  ;;  %v1511_v6 = vmul.f32 %v1505_v27, %v1388_v28 }
0x1024   :  { %v1784_v33 = vpop.f32.mrb[24].mxu1 }
0x1025   :  { %v1790_v34 = vadd.f32 %v1784_v33, %v1647_v30  ;;  %v3518_v37 = vpop.f32.mrb[25].mxu1  ;;  %v1650_v30 = vadd.f32 %v4676_v52, %v4621_v46 }
0x1026   :  { %v1787_v29 = vpop.f32.mrb[26].mxu1 }
0x1027   :  { %v2957_v38 = vmul.f32 -1.442695, %v1790_v34  ;;  %v3519_v40 = vpop.f32.mrb[27].mxu1 }
0x1029   :  { %3974 = vpow2.f32 %v2957_v38 }
0x102a   :  { %3976 = vtanh.f32 %v1790_v34 }
0x1033   :  { %v3975_v26 = vpop.eup %3974 }
0x1034   :  { %v1795_v45 = vadd.f32 1.0, %v3975_v26  ;;  %v3977_v47 = vpop.eup %3976 }
0x1036   :  { %3978 = vrcp.f32 %v1795_v45  ;;  %v3864_v45 = vld [vmem:[#allocation11] sm:$0xff]  }
0x1037   :  { %3541 = vmatpush3.bf16.msra.mxu1 %v3864_v45 }
0x1038   :  { %3542 = vmatprep.subr.bf16.mxu1 %v4166_v39 }
0x1040   :  { %v3979_v48 = vpop.eup %3978 }
0x1041   :  { %v1798_v49 = vsel %vm113_vm9, %v3977_v47, %v3979_v48  ;;  %v3865_v47 = vld [vmem:[#allocation11 + $0x8] sm:$0xff]   ;;  %v3866_v48 = vld [vmem:[#allocation11 + $0x10] sm:$0xff]  }
0x1042   :  { %1799 = vrot.lane.b32.xlu0 %v1798_v49, %s4157_s23  ;;  %3543 = vmatpush3.bf16.msra.mxu1 %v3865_v47 }
0x1043   :  { %3544 = vmatprep.subr.bf16.mxu1 %v4166_v39 }
0x1046   :  { %3545 = vmatpush3.bf16.msra.mxu1 %v3866_v48 }
0x1047   :  { %3546 = vmatprep.subr.bf16.mxu1 %v4166_v39 }
0x1094   :  { %v1507_v32 = vpop.permute.xlu1 %1506 }
0x1095   :  { %v1508_v43 = vmul.f32 %v1507_v32, %v1505_v27 }
0x1097   :  { %1509 = vrot.lane.b32.xlu1 %v1508_v43, %s4169_s1  ;;  %v3867_v43 = vld [vmem:[#allocation11 + $0x18] sm:$0xff]  }
0x1098   :  { %3547 = vmatpush3.bf16.msra.mxu1 %v3867_v43 }
0x1099   :  { %3548 = vmatprep.subr.bf16.mxu1 %v4166_v39 }
0x109b   :  { %1520 = vperm.xlu1 %3767, %v1518_v50   ;;  %v3868_v50 = vld [vmem:[#allocation11 + $0x20] sm:$0xff]  }
0x109c   :  { %3549 = vmatpush3.bf16.msra.mxu1 %v3868_v50  ;;  %v1658_v50 = vadd.f32 %v4619_v44, %v4676_v52 }
0x109d   :  { %3550 = vmatprep.subr.bf16.mxu1 %v4166_v39 }
0x10a0   :  { %3551 = vmatpush3.bf16.msra.mxu1 %v3869_v16 }
0x10a1   :  { %3552 = vmatprep.subr.bf16.mxu1 %v4166_v39 }
0x10a4   :  { %3553 = vmatpush3.bf16.msra.mxu1 %v3870_v53 }
0x10a5   :  { %3554 = vmatprep.subr.bf16.mxu1 %v4166_v39 }
0x10a8   :  { %3555 = vmatpush3.bf16.msra.mxu1 %v3871_v35 }
0x10a9   :  { %3580 = vmatprep.subr.bf16.mxu1 %v4166_v39 }
0x10b4   :  { %v1800_v61 = vpop.permute.xlu0 %1799 }
0x10b5   :  { %v1801_v62 = vmul.f32 %v1800_v61, %v1798_v49 }
0x10b7   :  { %1802 = vrot.lane.b32.xlu0 %v1801_v62, %s4169_s1 }
0x1109   :  { %v1510_v9 = vpop.permute.xlu1 %1509 }
0x110a   :  { %v1512_v11 = vadd.f32 %v1511_v6, %v1510_v9 }
0x110c   :  { %3980 = vtanh.f32 %v1512_v11  ;;  %v1515_v63 = vsel %vm114_vm11, %v1512_v11, 0.0 }
0x1116   :  { %v3981_v13 = vpop.eup %3980 }
0x1117   :  { %v1514_v12 = vmul.f32 %v3981_v13, %v1507_v32  ;;  %v1655_v13 = vadd.f32 %v4615_v42, %v4676_v52 }
0x1119   :  { %v1516_v14 = vsel %vm114_vm11, %v1514_v12, 0.0 }
0x111a   :  { %v4706_v15 = vpop.permute.xlu1 %1520  ;;  %v3037_v17 = vpack.c.bf16 %v1516_v14, %v4649_v5  ;;  %v1804_v5 = vmul.f32 0.0, %v1798_v49 }
0x111b   :  { %vm1522_vm10 = vcmp.eq.s32.totalorder %v4706_v15, 1 }
0x111c   :  { %v1524_v59 = vsel %vm1522_vm10, %v1515_v63, %v1388_v28  ;;  %v1523_v18 = vsel %vm1522_vm10, %v1516_v14, %v4655_v3  ;;  %vm3036_vm14 = vmpackc.low %vm1522_vm10, %vm1386_vm4 }
0x111d   :  { %1528 = vst [vmem:[%s5027_s13] sm:$0xff] %v1524_v59  ;;  %1527 = vst [vmem:[%s5026_s12] sm:$0xff] %v1523_v18  ;;  %3497 = vmatmul.mubr.msk.bf16.gmra.mrb[28].mxu0 %vm3036_vm14, %v3037_v17 }
0x111e   :  { %3536 = vmatprep.mubr.msk.bf16.mxu0 %vm4168_vm8, %v4166_v39 }
0x1129   :  { %v1803_v19 = vpop.permute.xlu0 %1802 }
0x112a   :  { %v1805_v3 = vadd.f32 %v1804_v5, %v1803_v19 }
0x112c   :  { %3982 = vtanh.f32 %v1805_v3  ;;  %v1808_v0 = vsel %vm114_vm11, %v1805_v3, 0.0  ;;  %v3872_v3 = vld [vmem:[#allocation11] sm:$0xff]  }
0x112d   :  { %v1811_v57 = vsel %vm571_vm12, %v1808_v0, 0.0 }
0x1136   :  { %v3983_v21 = vpop.eup %3982 }
0x1137   :  { %v1807_v58 = vmul.f32 %v3983_v21, %v1800_v61  ;;  %v3873_v21 = vld [vmem:[#allocation11 + $0x8] sm:$0xff]  }
0x1139   :  { %v1809_v36 = vsel %vm114_vm11, %v1807_v58, 0.0  ;;  %v3874_v58 = vld [vmem:[#allocation11 + $0x10] sm:$0xff]  }
0x113a   :  { %v2967_v22 = vpack.c.bf16 %v1809_v36, %v1809_v36  ;;  %v1810_v23 = vsel %vm571_vm12, %v1809_v36, 0.0 }
0x113b   :  { %1812 = vst [vmem:[%s5025_s11] sm:$0xff] %v1810_v23 }
0x113c   :  { %3537 = vmatmul.mubr.msk.bf16.vlgmr.msra.gmra.mrb[32].mxu0 %vm4421_vm13, %v2967_v22 }
0x113d   :  { %3576 = vmatprep.mubr.msk.bf16.mxu0 %vm4168_vm8, %v4166_v39  ;;  %3561 = vmatpush3.bf16.msra.mxu0 %v3872_v3 }
0x113e   :  { %3562 = vmatprep.subr.bf16.mxu0 %v4166_v39 }
0x1141   :  { %3563 = vmatpush3.bf16.msra.mxu0 %v3873_v21 }
0x1142   :  { %3564 = vmatprep.subr.bf16.mxu0 %v4166_v39 }
0x1145   :  { %3565 = vmatpush3.bf16.msra.mxu0 %v3874_v58 }
0x1146   :  { %3566 = vmatprep.subr.bf16.mxu0 %v4166_v39 }
0x11f0   :  { %v4740_v24 = vpop.f32.mrb[28].mxu0 }
0x11f1   :  { %v4742_v25 = vpop.f32.mrb[29].mxu0 }
0x11f2   :  { %v4744_v10 = vpop.f32.mrb[30].mxu0 }
0x11f3   :  { %v4746_v27 = vpop.f32.mrb[31].mxu0 }
0x120f   :  { %v1913_v33 = vpop.f32.mrb[32].mxu0 }
0x1210   :  { %v1919_v34 = vadd.f32 %v1913_v33, %v1650_v30  ;;  %v3538_v37 = vpop.f32.mrb[33].mxu0  ;;  %v3876_v30 = vld [vmem:[#allocation11 + $0x20] sm:$0xff]   ;;  %v3877_v33 = vld [vmem:[#allocation11 + $0x28] sm:$0xff]  }
0x1211   :  { %v1916_v29 = vpop.f32.mrb[34].mxu0 }
0x1212   :  { %v2969_v60 = vmul.f32 -1.442695, %v1919_v34  ;;  %v3539_v38 = vpop.f32.mrb[35].mxu0 }
0x1214   :  { %3984 = vpow2.f32 %v2969_v60  ;;  %v3879_v60 = vld [vmem:[#allocation11 + $0x38] sm:$0xff]  }
0x1215   :  { %3986 = vtanh.f32 %v1919_v34  ;;  %v3878_v34 = vld [vmem:[#allocation11 + $0x30] sm:$0xff]  }
0x121e   :  { %v3985_v40 = vpop.eup %3984 }
0x121f   :  { %v1924_v26 = vadd.f32 1.0, %v3985_v40  ;;  %v3987_v46 = vpop.eup %3986 }
0x1221   :  { %3988 = vrcp.f32 %v1924_v26 }
0x122b   :  { %v3989_v49 = vpop.eup %3988 }
0x122c   :  { %v1927_v32 = vsel %vm113_vm9, %v3987_v46, %v3989_v49 }
0x122d   :  { %1928 = vrot.lane.b32.xlu0 %v1927_v32, %s4157_s23  ;;  %v1933_v61 = vmul.f32 %v1927_v32, %v1811_v57 }
0x129f   :  { %v1929_v54 = vpop.permute.xlu0 %1928 }
0x12a0   :  { %v1930_v56 = vmul.f32 %v1929_v54, %v1927_v32 }
0x12a2   :  { %1931 = vrot.lane.b32.xlu1 %v1930_v56, %s4169_s1 }
0x1314   :  { %v1932_v62 = vpop.permute.xlu1 %1931 }
0x1315   :  { %v1934_v1 = vadd.f32 %v1933_v61, %v1932_v62  ;;  %v3880_v62 = vld [vmem:[#allocation11] sm:$0xff]  }
0x1317   :  { %3990 = vtanh.f32 %v1934_v1  ;;  %v1937_v38 = vsel %vm114_vm11, %v1934_v1, 0.0  ;;  %v3881_v1 = vld [vmem:[#allocation11 + $0x8] sm:$0xff]  }
0x1318   :  { %v1940_v40 = vsel %vm706_vm15, %v1937_v38, %v1811_v57 }
0x1321   :  { %v3991_v4 = vpop.eup %3990 }
0x1322   :  { %v1936_v28 = vmul.f32 %v3991_v4, %v1929_v54  ;;  %v3882_v4 = vld [vmem:[#allocation11 + $0x10] sm:$0xff]  }
0x1324   :  { %v1938_v6 = vsel %vm114_vm11, %v1936_v28, 0.0 }
0x1325   :  { %v1939_v9 = vsel %vm706_vm15, %v1938_v6, %v1810_v23  ;;  %v1941_v11 = vsel %vm706_vm15, %v1938_v6, 0.0  ;;  %v3875_v23 = vld [vmem:[#allocation11 + $0x18] sm:$0xff]  }
0x1326   :  { %1942 = vst [vmem:[%s5025_s11 + $0x8] sm:$0xff] %v1941_v11  ;;  %v1944_v55 = vpack.c.bf16 %v1939_v9, %v1939_v9  ;;  %3567 = vmatpush3.bf16.msra.mxu0 %v3875_v23  ;;  %v3884_v11 = vld [vmem:[#allocation11 + $0x20] sm:$0xff]  }
0x1327   :  { %3568 = vmatprep.subr.bf16.mxu0 %v4166_v39 }
0x1328   :  { %3557 = vmatmul.mubr.bf16.vlgmr.msra.gmra.mrb[28].mxu1 %v1944_v55  ;;  %v3885_v55 = vld [vmem:[#allocation11 + $0x28] sm:$0xff]  }
0x1329   :  { %3596 = vmatprep.mubr.msk.bf16.mxu1 %vm4168_vm8, %v4166_v39  ;;  %3581 = vmatpush3.bf16.msra.mxu1 %v3880_v62 }
0x132a   :  { %3569 = vmatpush3.bf16.msra.mxu0 %v3876_v30  ;;  %3582 = vmatprep.subr.bf16.mxu1 %v4166_v39 }
0x132b   :  { %3570 = vmatprep.subr.bf16.mxu0 %v4166_v39 }
0x132d   :  { %3583 = vmatpush3.bf16.msra.mxu1 %v3881_v1 }
0x132e   :  { %3571 = vmatpush3.bf16.msra.mxu0 %v3877_v33  ;;  %3584 = vmatprep.subr.bf16.mxu1 %v4166_v39 }
0x132f   :  { %3572 = vmatprep.subr.bf16.mxu0 %v4166_v39 }
0x1331   :  { %3585 = vmatpush3.bf16.msra.mxu1 %v3882_v4 }
0x1332   :  { %3573 = vmatpush3.bf16.msra.mxu0 %v3878_v34  ;;  %3586 = vmatprep.subr.bf16.mxu1 %v4166_v39 }
0x1333   :  { %3574 = vmatprep.subr.bf16.mxu0 %v4166_v39 }
0x1336   :  { %3575 = vmatpush3.bf16.msra.mxu0 %v3879_v60 }
0x1337   :  { %3600 = vmatprep.subr.bf16.mxu0 %v4166_v39 }
0x13fb   :  { %v2043_v12 = vpop.f32.mrb[28].mxu1 }
0x13fc   :  { %v2049_v14 = vadd.f32 %v2043_v12, %v1655_v13  ;;  %v3558_v17 = vpop.f32.mrb[29].mxu1  ;;  %v3886_v13 = vld [vmem:[#allocation11 + $0x30] sm:$0xff]  }
0x13fd   :  { %v2046_v63 = vpop.f32.mrb[30].mxu1  ;;  %v3887_v17 = vld [vmem:[#allocation11 + $0x38] sm:$0xff]  }
0x13fe   :  { %v2978_v59 = vmul.f32 -1.442695, %v2049_v14  ;;  %v3559_v18 = vpop.f32.mrb[31].mxu1 }
0x1400   :  { %3992 = vpow2.f32 %v2978_v59 }
0x1401   :  { %3994 = vtanh.f32 %v2049_v14 }
0x140a   :  { %v3993_v5 = vpop.eup %3992 }
0x140b   :  { %v2054_v19 = vadd.f32 1.0, %v3993_v5  ;;  %v3995_v42 = vpop.eup %3994 }
0x140d   :  { %3996 = vrcp.f32 %v2054_v19 }
0x1417   :  { %v3997_v36 = vpop.eup %3996 }
0x1418   :  { %v2057_v22 = vsel %vm113_vm9, %v3995_v42, %v3997_v36 }
0x1419   :  { %2058 = vrot.lane.b32.xlu0 %v2057_v22, %s4157_s23  ;;  %v2063_v26 = vmul.f32 %v2057_v22, %v1940_v40 }
0x148b   :  { %v2059_v37 = vpop.permute.xlu0 %2058 }
0x148c   :  { %v2060_v29 = vmul.f32 %v2059_v37, %v2057_v22  ;;  %v1663_v22 = vadd.f32 %v4676_v52, %v4742_v25 }
0x148e   :  { %2061 = vrot.lane.b32.xlu1 %v2060_v29, %s4169_s1 }
0x1500   :  { %v2062_v45 = vpop.permute.xlu1 %2061 }
0x1501   :  { %v2064_v47 = vadd.f32 %v2063_v26, %v2062_v45  ;;  %v3889_v26 = vld [vmem:[#allocation11 + $0x8] sm:$0xff]   ;;  %v3890_v45 = vld [vmem:[#allocation11 + $0x10] sm:$0xff]  }
0x1503   :  { %3998 = vtanh.f32 %v2064_v47  ;;  %v2067_v63 = vsel %vm114_vm11, %v2064_v47, 0.0 }
0x1504   :  { %v2070_v59 = vsel %vm842_vm1, %v2067_v63, %v1940_v40  ;;  %v3888_v40 = vld [vmem:[#allocation11] sm:$0xff]   ;;  %v3897_v63 = vld [vmem:[#allocation11 + $0x8] sm:$0xff]  }
0x150d   :  { %v3999_v48 = vpop.eup %3998 }
0x150e   :  { %v2066_v46 = vmul.f32 %v3999_v48, %v2059_v37 }
0x1510   :  { %v2068_v49 = vsel %vm114_vm11, %v2066_v46, 0.0  ;;  %v3891_v46 = vld [vmem:[#allocation11 + $0x18] sm:$0xff]  }
0x1511   :  { %v2069_v32 = vsel %vm842_vm1, %v2068_v49, %v1939_v9  ;;  %v2071_v43 = vsel %vm842_vm1, %v2068_v49, 0.0  ;;  %v3883_v9 = vld [vmem:[#allocation11 + $0x18] sm:$0xff]   ;;  %v3892_v49 = vld [vmem:[#allocation11 + $0x20] sm:$0xff]  }
0x1512   :  { %2072 = vst [vmem:[%s5025_s11 + $0x10] sm:$0xff] %v2071_v43  ;;  %v2074_v31 = vpack.c.bf16 %v2069_v32, %v2069_v32  ;;  %3587 = vmatpush3.bf16.msra.mxu1 %v3883_v9  ;;  %v3894_v43 = vld [vmem:[#allocation11 + $0x30] sm:$0xff]  }
0x1513   :  { %3588 = vmatprep.subr.bf16.mxu1 %v4166_v39 }
0x1514   :  { %3577 = vmatmul.mubr.bf16.vlgmr.msra.gmra.mrb[36].mxu0 %v2074_v31 }
0x1515   :  { %3616 = vmatprep.mubr.msk.bf16.mxu0 %vm4168_vm8, %v4166_v39  ;;  %3601 = vmatpush3.bf16.msra.mxu0 %v3888_v40 }
0x1516   :  { %3589 = vmatpush3.bf16.msra.mxu1 %v3884_v11  ;;  %3602 = vmatprep.subr.bf16.mxu0 %v4166_v39 }
0x1517   :  { %3590 = vmatprep.subr.bf16.mxu1 %v4166_v39 }
0x1519   :  { %3603 = vmatpush3.bf16.msra.mxu0 %v3889_v26  ;;  %v1671_v26 = vadd.f32 %v4740_v24, %v4676_v52 }
0x151a   :  { %3591 = vmatpush3.bf16.msra.mxu1 %v3885_v55  ;;  %3604 = vmatprep.subr.bf16.mxu0 %v4166_v39 }
0x151b   :  { %3592 = vmatprep.subr.bf16.mxu1 %v4166_v39 }
0x151d   :  { %3605 = vmatpush3.bf16.msra.mxu0 %v3890_v45 }
0x151e   :  { %3593 = vmatpush3.bf16.msra.mxu1 %v3886_v13  ;;  %3606 = vmatprep.subr.bf16.mxu0 %v4166_v39 }
0x151f   :  { %3594 = vmatprep.subr.bf16.mxu1 %v4166_v39 }
0x1521   :  { %3607 = vmatpush3.bf16.msra.mxu0 %v3891_v46 }
0x1522   :  { %3595 = vmatpush3.bf16.msra.mxu1 %v3887_v17  ;;  %3608 = vmatprep.subr.bf16.mxu0 %v4166_v39  ;;  %v3896_v17 = vld [vmem:[#allocation11] sm:$0xff]  }
0x1523   :  { %3620 = vmatprep.subr.bf16.mxu1 %v4166_v39 }
0x1525   :  { %3609 = vmatpush3.bf16.msra.mxu0 %v3892_v49 }
0x1526   :  { %3610 = vmatprep.subr.bf16.mxu0 %v4166_v39 }
0x15e7   :  { %v2173_v16 = vpop.f32.mrb[36].mxu0 }
0x15e8   :  { %v2179_v53 = vadd.f32 %v2173_v16, %v1658_v50  ;;  %v3578_v54 = vpop.f32.mrb[37].mxu0  ;;  %v3895_v16 = vld [vmem:[#allocation11 + $0x38] sm:$0xff]  }
0x15e9   :  { %v2176_v56 = vpop.f32.mrb[38].mxu0 }
0x15ea   :  { %v2987_v35 = vmul.f32 -1.442695, %v2179_v53  ;;  %v3579_v0 = vpop.f32.mrb[39].mxu0 }
0x15ec   :  { %4000 = vpow2.f32 %v2987_v35 }
0x15ed   :  { %4002 = vtanh.f32 %v2179_v53 }
0x15f6   :  { %v4001_v57 = vpop.eup %4000 }
0x15f7   :  { %v2184_v61 = vadd.f32 1.0, %v4001_v57  ;;  %v4003_v44 = vpop.eup %4002 }
0x15f9   :  { %4004 = vrcp.f32 %v2184_v61 }
0x1603   :  { %v4005_v28 = vpop.eup %4004 }
0x1604   :  { %v2187_v6 = vsel %vm113_vm9, %v4003_v44, %v4005_v28  ;;  %v1666_v44 = vadd.f32 %v4676_v52, %v4746_v27 }
0x1605   :  { %2188 = vrot.lane.b32.xlu0 %v2187_v6, %s4157_s23  ;;  %v2193_v18 = vmul.f32 %v2187_v6, %v2070_v59 }
0x1677   :  { %v2189_v12 = vpop.permute.xlu0 %2188 }
0x1678   :  { %v2190_v14 = vmul.f32 %v2189_v12, %v2187_v6 }
0x167a   :  { %2191 = vrot.lane.b32.xlu1 %v2190_v14, %s4169_s1 }
0x16ec   :  { %v2192_v5 = vpop.permute.xlu1 %2191 }
0x16ed   :  { %v2194_v19 = vadd.f32 %v2193_v18, %v2192_v5 }
0x16ef   :  { %4006 = vtanh.f32 %v2194_v19  ;;  %v2197_v53 = vsel %vm114_vm11, %v2194_v19, 0.0  ;;  %v3899_v19 = vld [vmem:[#allocation11 + $0x18] sm:$0xff]  }
0x16f0   :  { %v2200_v54 = vsel %vm978_vm3, %v2197_v53, %v2070_v59  ;;  %v3898_v59 = vld [vmem:[#allocation11 + $0x10] sm:$0xff]  }
0x16f9   :  { %v4007_v3 = vpop.eup %4006 }
0x16fa   :  { %v2196_v21 = vmul.f32 %v4007_v3, %v2189_v12  ;;  %v3900_v3 = vld [vmem:[#allocation11 + $0x20] sm:$0xff]  }
0x16fc   :  { %v2198_v58 = vsel %vm114_vm11, %v2196_v21, 0.0  ;;  %v3901_v21 = vld [vmem:[#allocation11 + $0x28] sm:$0xff]  }
0x16fd   :  { %v2199_v42 = vsel %vm978_vm3, %v2198_v58, %v2069_v32  ;;  %v2201_v36 = vsel %vm978_vm3, %v2198_v58, 0.0  ;;  %v3893_v32 = vld [vmem:[#allocation11 + $0x28] sm:$0xff]   ;;  %v3902_v58 = vld [vmem:[#allocation11 + $0x30] sm:$0xff]  }
0x16fe   :  { %2202 = vst [vmem:[%s5025_s11 + $0x18] sm:$0xff] %v2201_v36  ;;  %v2204_v8 = vpack.c.bf16 %v2199_v42, %v2199_v42  ;;  %3611 = vmatpush3.bf16.msra.mxu0 %v3893_v32 }
0x16ff   :  { %3612 = vmatprep.subr.bf16.mxu0 %v4166_v39 }
0x1700   :  { %3597 = vmatmul.mubr.bf16.vlgmr.msra.gmra.mrb[32].mxu1 %v2204_v8  ;;  %v3903_v8 = vld [vmem:[#allocation11 + $0x38] sm:$0xff]  }
0x1701   :  { %3636 = vmatprep.mubr.msk.bf16.mxu1 %vm4168_vm8, %v4166_v39  ;;  %3621 = vmatpush3.bf16.msra.mxu1 %v3896_v17 }
0x1702   :  { %3613 = vmatpush3.bf16.msra.mxu0 %v3894_v43  ;;  %3622 = vmatprep.subr.bf16.mxu1 %v4166_v39 }
0x1703   :  { %3614 = vmatprep.subr.bf16.mxu0 %v4166_v39 }
0x1705   :  { %3623 = vmatpush3.bf16.msra.mxu1 %v3897_v63 }
0x1706   :  { %3615 = vmatpush3.bf16.msra.mxu0 %v3895_v16  ;;  %3624 = vmatprep.subr.bf16.mxu1 %v4166_v39  ;;  %v3906_v16 = vld [vmem:[#allocation11 + $0x10] sm:$0xff]  }
0x1707   :  { %3640 = vmatprep.subr.bf16.mxu0 %v4166_v39 }
0x1709   :  { %3625 = vmatpush3.bf16.msra.mxu1 %v3898_v59 }
0x170a   :  { %3626 = vmatprep.subr.bf16.mxu1 %v4166_v39 }
0x170d   :  { %3627 = vmatpush3.bf16.msra.mxu1 %v3899_v19 }
0x170e   :  { %3628 = vmatprep.subr.bf16.mxu1 %v4166_v39 }
0x1711   :  { %3629 = vmatpush3.bf16.msra.mxu1 %v3900_v3  ;;  %v2727_v3 = vld [vmem:[%s5017_s3] sm:$0xff] }
0x1712   :  { %3630 = vmatprep.subr.bf16.mxu1 %v4166_v39 }
0x1715   :  { %3631 = vmatpush3.bf16.msra.mxu1 %v3901_v21  ;;  %v2728_v21 = vld [vmem:[%s5017_s3 + $0x8] sm:$0xff] }
0x1716   :  { %3632 = vmatprep.subr.bf16.mxu1 %v4166_v39 }
0x1719   :  { %3633 = vmatpush3.bf16.msra.mxu1 %v3902_v58  ;;  %v3728_v58 = vpack.c.bf16 %v2728_v21, %v2727_v3 }
0x171a   :  { %3634 = vmatprep.subr.bf16.mxu1 %v4166_v39 }
0x171d   :  { %3635 = vmatpush3.bf16.msra.mxu1 %v3903_v8  ;;  %v2731_v8 = vld [vmem:[%s5017_s3 + $0x20] sm:$0xff] }
0x17d3   :  { %v2303_v23 = vpop.f32.mrb[32].mxu1 }
0x17d4   :  { %v2309_v30 = vadd.f32 %v2303_v23, %v1663_v22  ;;  %v3598_v33 = vpop.f32.mrb[33].mxu1 }
0x17d5   :  { %v2306_v34 = vpop.f32.mrb[34].mxu1 }
0x17d6   :  { %v2996_v37 = vmul.f32 -1.442695, %v2309_v30  ;;  %v3599_v29 = vpop.f32.mrb[35].mxu1 }
0x17d8   :  { %4008 = vpow2.f32 %v2996_v37 }
0x17d9   :  { %4010 = vtanh.f32 %v2309_v30 }
0x17e2   :  { %v4009_v60 = vpop.eup %4008 }
0x17e3   :  { %v2314_v38 = vadd.f32 1.0, %v4009_v60  ;;  %v4011_v25 = vpop.eup %4010 }
0x17e5   :  { %4012 = vrcp.f32 %v2314_v38 }
0x17ef   :  { %v4013_v47 = vpop.eup %4012 }
0x17f0   :  { %v2317_v48 = vsel %vm113_vm9, %v4011_v25, %v4013_v47 }
0x17f1   :  { %2318 = vrot.lane.b32.xlu0 %v2317_v48, %s4157_s23  ;;  %v2323_v56 = vmul.f32 %v2317_v48, %v2200_v54 }
0x1863   :  { %v2319_v31 = vpop.permute.xlu0 %2318 }
0x1864   :  { %v2320_v50 = vmul.f32 %v2319_v31, %v2317_v48 }
0x1866   :  { %2321 = vrot.lane.b32.xlu1 %v2320_v50, %s4169_s1  ;;  %v3905_v50 = vld [vmem:[#allocation11 + $0x8] sm:$0xff]  }
0x18d8   :  { %v2322_v35 = vpop.permute.xlu1 %2321 }
0x18d9   :  { %v2324_v0 = vadd.f32 %v2323_v56, %v2322_v35  ;;  %v3907_v56 = vld [vmem:[#allocation11 + $0x18] sm:$0xff]   ;;  %v3908_v35 = vld [vmem:[#allocation11 + $0x20] sm:$0xff]  }
0x18db   :  { %4014 = vtanh.f32 %v2324_v0  ;;  %v2327_v22 = vsel %vm114_vm11, %v2324_v0, 0.0  ;;  %v3909_v0 = vld [vmem:[#allocation11 + $0x28] sm:$0xff]  }
0x18dc   :  { %v2330_v23 = vsel %vm1114_vm5, %v2327_v22, %v2200_v54  ;;  %v2732_v22 = vld [vmem:[%s5017_s3 + $0x28] sm:$0xff] }
0x18e5   :  { %v4015_v57 = vpop.eup %4014 }
0x18e6   :  { %v2326_v61 = vmul.f32 %v4015_v57, %v2319_v31  ;;  %v3904_v31 = vld [vmem:[#allocation11] sm:$0xff]   ;;  %v3910_v57 = vld [vmem:[#allocation11 + $0x30] sm:$0xff]  }
0x18e8   :  { %v2328_v62 = vsel %vm114_vm11, %v2326_v61, 0.0 }
0x18e9   :  { %v2329_v1 = vsel %vm1114_vm5, %v2328_v62, %v2199_v42  ;;  %v2331_v4 = vsel %vm1114_vm5, %v2328_v62, 0.0 }
0x18ea   :  { %2332 = vst [vmem:[%s5025_s11 + $0x20] sm:$0xff] %v2331_v4  ;;  %v2334_v51 = vpack.c.bf16 %v2329_v1, %v2329_v1 }
0x18ec   :  { %3617 = vmatmul.mubr.bf16.vlgmr.msra.gmra.mrb[40].mxu0 %v2334_v51 }
0x18ed   :  { %3656 = vmatprep.mubr.msk.bf16.mxu0 %vm4168_vm8, %v4166_v39  ;;  %3641 = vmatpush3.bf16.msra.mxu0 %v3904_v31 }
0x18ee   :  { %3642 = vmatprep.subr.bf16.mxu0 %v4166_v39 }
0x18f1   :  { %3643 = vmatpush3.bf16.msra.mxu0 %v3905_v50 }
0x18f2   :  { %3644 = vmatprep.subr.bf16.mxu0 %v4166_v39 }
0x18f5   :  { %3645 = vmatpush3.bf16.msra.mxu0 %v3906_v16 }
0x18f6   :  { %3646 = vmatprep.subr.bf16.mxu0 %v4166_v39 }
0x18f9   :  { %3647 = vmatpush3.bf16.msra.mxu0 %v3907_v56 }
0x18fa   :  { %3648 = vmatprep.subr.bf16.mxu0 %v4166_v39 }
0x18fd   :  { %3649 = vmatpush3.bf16.msra.mxu0 %v3908_v35 }
0x18fe   :  { %3650 = vmatprep.subr.bf16.mxu0 %v4166_v39 }
0x1901   :  { %3651 = vmatpush3.bf16.msra.mxu0 %v3909_v0 }
0x1902   :  { %3652 = vmatprep.subr.bf16.mxu0 %v4166_v39 }
0x1905   :  { %3653 = vmatpush3.bf16.msra.mxu0 %v3910_v57 }
0x1906   :  { %3654 = vmatprep.subr.bf16.mxu0 %v4166_v39 }
0x19bf   :  { %v2433_v28 = vpop.f32.mrb[40].mxu0 }
0x19c0   :  { %v2439_v6 = vadd.f32 %v2433_v28, %v1666_v44  ;;  %v3618_v9 = vpop.f32.mrb[41].mxu0 }
0x19c1   :  { %v2436_v11 = vpop.f32.mrb[42].mxu0 }
0x19c2   :  { %v3005_v55 = vmul.f32 -1.442695, %v2439_v6  ;;  %v3619_v13 = vpop.f32.mrb[43].mxu0 }
0x19c4   :  { %4016 = vpow2.f32 %v3005_v55 }
0x19c5   :  { %4018 = vtanh.f32 %v2439_v6 }
0x19ce   :  { %v4017_v12 = vpop.eup %4016 }
0x19cf   :  { %v2444_v14 = vadd.f32 1.0, %v4017_v12  ;;  %v4019_v27 = vpop.eup %4018  ;;  %v1674_v12 = vadd.f32 %v4744_v10, %v4676_v52  ;;  %v2729_v52 = vld [vmem:[%s5017_s3 + $0x10] sm:$0xff]  ;;  %v4170_v10 = vmov 0.0|0.0  }
0x19d0   :  { %3727 = vmatprep.subr.bf16.mxu1 %v4170_v10 }
0x19d1   :  { %4020 = vrcp.f32 %v2444_v14 }
0x19db   :  { %v4021_v18 = vpop.eup %4020 }
0x19dc   :  { %v2447_v5 = vsel %vm113_vm9, %v4019_v27, %v4021_v18 }
0x19dd   :  { %2448 = vrot.lane.b32.xlu0 %v2447_v5, %s4157_s23  ;;  %v2453_v30 = vmul.f32 %v2447_v5, %v2330_v23 }
0x1a4f   :  { %v2449_v42 = vpop.permute.xlu0 %2448 }
0x1a50   :  { %v2450_v36 = vmul.f32 %v2449_v42, %v2447_v5 }
0x1a52   :  { %2451 = vrot.lane.b32.xlu1 %v2450_v36, %s4169_s1 }
0x1ac4   :  { %v2452_v33 = vpop.permute.xlu1 %2451 }
0x1ac5   :  { %v2454_v34 = vadd.f32 %v2453_v30, %v2452_v33  ;;  %v2733_v33 = vld [vmem:[%s5017_s3 + $0x30] sm:$0xff] }
0x1ac7   :  { %4022 = vtanh.f32 %v2454_v34  ;;  %v2457_v4 = vsel %vm114_vm11, %v2454_v34, 0.0  ;;  %v2734_v34 = vld [vmem:[%s5017_s3 + $0x38] sm:$0xff] }
0x1ac8   :  { %v4909_v51 = vsel %vm1250_vm7, %v2457_v4, %v2330_v23  ;;  %v3734_v23 = vpack.c.bf16 %v2732_v22, %v2731_v8 }
0x1ad1   :  { %v4023_v37 = vpop.eup %4022 }
0x1ad2   :  { %v2456_v29 = vmul.f32 %v4023_v37, %v2449_v42  ;;  %v2730_v42 = vld [vmem:[%s5017_s3 + $0x18] sm:$0xff] }
0x1ad3   :  { %v3731_v36 = vpack.c.bf16 %v2730_v42, %v2729_v52 }
0x1ad4   :  { %v2458_v60 = vsel %vm114_vm11, %v2456_v29, 0.0 }
0x1ad5   :  { %v2459_v38 = vsel %vm1250_vm7, %v2458_v60, %v2329_v1  ;;  %v2461_v40 = vsel %vm1250_vm7, %v2458_v60, 0.0  ;;  %v3911_v1 = vld [vmem:[#allocation11 + $0x38] sm:$0xff]   ;;  %v3737_v60 = vpack.c.bf16 %v2734_v34, %v2733_v33 }
0x1ad6   :  { %2462 = vst [vmem:[%s5025_s11 + $0x28] sm:$0xff] %v2461_v40  ;;  %v2464_v20 = vpack.c.bf16 %v2459_v38, %v2459_v38  ;;  %3655 = vmatpush3.bf16.msra.mxu0 %v3911_v1  ;;  %v2736_v40 = vld [vmem:[%s5017_s3 + $0x48] sm:$0xff] }
0x1ad8   :  { %3637 = vmatmul.mubr.bf16.vlgmr.msra.gmra.mrb[36].mxu1 %v2464_v20 }
0x1ad9   :  { %3692 = vmatprep.mubr.msk.f32.mxu1 %vm4168_vm8, %v4166_v39  ;;  %3729 = vmatpush3.bf16.msra.mxu1 %v3728_v58 }
0x1ada   :  { %3730 = vmatprep.subr.bf16.mxu1 %v4170_v10 }
0x1add   :  { %3732 = vmatpush3.bf16.msra.mxu1 %v3731_v36 }
0x1ade   :  { %3733 = vmatprep.subr.bf16.mxu1 %v4170_v10 }
0x1ae1   :  { %3735 = vmatpush3.bf16.msra.mxu1 %v3734_v23 }
0x1ae2   :  { %3736 = vmatprep.subr.bf16.mxu1 %v4170_v10 }
0x1ae5   :  { %3738 = vmatpush3.bf16.msra.mxu1 %v3737_v60 }
0x1ae6   :  { %3739 = vmatprep.subr.bf16.mxu1 %v4170_v10 }
0x1bab   :  { %v2563_v45 = vpop.f32.mrb[36].mxu1 }
0x1bac   :  { %v2569_v25 = vadd.f32 %v2563_v45, %v1671_v26  ;;  %v3638_v47 = vpop.f32.mrb[37].mxu1  ;;  %v2737_v26 = vld [vmem:[%s5017_s3 + $0x50] sm:$0xff]  ;;  %v2738_v45 = vld [vmem:[%s5017_s3 + $0x58] sm:$0xff] }
0x1bad   :  { %v2566_v48 = vpop.f32.mrb[38].mxu1  ;;  %v2739_v47 = vld [vmem:[%s5017_s3 + $0x60] sm:$0xff] }
0x1bae   :  { %v3014_v46 = vmul.f32 -1.442695, %v2569_v25  ;;  %v3639_v49 = vpop.f32.mrb[39].mxu1  ;;  %v2740_v48 = vld [vmem:[%s5017_s3 + $0x68] sm:$0xff] }
0x1baf   :  { %v2741_v49 = vld [vmem:[%s5017_s3 + $0x70] sm:$0xff] }
0x1bb0   :  { %4024 = vpow2.f32 %v3014_v46  ;;  %v3746_v46 = vpack.c.bf16 %v2740_v48, %v2739_v47 }
0x1bb1   :  { %4026 = vtanh.f32 %v2569_v25  ;;  %v3743_v25 = vpack.c.bf16 %v2738_v45, %v2737_v26 }
0x1bba   :  { %v4025_v32 = vpop.eup %4024 }
0x1bbb   :  { %v2574_v43 = vadd.f32 1.0, %v4025_v32  ;;  %v4027_v24 = vpop.eup %4026  ;;  %v2742_v32 = vld [vmem:[%s5017_s3 + $0x78] sm:$0xff] }
0x1bbc   :  { %v3749_v31 = vpack.c.bf16 %v2742_v32, %v2741_v49 }
0x1bbd   :  { %4028 = vrcp.f32 %v2574_v43 }
0x1bc7   :  { %v4029_v53 = vpop.eup %4028 }
0x1bc8   :  { %v2577_v54 = vsel %vm113_vm9, %v4027_v24, %v4029_v53 }
0x1bc9   :  { %2578 = vrot.lane.b32.xlu0 %v2577_v54, %s4157_s23  ;;  %v2583_v44 = vmul.f32 %v2577_v54, %v4909_v51 }
0x1c3b   :  { %v2579_v61 = vpop.permute.xlu0 %2578 }
0x1c3c   :  { %v2580_v62 = vmul.f32 %v2579_v61, %v2577_v54 }
0x1c3e   :  { %2581 = vrot.lane.b32.xlu1 %v2580_v62, %s4169_s1 }
0x1cb0   :  { %v2582_v28 = vpop.permute.xlu1 %2581 }
0x1cb1   :  { %v4912_v6 = vadd.f32 %v2583_v44, %v2582_v28 }
0x1cb3   :  { %4030 = vtanh.f32 %v4912_v6  ;;  %v2587_v16 = vsel %vm114_vm11, %v4912_v6, 0.0 }
0x1cb4   :  { %v2590_v24 = vsel %vm1386_vm4, %v2587_v16, %v4909_v51 }
0x1cbd   :  { %v4031_v9 = vpop.eup %4030 }
0x1cbe   :  { %v2586_v11 = vmul.f32 %v4031_v9, %v2579_v61 }
0x1cc0   :  { %v2588_v39 = vsel %vm114_vm11, %v2586_v11, 0.0 }
0x1cc1   :  { %v4919_v55 = vsel %vm1386_vm4, %v2588_v39, %v2459_v38  ;;  %v2591_v7 = vsel %vm1386_vm4, %v2588_v39, 0.0  ;;  %v2735_v38 = vld [vmem:[%s5017_s3 + $0x40] sm:$0xff] }
0x1cc2   :  { %2592 = vst [vmem:[%s5025_s11 + $0x30] sm:$0xff] %v2591_v7  ;;  %v2594_v13 = vpack.c.bf16 %v4919_v55, %v4919_v55  ;;  %v3740_v20 = vpack.c.bf16 %v2736_v40, %v2735_v38 }
0x1cc4   :  { %3657 = vmatmul.mubr.bf16.vlgmr.msra.gmra.mrb[44].mxu0 %v2594_v13  ;;  %3741 = vmatpush3.bf16.msra.mxu1 %v3740_v20 }
0x1cc5   :  { %3742 = vmatprep.subr.bf16.mxu1 %v4170_v10 }
0x1cc8   :  { %3744 = vmatpush3.bf16.msra.mxu1 %v3743_v25 }
0x1cc9   :  { %3745 = vmatprep.subr.bf16.mxu1 %v4170_v10 }
0x1ccc   :  { %3747 = vmatpush3.bf16.msra.mxu1 %v3746_v46 }
0x1ccd   :  { %3748 = vmatprep.subr.bf16.mxu1 %v4170_v10 }
0x1cd0   :  { %3750 = vmatpush3.bf16.msra.mxu1 %v3749_v31 }
0x1d97   :  { %v2693_v14 = vpop.f32.mrb[44].mxu0 }
0x1d98   :  { %v2699_v17 = vadd.f32 %v2693_v14, %v1674_v12  ;;  %v3658_v63 = vpop.f32.mrb[45].mxu0 }
0x1d99   :  { %v2696_v59 = vpop.f32.mrb[46].mxu0 }
0x1d9a   :  { %v3023_v27 = vmul.f32 -1.442695, %v2699_v17  ;;  %v3659_v18 = vpop.f32.mrb[47].mxu0 }
0x1d9c   :  { %4032 = vpow2.f32 %v3023_v27 }
0x1d9d   :  { %4034 = vtanh.f32 %v2699_v17 }
0x1da6   :  { %v4033_v5 = vpop.eup %4032 }
0x1da7   :  { %v2704_v19 = vadd.f32 1.0, %v4033_v5  ;;  %v4035_v30 = vpop.eup %4034 }
0x1da9   :  { %4036 = vrcp.f32 %v2704_v19 }
0x1db3   :  { %v4037_v37 = vpop.eup %4036 }
0x1db4   :  { %v2707_v29 = vsel %vm113_vm9, %v4035_v30, %v4037_v37 }
0x1db5   :  { %2708 = vrot.lane.b32.xlu0 %v2707_v29, %s4157_s23  ;;  %v2713_v53 = vmul.f32 %v2707_v29, %v2590_v24 }
0x1e27   :  { %v2709_v43 = vpop.permute.xlu0 %2708 }
0x1e28   :  { %v2710_v50 = vmul.f32 %v2709_v43, %v2707_v29 }
0x1e2a   :  { %2711 = vrot.lane.b32.xlu1 %v2710_v50, %s4169_s1 }
0x1e9c   :  { %v2712_v54 = vpop.permute.xlu1 %2711 }
0x1e9d   :  { %v2714_v56 = vadd.f32 %v2713_v53, %v2712_v54 }
0x1e9f   :  { %4038 = vtanh.f32 %v2714_v56  ;;  %v2717_v35 = vsel %vm114_vm11, %v2714_v56, 0.0 }
0x1ea0   :  { %v2720_v0 = vsel %vm1522_vm10, %v2717_v35, %v2590_v24 }
0x1ea1   :  { %3025 = vst [vmem:[%s5027_s13 + $0x8] sm:$0xff] %v2720_v0 }
0x1ea9   :  { %v4039_v57 = vpop.eup %4038 }
0x1eaa   :  { %v2716_v61 = vmul.f32 %v4039_v57, %v2709_v43 }
0x1eac   :  { %v2718_v2 = vsel %vm114_vm11, %v2716_v61, 0.0 }
0x1ead   :  { %v2719_v62 = vsel %vm1522_vm10, %v2718_v2, %v4919_v55  ;;  %v2721_v1 = vsel %vm1522_vm10, %v2718_v2, 0.0 }
0x1eae   :  { %2722 = vst [vmem:[%s5025_s11 + $0x38] sm:$0xff] %v2721_v1  ;;  %3024 = vst [vmem:[%s5026_s12 + $0x8] sm:$0xff] %v2719_v62  ;;  %3693 = vmatmul.mubr.f32.vlgmr.msra.gmra.mrb[40].mxu1 %v2719_v62 }
0x1f81   :  { %v2816_v4 = vpop.f32.mrb[40].mxu1 }
0x1f82   :  { %v2817_v51 = vadd.f32 %v3026_v41, %v2816_v4  ;;  %v3694_v44 = vpop.f32.mrb[41].mxu1 }
0x1f84   :  { %2820 = vst [vmem:[%s5028_s14] sm:$0xff] %v2817_v51 }
0x1f85   :  { %2837 = vsyncpa [#allocation5], 1 }
0x1f86   :  { %2838 = vsyncpa [#allocation7], 1 }
0x1f87   :  { %2839 = vsyncpa [#allocation10], 1 }

</bundles_post_ra>
